<compile_context>
chip_gen: v6e
topology: v6e:2x2x1
jax: 0.10.0
libtpu: 0.0.40
codegen_flags: <defaults>
</compile_context>

<pallas_src>
import math
import numpy as np

import jax
import jax.numpy as jnp
from jax.experimental import pallas as pl
from jax.experimental.pallas import tpu as pltpu

EPS = 1e-5
_VMEM_SPEC = pl.BlockSpec(memory_space=pltpu.MemorySpace.VMEM)


# ----------------------------------------------------------------------------
# Static plan: per-stage geometry + packed-param offsets, known at trace time.
# ----------------------------------------------------------------------------
def make_plan(cfg, masks, B, H, W, in_ch=3, num_classes=10):
    plan = []
    h, w, cin = H, W, in_ch
    mi = 0
    voff = 0
    for v in cfg[:-1]:
        if v == 'M':
            plan.append(dict(kind='pool', H=h, W=w, N=B * h * w,
                             No=B * (h // 2) * (w // 2), C=cin))
            h, w = h // 2, w // 2
        else:
            cout = int(np.asarray(masks[mi]).sum())
            plan.append(dict(kind='conv', H=h, W=w, N=B * h * w,
                             Cin=cin, Cout=cout, ci=mi,
                             g_off=voff, b_off=voff + cout))
            voff += 2 * cout
            cin = cout
            mi += 1
    # forward() does AvgPool2d(2) then Linear(cfg[-2], ...): needs a 2x2 map.
    assert h == 2 and w == 2, "cfg/input must leave a 2x2 feature map"
    hid, nc = cfg[-1], num_classes
    plan.append(dict(kind='head', B=B, S=h * w, Cp=cin, Cfull=cfg[-2],
                     Hid=hid, NC=nc,
                     g1_off=voff, be1_off=voff + hid, b2_off=voff + 2 * hid))
    vec_len = voff + 2 * hid + nc
    return plan, vec_len


# ----------------------------------------------------------------------------
# Constant helper matrices (built once, with numpy).
# ----------------------------------------------------------------------------
def _conv_tap_masks_rows(B, H, W):
    """[N, 9] 0/1: 3x3 tap t of output row n lies inside the image (lane-dense,
    channel-independent; broadcast over Cin lanes inside the kernel)."""
    N = B * H * W
    n = np.arange(N)
    y = (n % (H * W)) // W
    x = n % W
    m = np.zeros((N, 9), np.float32)
    for t in range(9):
        dy, dx = t // 3 - 1, t % 3 - 1
        ok = (y + dy >= 0) & (y + dy < H) & (x + dx >= 0) & (x + dx < W)
        m[:, t] = ok.astype(np.float32)
    return m


def _pack_masks(plan):
    """Pack all conv tap masks into one [Nmax, 9*n_conv] array (one DMA)."""
    convs = [op for op in plan if op['kind'] == 'conv']
    n_max = ((max(op['N'] for op in convs) + 7) // 8) * 8
    mp = np.zeros((n_max, 9 * len(convs)), np.float32)
    for op in convs:
        B_ = op['N'] // (op['H'] * op['W'])
        mp[:op['N'], 9 * op['ci']:9 * op['ci'] + 9] = \
            _conv_tap_masks_rows(B_, op['H'], op['W'])
    return mp


def _pool_select(B, H, W):
    """[No, N] 0/1 matrix selecting the 2x2-window anchor rows (stride 2)."""
    Ho, Wo = H // 2, W // 2
    No, N = B * Ho * Wo, B * H * W
    sel = np.zeros((No, N), np.float32)
    m = np.arange(No)
    b = m // (Ho * Wo)
    yo = (m % (Ho * Wo)) // Wo
    xo = m % Wo
    sel[m, b * H * W + 2 * yo * W + 2 * xo] = 1.0
    return sel


def _avgpool_matrix(B, S):
    """[B, B*S]: per-image mean over S spatial positions (AvgPool2d(2)->1x1)."""
    return np.kron(np.eye(B, dtype=np.float32),
                   np.full((1, S), 1.0 / S, np.float32))


# ----------------------------------------------------------------------------
# Parameters (deterministic, mirrors VGG_pruned._initialize_weights).
# Pure array pytree: jit-safe (no strings / python scalars).
# ----------------------------------------------------------------------------
def init_params(key, masks, plan, vec_len):
    keys = iter(jax.random.split(key, 16))
    conv_w, pool_sel, head = [], [], {}
    vec = np.zeros((1, vec_len), np.float32)
    for op in plan:
        if op['kind'] == 'conv':
            cin, cout = op['Cin'], op['Cout']
            n = 3 * 3 * cout
            w = jax.random.normal(next(keys), (cout, cin, 3, 3),
                                  jnp.float32) * math.sqrt(2.0 / n)
            # [9*Cin, Cout], row index = (ky*3+kx)*Cin + ci  (matches tap concat
            # order in the kernel).  Conv bias omitted: exactly cancelled by the
            # training-mode BN mean subtraction.
            conv_w.append(jnp.transpose(w, (2, 3, 1, 0))
                          .reshape(9 * cin, cout).astype(jnp.bfloat16))
            vec[0, op['g_off']:op['g_off'] + cout] = 0.5   # BN2d weight init
            # BN2d bias stays 0.
        elif op['kind'] == 'pool':
            B_ = op['N'] // (op['H'] * op['W'])
            pool_sel.append(jnp.asarray(_pool_select(B_, op['H'], op['W']),
                                        jnp.bfloat16))
        else:  # head
            hid, nc, cp, cfull = op['Hid'], op['NC'], op['Cp'], op['Cfull']
            w1 = jax.random.normal(next(keys), (hid, cfull), jnp.float32) * 0.01
            w2 = jax.random.normal(next(keys), (nc, hid), jnp.float32) * 0.01
            idx = np.nonzero(np.asarray(masks[-1]))[0]
            assert len(idx) == cp
            head['ap'] = jnp.asarray(_avgpool_matrix(op['B'], op['S']),
                                     jnp.bfloat16)
            head['w1'] = jnp.transpose(w1[:, idx]).astype(jnp.bfloat16)  # scatter folded in
            head['w2'] = jnp.transpose(w2).astype(jnp.bfloat16)
            vec[0, op['g1_off']:op['g1_off'] + hid] = 1.0   # BN1d default weight
            # BN1d bias, classifier bias b2 stay 0; linear1 bias dropped
            # (exactly cancelled by the BN1d mean subtraction).
    return dict(conv_w=conv_w, pool_sel=pool_sel,
                mask_pack=jnp.asarray(_pack_masks(plan)),
                vec=jnp.asarray(vec), **head)


# ----------------------------------------------------------------------------
# The single fused kernel body (no scratch refs: taps are value slices).
# ----------------------------------------------------------------------------
def _fused_forward_body(plan, in_refs, o_ref):
    x_ref, mask_ref, vec_ref = in_refs[0], in_refs[1], in_refs[2]
    layer_refs = in_refs[3:]
    x = x_ref[...]                          # [B*H*W, Cin0] f32, channels on lanes
    li = 0
    for op in plan:
        if op['kind'] == 'conv':
            w_ref = layer_refs[li]; li += 1
            N, W, Cin, Cout, ci = op['N'], op['W'], op['Cin'], op['Cout'], op['ci']
            P = W + 1
            zp = jnp.zeros((P, Cin), jnp.float32)
            xp = jnp.concatenate([zp, x, zp], axis=0)     # zero rows == conv zero padding
            mcols = mask_ref[0:N, 9 * ci:9 * ci + 9]      # [N, 9] image-border masks
            taps = []
            for t in range(9):
                dy, dx = t // 3 - 1, t % 3 - 1
                s = P + dy * W + dx
                tap = xp[s:s + N, :]                      # [N, Cin] shifted tap
                if not (dy == 0 and dx == 0):
                    tap = tap * mcols[:, t:t + 1]         # zero taps outside the image
                taps.append(tap)
            # One lane-dense patch matrix -> ONE MXU matmul (K = 9*Cin).
            patch = jnp.concatenate(taps, axis=1).astype(jnp.bfloat16)   # [N, 9*Cin]
            acc = jnp.dot(patch, w_ref[...], preferred_element_type=jnp.float32)
            g = vec_ref[:, op['g_off']:op['g_off'] + Cout]
            b = vec_ref[:, op['b_off']:op['b_off'] + Cout]
            mean = jnp.mean(acc, axis=0, keepdims=True)    # BN2d, batch stats (f32)
            var = jnp.mean((acc - mean) ** 2, axis=0, keepdims=True)
            x = jnp.maximum((acc - mean) * (g * jax.lax.rsqrt(var + EPS)) + b, 0.0)
        elif op['kind'] == 'pool':
            sel_ref = layer_refs[li]; li += 1
            N, W = op['N'], op['W']
            P = W + 1
            zp = jnp.zeros((P, op['C']), jnp.float32)
            xp = jnp.concatenate([x, zp], axis=0)          # bottom pad only
            wmax = jnp.maximum(
                jnp.maximum(xp[0:N, :], xp[1:N + 1, :]),
                jnp.maximum(xp[W:W + N, :], xp[W + 1:W + 1 + N, :]))
            # TODO(synk): O(No*N) selection matmul for the stride-2 compaction;
            # replace with a strided scratch load (ref[pl.ds(..., stride=2)])
            # before scaling past toy shapes.
            x = jnp.dot(sel_ref[...], wmax.astype(jnp.bfloat16),
                        preferred_element_type=jnp.float32)
        else:  # head: AvgPool2d(2) + (scatter-folded) Linear + BN1d + ReLU + Linear
            ap_ref, w1_ref, w2_ref = layer_refs[li:li + 3]; li += 3
            Hid, NC = op['Hid'], op['NC']
            xm = jnp.dot(ap_ref[...], x.astype(jnp.bfloat16),
                         preferred_element_type=jnp.float32)       # [B, Cp]
            h = jnp.dot(xm.astype(jnp.bfloat16), w1_ref[...],
                        preferred_element_type=jnp.float32)        # linear1, bias dropped
            g1 = vec_ref[:, op['g1_off']:op['g1_off'] + Hid]
            be1 = vec_ref[:, op['be1_off']:op['be1_off'] + Hid]
            b2 = vec_ref[:, op['b2_off']:op['b2_off'] + NC]
            mean = jnp.mean(h, axis=0, keepdims=True)               # BN1d, batch stats
            var = jnp.mean((h - mean) ** 2, axis=0, keepdims=True)
            h = jnp.maximum((h - mean) * (g1 * jax.lax.rsqrt(var + EPS)) + be1, 0.0)
            o_ref[...] = jnp.dot(h.astype(jnp.bfloat16), w2_ref[...],
                                 preferred_element_type=jnp.float32) + b2


# ----------------------------------------------------------------------------
# Wrapper: one pallas_call, everything VMEM-resident.
# ----------------------------------------------------------------------------
def vgg_pruned_forward(x_nchw, params, plan):
    B, C0, H, W = x_nchw.shape
    x0 = jnp.transpose(x_nchw, (0, 2, 3, 1)).reshape(B * H * W, C0)

    inputs = [x0, params['mask_pack'], params['vec']]
    flops = 0
    ci = pi = 0
    for op in plan:
        if op['kind'] == 'conv':
            inputs.append(params['conv_w'][ci]); ci += 1
            flops += 2 * op['N'] * 9 * op['Cin'] * op['Cout']
        elif op['kind'] == 'pool':
            inputs.append(params['pool_sel'][pi]); pi += 1
            flops += 2 * op['No'] * op['N'] * op['C'] + 3 * op['N'] * op['C']
        else:
            inputs += [params['ap'], params['w1'], params['w2']]
            flops += (2 * op['B'] * op['B'] * op['S'] * op['Cp']
                      + 2 * op['B'] * op['Cp'] * op['Hid']
                      + 2 * op['B'] * op['Hid'] * op['NC'])

    nc = plan[-1]['NC']
    n_in = len(inputs)
    bytes_accessed = (sum(int(np.prod(a.shape)) * a.dtype.itemsize for a in inputs)
                      + B * nc * 4)
    transc = sum(op.get('Cout', 0) for op in plan) + plan[-1]['Hid']
    # Explicit VMEM budget (headroom for tile padding / temporaries); clamped to
    # v7x's 64 MiB physical VMEM (v5e/v6e have 128 MiB, so always safe).
    vmem_limit = int(min(64 * 1024 * 1024, max(16 * 1024 * 1024, 8 * bytes_accessed)))

    def kernel(*refs):
        _fused_forward_body(plan, refs[:n_in], refs[n_in])

    out = pl.pallas_call(
        kernel,
        out_shape=jax.ShapeDtypeStruct((B, nc), jnp.float32),
        in_specs=[_VMEM_SPEC] * n_in,
        out_specs=_VMEM_SPEC,
        compiler_params=pltpu.CompilerParams(vmem_limit_bytes=vmem_limit),
        cost_estimate=pl.CostEstimate(flops=flops, transcendentals=transc,
                                      bytes_accessed=bytes_accessed),
    )(*inputs)
    return out, [jnp.zeros_like(out)]


if __name__ == "__main__":
    # Small config consistent with the module: 3 convs, 2 maxpools; the 2x2
    # feature map is AvgPool2d(2)-ed to 1x1, so classifier input = cfg[-2].
    cfg = [8, 'M', 8, 'M', 16, 16]
    masks = [(np.arange(v) % 4 != 3).astype(np.int32)
             for v in cfg[:-1] if v != 'M']          # keep 6, 6, 12 channels

    B, C0, H, W = 2, 3, 8, 8
    plan, vec_len = make_plan(cfg, masks, B, H, W, in_ch=C0, num_classes=10)

    key = jax.random.PRNGKey(0)
    kx, kp = jax.random.split(key)
    x = jax.random.normal(kx, (B, C0, H, W), jnp.float32)   # NCHW like PyTorch

    params = init_params(kp, masks, plan, vec_len)          # array-only pytree
    fwd = jax.jit(lambda xx, pp: vgg_pruned_forward(xx, pp, plan))
    out, aux = fwd(x, params)
    out = jax.block_until_ready(out)
    assert out.shape == (B, 10) and aux[0].shape == (B, 10)
    assert bool(jnp.all(jnp.isfinite(out)))
    print("KERNEL_OK")
</pallas_src>

<mosaic_0001>
module attributes {stable_mosaic.version = 11 : i64} {
  func.func @kernel(%arg0: memref<128x3xf32, #tpu.memory_space<vmem>>, %arg1: memref<128x27xf32, #tpu.memory_space<vmem>>, %arg2: memref<1x90xf32, #tpu.memory_space<vmem>>, %arg3: memref<27x6xbf16, #tpu.memory_space<vmem>>, %arg4: memref<32x128xbf16, #tpu.memory_space<vmem>>, %arg5: memref<54x6xbf16, #tpu.memory_space<vmem>>, %arg6: memref<8x32xbf16, #tpu.memory_space<vmem>>, %arg7: memref<54x12xbf16, #tpu.memory_space<vmem>>, %arg8: memref<2x8xbf16, #tpu.memory_space<vmem>>, %arg9: memref<12x16xbf16, #tpu.memory_space<vmem>>, %arg10: memref<16x10xbf16, #tpu.memory_space<vmem>>, %arg11: memref<2x10xf32, #tpu.memory_space<vmem>>) attributes {dimension_semantics = [], scalar_prefetch = 0 : i64, scratch_operands = 0 : i64, tpu.core_type = #tpu.core_type<tc>} {
    %c0 = arith.constant 0 : index
    %c0_0 = arith.constant 0 : index
    %0 = vector.load %arg0[%c0, %c0_0] : memref<128x3xf32, #tpu.memory_space<vmem>>, vector<128x3xf32>
    %cst = arith.constant 0.000000e+00 : f32
    %1 = vector.broadcast %cst : f32 to vector<9x3xf32>
    %2 = tpu.concatenate %1, %0, %1 in 0 : vector<9x3xf32>, vector<128x3xf32>, vector<9x3xf32> -> vector<146x3xf32>
    %c0_1 = arith.constant 0 : index
    %c0_2 = arith.constant 0 : index
    %3 = vector.load %arg1[%c0_1, %c0_2] : memref<128x27xf32, #tpu.memory_space<vmem>>, vector<128x9xf32>
    %4 = vector.extract_strided_slice %2 {offsets = [0, 0], sizes = [128, 3], strides = [1, 1]} : vector<146x3xf32> to vector<128x3xf32>
    %5 = vector.extract_strided_slice %3 {offsets = [0, 0], sizes = [128, 1], strides = [1, 1]} : vector<128x9xf32> to vector<128x1xf32>
    %6 = vector.broadcast %5 : vector<128x1xf32> to vector<128x3xf32>
    %7 = arith.mulf %4, %6 : vector<128x3xf32>
    %8 = vector.extract_strided_slice %2 {offsets = [1, 0], sizes = [128, 3], strides = [1, 1]} : vector<146x3xf32> to vector<128x3xf32>
    %9 = vector.extract_strided_slice %3 {offsets = [0, 1], sizes = [128, 1], strides = [1, 1]} : vector<128x9xf32> to vector<128x1xf32>
    %10 = vector.broadcast %9 : vector<128x1xf32> to vector<128x3xf32>
    %11 = arith.mulf %8, %10 : vector<128x3xf32>
    %12 = vector.extract_strided_slice %2 {offsets = [2, 0], sizes = [128, 3], strides = [1, 1]} : vector<146x3xf32> to vector<128x3xf32>
    %13 = vector.extract_strided_slice %3 {offsets = [0, 2], sizes = [128, 1], strides = [1, 1]} : vector<128x9xf32> to vector<128x1xf32>
    %14 = vector.broadcast %13 : vector<128x1xf32> to vector<128x3xf32>
    %15 = arith.mulf %12, %14 : vector<128x3xf32>
    %16 = vector.extract_strided_slice %2 {offsets = [8, 0], sizes = [128, 3], strides = [1, 1]} : vector<146x3xf32> to vector<128x3xf32>
    %17 = vector.extract_strided_slice %3 {offsets = [0, 3], sizes = [128, 1], strides = [1, 1]} : vector<128x9xf32> to vector<128x1xf32>
    %18 = vector.broadcast %17 : vector<128x1xf32> to vector<128x3xf32>
    %19 = arith.mulf %16, %18 : vector<128x3xf32>
    %20 = vector.extract_strided_slice %2 {offsets = [9, 0], sizes = [128, 3], strides = [1, 1]} : vector<146x3xf32> to vector<128x3xf32>
    %21 = vector.extract_strided_slice %2 {offsets = [10, 0], sizes = [128, 3], strides = [1, 1]} : vector<146x3xf32> to vector<128x3xf32>
    %22 = vector.extract_strided_slice %3 {offsets = [0, 5], sizes = [128, 1], strides = [1, 1]} : vector<128x9xf32> to vector<128x1xf32>
    %23 = vector.broadcast %22 : vector<128x1xf32> to vector<128x3xf32>
    %24 = arith.mulf %21, %23 : vector<128x3xf32>
    %25 = vector.extract_strided_slice %2 {offsets = [16, 0], sizes = [128, 3], strides = [1, 1]} : vector<146x3xf32> to vector<128x3xf32>
    %26 = vector.extract_strided_slice %3 {offsets = [0, 6], sizes = [128, 1], strides = [1, 1]} : vector<128x9xf32> to vector<128x1xf32>
    %27 = vector.broadcast %26 : vector<128x1xf32> to vector<128x3xf32>
    %28 = arith.mulf %25, %27 : vector<128x3xf32>
    %29 = vector.extract_strided_slice %2 {offsets = [17, 0], sizes = [128, 3], strides = [1, 1]} : vector<146x3xf32> to vector<128x3xf32>
    %30 = vector.extract_strided_slice %3 {offsets = [0, 7], sizes = [128, 1], strides = [1, 1]} : vector<128x9xf32> to vector<128x1xf32>
    %31 = vector.broadcast %30 : vector<128x1xf32> to vector<128x3xf32>
    %32 = arith.mulf %29, %31 : vector<128x3xf32>
    %33 = vector.extract_strided_slice %2 {offsets = [18, 0], sizes = [128, 3], strides = [1, 1]} : vector<146x3xf32> to vector<128x3xf32>
    %34 = vector.extract_strided_slice %3 {offsets = [0, 8], sizes = [128, 1], strides = [1, 1]} : vector<128x9xf32> to vector<128x1xf32>
    %35 = vector.broadcast %34 : vector<128x1xf32> to vector<128x3xf32>
    %36 = arith.mulf %33, %35 : vector<128x3xf32>
    %37 = tpu.concatenate %7, %11, %15, %19, %20, %24, %28, %32, %36 in 1 : vector<128x3xf32>, vector<128x3xf32>, vector<128x3xf32>, vector<128x3xf32>, vector<128x3xf32>, vector<128x3xf32>, vector<128x3xf32>, vector<128x3xf32>, vector<128x3xf32> -> vector<128x27xf32>
    %38 = arith.truncf %37 : vector<128x27xf32> to vector<128x27xbf16>
    %c0_3 = arith.constant 0 : index
    %c0_4 = arith.constant 0 : index
    %39 = vector.load %arg3[%c0_3, %c0_4] : memref<27x6xbf16, #tpu.memory_space<vmem>>, vector<27x6xbf16>
    %cst_5 = arith.constant dense<0.000000e+00> : vector<128x6xf32>
    %40 = tpu.matmul %38, %39, %cst_5 {dimension_numbers = #tpu.dot_dimension_numbers<[1], [0], [0], [1], [0, 0, 1, 1], [], []>} : vector<128x27xbf16>, vector<27x6xbf16>, vector<128x6xf32> -> vector<128x6xf32>
    %c0_6 = arith.constant 0 : index
    %c0_7 = arith.constant 0 : index
    %41 = vector.load %arg2[%c0_6, %c0_7] : memref<1x90xf32, #tpu.memory_space<vmem>>, vector<1x6xf32>
    %c0_8 = arith.constant 0 : index
    %c6 = arith.constant 6 : index
    %42 = vector.load %arg2[%c0_8, %c6] : memref<1x90xf32, #tpu.memory_space<vmem>>, vector<1x6xf32>
    %cst_9 = arith.constant dense<0.000000e+00> : vector<6xf32>
    %43 = vector.multi_reduction <add>, %40, %cst_9 [0] : vector<128x6xf32> to vector<6xf32>
    %44 = vector.shape_cast %43 : vector<6xf32> to vector<1x6xf32>
    %cst_10 = arith.constant 1.280000e+02 : f32
    %45 = vector.broadcast %cst_10 : f32 to vector<1x6xf32>
    %46 = arith.divf %44, %45 : vector<1x6xf32>
    %47 = vector.broadcast %46 : vector<1x6xf32> to vector<128x6xf32>
    %48 = arith.subf %40, %47 : vector<128x6xf32>
    %49 = arith.mulf %48, %48 : vector<128x6xf32>
    %cst_11 = arith.constant dense<0.000000e+00> : vector<6xf32>
    %50 = vector.multi_reduction <add>, %49, %cst_11 [0] : vector<128x6xf32> to vector<6xf32>
    %51 = vector.shape_cast %50 : vector<6xf32> to vector<1x6xf32>
    %cst_12 = arith.constant 1.280000e+02 : f32
    %52 = vector.broadcast %cst_12 : f32 to vector<1x6xf32>
    %53 = arith.divf %51, %52 : vector<1x6xf32>
    %54 = vector.broadcast %46 : vector<1x6xf32> to vector<128x6xf32>
    %55 = arith.subf %40, %54 : vector<128x6xf32>
    %cst_13 = arith.constant 9.99999974E-6 : f32
    %56 = vector.broadcast %cst_13 : f32 to vector<1x6xf32>
    %57 = arith.addf %53, %56 : vector<1x6xf32>
    %58 = math.rsqrt %57 : vector<1x6xf32>
    %59 = arith.mulf %41, %58 : vector<1x6xf32>
    %60 = vector.broadcast %59 : vector<1x6xf32> to vector<128x6xf32>
    %61 = arith.mulf %55, %60 : vector<128x6xf32>
    %62 = vector.broadcast %42 : vector<1x6xf32> to vector<128x6xf32>
    %63 = arith.addf %61, %62 : vector<128x6xf32>
    %cst_14 = arith.constant 0.000000e+00 : f32
    %64 = vector.broadcast %cst_14 : f32 to vector<128x6xf32>
    %65 = arith.maximumf %63, %64 : vector<128x6xf32>
    %cst_15 = arith.constant 0.000000e+00 : f32
    %66 = vector.broadcast %cst_15 : f32 to vector<9x6xf32>
    %67 = tpu.concatenate %65, %66 in 0 : vector<128x6xf32>, vector<9x6xf32> -> vector<137x6xf32>
    %68 = vector.extract_strided_slice %67 {offsets = [0, 0], sizes = [128, 6], strides = [1, 1]} : vector<137x6xf32> to vector<128x6xf32>
    %69 = vector.extract_strided_slice %67 {offsets = [1, 0], sizes = [128, 6], strides = [1, 1]} : vector<137x6xf32> to vector<128x6xf32>
    %70 = arith.maximumf %68, %69 : vector<128x6xf32>
    %71 = vector.extract_strided_slice %67 {offsets = [8, 0], sizes = [128, 6], strides = [1, 1]} : vector<137x6xf32> to vector<128x6xf32>
    %72 = vector.extract_strided_slice %67 {offsets = [9, 0], sizes = [128, 6], strides = [1, 1]} : vector<137x6xf32> to vector<128x6xf32>
    %73 = arith.maximumf %71, %72 : vector<128x6xf32>
    %74 = arith.maximumf %70, %73 : vector<128x6xf32>
    %c0_16 = arith.constant 0 : index
    %c0_17 = arith.constant 0 : index
    %75 = vector.load %arg4[%c0_16, %c0_17] : memref<32x128xbf16, #tpu.memory_space<vmem>>, vector<32x128xbf16>
    %76 = arith.truncf %74 : vector<128x6xf32> to vector<128x6xbf16>
    %cst_18 = arith.constant dense<0.000000e+00> : vector<32x6xf32>
    %77 = tpu.matmul %75, %76, %cst_18 {dimension_numbers = #tpu.dot_dimension_numbers<[1], [0], [0], [1], [0, 0, 1, 1], [], []>} : vector<32x128xbf16>, vector<128x6xbf16>, vector<32x6xf32> -> vector<32x6xf32>
    %cst_19 = arith.constant 0.000000e+00 : f32
    %78 = vector.broadcast %cst_19 : f32 to vector<5x6xf32>
    %79 = tpu.concatenate %78, %77, %78 in 0 : vector<5x6xf32>, vector<32x6xf32>, vector<5x6xf32> -> vector<42x6xf32>
    %c0_20 = arith.constant 0 : index
    %c9 = arith.constant 9 : index
    %80 = vector.load %arg1[%c0_20, %c9] : memref<128x27xf32, #tpu.memory_space<vmem>>, vector<32x9xf32>
    %81 = vector.extract_strided_slice %79 {offsets = [0, 0], sizes = [32, 6], strides = [1, 1]} : vector<42x6xf32> to vector<32x6xf32>
    %82 = vector.extract_strided_slice %80 {offsets = [0, 0], sizes = [32, 1], strides = [1, 1]} : vector<32x9xf32> to vector<32x1xf32>
    %83 = vector.broadcast %82 : vector<32x1xf32> to vector<32x6xf32>
    %84 = arith.mulf %81, %83 : vector<32x6xf32>
    %85 = vector.extract_strided_slice %79 {offsets = [1, 0], sizes = [32, 6], strides = [1, 1]} : vector<42x6xf32> to vector<32x6xf32>
    %86 = vector.extract_strided_slice %80 {offsets = [0, 1], sizes = [32, 1], strides = [1, 1]} : vector<32x9xf32> to vector<32x1xf32>
    %87 = vector.broadcast %86 : vector<32x1xf32> to vector<32x6xf32>
    %88 = arith.mulf %85, %87 : vector<32x6xf32>
    %89 = vector.extract_strided_slice %79 {offsets = [2, 0], sizes = [32, 6], strides = [1, 1]} : vector<42x6xf32> to vector<32x6xf32>
    %90 = vector.extract_strided_slice %80 {offsets = [0, 2], sizes = [32, 1], strides = [1, 1]} : vector<32x9xf32> to vector<32x1xf32>
    %91 = vector.broadcast %90 : vector<32x1xf32> to vector<32x6xf32>
    %92 = arith.mulf %89, %91 : vector<32x6xf32>
    %93 = vector.extract_strided_slice %79 {offsets = [4, 0], sizes = [32, 6], strides = [1, 1]} : vector<42x6xf32> to vector<32x6xf32>
    %94 = vector.extract_strided_slice %80 {offsets = [0, 3], sizes = [32, 1], strides = [1, 1]} : vector<32x9xf32> to vector<32x1xf32>
    %95 = vector.broadcast %94 : vector<32x1xf32> to vector<32x6xf32>
    %96 = arith.mulf %93, %95 : vector<32x6xf32>
    %97 = vector.extract_strided_slice %79 {offsets = [5, 0], sizes = [32, 6], strides = [1, 1]} : vector<42x6xf32> to vector<32x6xf32>
    %98 = vector.extract_strided_slice %79 {offsets = [6, 0], sizes = [32, 6], strides = [1, 1]} : vector<42x6xf32> to vector<32x6xf32>
    %99 = vector.extract_strided_slice %80 {offsets = [0, 5], sizes = [32, 1], strides = [1, 1]} : vector<32x9xf32> to vector<32x1xf32>
    %100 = vector.broadcast %99 : vector<32x1xf32> to vector<32x6xf32>
    %101 = arith.mulf %98, %100 : vector<32x6xf32>
    %102 = vector.extract_strided_slice %79 {offsets = [8, 0], sizes = [32, 6], strides = [1, 1]} : vector<42x6xf32> to vector<32x6xf32>
    %103 = vector.extract_strided_slice %80 {offsets = [0, 6], sizes = [32, 1], strides = [1, 1]} : vector<32x9xf32> to vector<32x1xf32>
    %104 = vector.broadcast %103 : vector<32x1xf32> to vector<32x6xf32>
    %105 = arith.mulf %102, %104 : vector<32x6xf32>
    %106 = vector.extract_strided_slice %79 {offsets = [9, 0], sizes = [32, 6], strides = [1, 1]} : vector<42x6xf32> to vector<32x6xf32>
    %107 = vector.extract_strided_slice %80 {offsets = [0, 7], sizes = [32, 1], strides = [1, 1]} : vector<32x9xf32> to vector<32x1xf32>
    %108 = vector.broadcast %107 : vector<32x1xf32> to vector<32x6xf32>
    %109 = arith.mulf %106, %108 : vector<32x6xf32>
    %110 = vector.extract_strided_slice %79 {offsets = [10, 0], sizes = [32, 6], strides = [1, 1]} : vector<42x6xf32> to vector<32x6xf32>
    %111 = vector.extract_strided_slice %80 {offsets = [0, 8], sizes = [32, 1], strides = [1, 1]} : vector<32x9xf32> to vector<32x1xf32>
    %112 = vector.broadcast %111 : vector<32x1xf32> to vector<32x6xf32>
    %113 = arith.mulf %110, %112 : vector<32x6xf32>
    %114 = tpu.concatenate %84, %88, %92, %96, %97, %101, %105, %109, %113 in 1 : vector<32x6xf32>, vector<32x6xf32>, vector<32x6xf32>, vector<32x6xf32>, vector<32x6xf32>, vector<32x6xf32>, vector<32x6xf32>, vector<32x6xf32>, vector<32x6xf32> -> vector<32x54xf32>
    %115 = arith.truncf %114 : vector<32x54xf32> to vector<32x54xbf16>
    %c0_21 = arith.constant 0 : index
    %c0_22 = arith.constant 0 : index
    %116 = vector.load %arg5[%c0_21, %c0_22] : memref<54x6xbf16, #tpu.memory_space<vmem>>, vector<54x6xbf16>
    %cst_23 = arith.constant dense<0.000000e+00> : vector<32x6xf32>
    %117 = tpu.matmul %115, %116, %cst_23 {dimension_numbers = #tpu.dot_dimension_numbers<[1], [0], [0], [1], [0, 0, 1, 1], [], []>} : vector<32x54xbf16>, vector<54x6xbf16>, vector<32x6xf32> -> vector<32x6xf32>
    %c0_24 = arith.constant 0 : index
    %c12 = arith.constant 12 : index
    %118 = vector.load %arg2[%c0_24, %c12] : memref<1x90xf32, #tpu.memory_space<vmem>>, vector<1x6xf32>
    %c0_25 = arith.constant 0 : index
    %c18 = arith.constant 18 : index
    %119 = vector.load %arg2[%c0_25, %c18] : memref<1x90xf32, #tpu.memory_space<vmem>>, vector<1x6xf32>
    %cst_26 = arith.constant dense<0.000000e+00> : vector<6xf32>
    %120 = vector.multi_reduction <add>, %117, %cst_26 [0] : vector<32x6xf32> to vector<6xf32>
    %121 = vector.shape_cast %120 : vector<6xf32> to vector<1x6xf32>
    %cst_27 = arith.constant 3.200000e+01 : f32
    %122 = vector.broadcast %cst_27 : f32 to vector<1x6xf32>
    %123 = arith.divf %121, %122 : vector<1x6xf32>
    %124 = vector.broadcast %123 : vector<1x6xf32> to vector<32x6xf32>
    %125 = arith.subf %117, %124 : vector<32x6xf32>
    %126 = arith.mulf %125, %125 : vector<32x6xf32>
    %cst_28 = arith.constant dense<0.000000e+00> : vector<6xf32>
    %127 = vector.multi_reduction <add>, %126, %cst_28 [0] : vector<32x6xf32> to vector<6xf32>
    %128 = vector.shape_cast %127 : vector<6xf32> to vector<1x6xf32>
    %cst_29 = arith.constant 3.200000e+01 : f32
    %129 = vector.broadcast %cst_29 : f32 to vector<1x6xf32>
    %130 = arith.divf %128, %129 : vector<1x6xf32>
    %131 = vector.broadcast %123 : vector<1x6xf32> to vector<32x6xf32>
    %132 = arith.subf %117, %131 : vector<32x6xf32>
    %cst_30 = arith.constant 9.99999974E-6 : f32
    %133 = vector.broadcast %cst_30 : f32 to vector<1x6xf32>
    %134 = arith.addf %130, %133 : vector<1x6xf32>
    %135 = math.rsqrt %134 : vector<1x6xf32>
    %136 = arith.mulf %118, %135 : vector<1x6xf32>
    %137 = vector.broadcast %136 : vector<1x6xf32> to vector<32x6xf32>
    %138 = arith.mulf %132, %137 : vector<32x6xf32>
    %139 = vector.broadcast %119 : vector<1x6xf32> to vector<32x6xf32>
    %140 = arith.addf %138, %139 : vector<32x6xf32>
    %cst_31 = arith.constant 0.000000e+00 : f32
    %141 = vector.broadcast %cst_31 : f32 to vector<32x6xf32>
    %142 = arith.maximumf %140, %141 : vector<32x6xf32>
    %cst_32 = arith.constant 0.000000e+00 : f32
    %143 = vector.broadcast %cst_32 : f32 to vector<5x6xf32>
    %144 = tpu.concatenate %142, %143 in 0 : vector<32x6xf32>, vector<5x6xf32> -> vector<37x6xf32>
    %145 = vector.extract_strided_slice %144 {offsets = [0, 0], sizes = [32, 6], strides = [1, 1]} : vector<37x6xf32> to vector<32x6xf32>
    %146 = vector.extract_strided_slice %144 {offsets = [1, 0], sizes = [32, 6], strides = [1, 1]} : vector<37x6xf32> to vector<32x6xf32>
    %147 = arith.maximumf %145, %146 : vector<32x6xf32>
    %148 = vector.extract_strided_slice %144 {offsets = [4, 0], sizes = [32, 6], strides = [1, 1]} : vector<37x6xf32> to vector<32x6xf32>
    %149 = vector.extract_strided_slice %144 {offsets = [5, 0], sizes = [32, 6], strides = [1, 1]} : vector<37x6xf32> to vector<32x6xf32>
    %150 = arith.maximumf %148, %149 : vector<32x6xf32>
    %151 = arith.maximumf %147, %150 : vector<32x6xf32>
    %c0_33 = arith.constant 0 : index
    %c0_34 = arith.constant 0 : index
    %152 = vector.load %arg6[%c0_33, %c0_34] : memref<8x32xbf16, #tpu.memory_space<vmem>>, vector<8x32xbf16>
    %153 = arith.truncf %151 : vector<32x6xf32> to vector<32x6xbf16>
    %cst_35 = arith.constant dense<0.000000e+00> : vector<8x6xf32>
    %154 = tpu.matmul %152, %153, %cst_35 {dimension_numbers = #tpu.dot_dimension_numbers<[1], [0], [0], [1], [0, 0, 1, 1], [], []>} : vector<8x32xbf16>, vector<32x6xbf16>, vector<8x6xf32> -> vector<8x6xf32>
    %cst_36 = arith.constant 0.000000e+00 : f32
    %155 = vector.broadcast %cst_36 : f32 to vector<3x6xf32>
    %156 = tpu.concatenate %155, %154, %155 in 0 : vector<3x6xf32>, vector<8x6xf32>, vector<3x6xf32> -> vector<14x6xf32>
    %c0_37 = arith.constant 0 : index
    %c18_38 = arith.constant 18 : index
    %157 = vector.load %arg1[%c0_37, %c18_38] : memref<128x27xf32, #tpu.memory_space<vmem>>, vector<8x9xf32>
    %158 = vector.extract_strided_slice %156 {offsets = [0, 0], sizes = [8, 6], strides = [1, 1]} : vector<14x6xf32> to vector<8x6xf32>
    %159 = vector.extract_strided_slice %157 {offsets = [0, 0], sizes = [8, 1], strides = [1, 1]} : vector<8x9xf32> to vector<8x1xf32>
    %160 = vector.broadcast %159 : vector<8x1xf32> to vector<8x6xf32>
    %161 = arith.mulf %158, %160 : vector<8x6xf32>
    %162 = vector.extract_strided_slice %156 {offsets = [1, 0], sizes = [8, 6], strides = [1, 1]} : vector<14x6xf32> to vector<8x6xf32>
    %163 = vector.extract_strided_slice %157 {offsets = [0, 1], sizes = [8, 1], strides = [1, 1]} : vector<8x9xf32> to vector<8x1xf32>
    %164 = vector.broadcast %163 : vector<8x1xf32> to vector<8x6xf32>
    %165 = arith.mulf %162, %164 : vector<8x6xf32>
    %166 = vector.extract_strided_slice %156 {offsets = [2, 0], sizes = [8, 6], strides = [1, 1]} : vector<14x6xf32> to vector<8x6xf32>
    %167 = vector.extract_strided_slice %157 {offsets = [0, 2], sizes = [8, 1], strides = [1, 1]} : vector<8x9xf32> to vector<8x1xf32>
    %168 = vector.broadcast %167 : vector<8x1xf32> to vector<8x6xf32>
    %169 = arith.mulf %166, %168 : vector<8x6xf32>
    %170 = vector.extract_strided_slice %156 {offsets = [2, 0], sizes = [8, 6], strides = [1, 1]} : vector<14x6xf32> to vector<8x6xf32>
    %171 = vector.extract_strided_slice %157 {offsets = [0, 3], sizes = [8, 1], strides = [1, 1]} : vector<8x9xf32> to vector<8x1xf32>
    %172 = vector.broadcast %171 : vector<8x1xf32> to vector<8x6xf32>
    %173 = arith.mulf %170, %172 : vector<8x6xf32>
    %174 = vector.extract_strided_slice %156 {offsets = [3, 0], sizes = [8, 6], strides = [1, 1]} : vector<14x6xf32> to vector<8x6xf32>
    %175 = vector.extract_strided_slice %156 {offsets = [4, 0], sizes = [8, 6], strides = [1, 1]} : vector<14x6xf32> to vector<8x6xf32>
    %176 = vector.extract_strided_slice %157 {offsets = [0, 5], sizes = [8, 1], strides = [1, 1]} : vector<8x9xf32> to vector<8x1xf32>
    %177 = vector.broadcast %176 : vector<8x1xf32> to vector<8x6xf32>
    %178 = arith.mulf %175, %177 : vector<8x6xf32>
    %179 = vector.extract_strided_slice %156 {offsets = [4, 0], sizes = [8, 6], strides = [1, 1]} : vector<14x6xf32> to vector<8x6xf32>
    %180 = vector.extract_strided_slice %157 {offsets = [0, 6], sizes = [8, 1], strides = [1, 1]} : vector<8x9xf32> to vector<8x1xf32>
    %181 = vector.broadcast %180 : vector<8x1xf32> to vector<8x6xf32>
    %182 = arith.mulf %179, %181 : vector<8x6xf32>
    %183 = vector.extract_strided_slice %156 {offsets = [5, 0], sizes = [8, 6], strides = [1, 1]} : vector<14x6xf32> to vector<8x6xf32>
    %184 = vector.extract_strided_slice %157 {offsets = [0, 7], sizes = [8, 1], strides = [1, 1]} : vector<8x9xf32> to vector<8x1xf32>
    %185 = vector.broadcast %184 : vector<8x1xf32> to vector<8x6xf32>
    %186 = arith.mulf %183, %185 : vector<8x6xf32>
    %187 = vector.extract_strided_slice %156 {offsets = [6, 0], sizes = [8, 6], strides = [1, 1]} : vector<14x6xf32> to vector<8x6xf32>
    %188 = vector.extract_strided_slice %157 {offsets = [0, 8], sizes = [8, 1], strides = [1, 1]} : vector<8x9xf32> to vector<8x1xf32>
    %189 = vector.broadcast %188 : vector<8x1xf32> to vector<8x6xf32>
    %190 = arith.mulf %187, %189 : vector<8x6xf32>
    %191 = tpu.concatenate %161, %165, %169, %173, %174, %178, %182, %186, %190 in 1 : vector<8x6xf32>, vector<8x6xf32>, vector<8x6xf32>, vector<8x6xf32>, vector<8x6xf32>, vector<8x6xf32>, vector<8x6xf32>, vector<8x6xf32>, vector<8x6xf32> -> vector<8x54xf32>
    %192 = arith.truncf %191 : vector<8x54xf32> to vector<8x54xbf16>
    %c0_39 = arith.constant 0 : index
    %c0_40 = arith.constant 0 : index
    %193 = vector.load %arg7[%c0_39, %c0_40] : memref<54x12xbf16, #tpu.memory_space<vmem>>, vector<54x12xbf16>
    %cst_41 = arith.constant dense<0.000000e+00> : vector<8x12xf32>
    %194 = tpu.matmul %192, %193, %cst_41 {dimension_numbers = #tpu.dot_dimension_numbers<[1], [0], [0], [1], [0, 0, 1, 1], [], []>} : vector<8x54xbf16>, vector<54x12xbf16>, vector<8x12xf32> -> vector<8x12xf32>
    %c0_42 = arith.constant 0 : index
    %c24 = arith.constant 24 : index
    %195 = vector.load %arg2[%c0_42, %c24] : memref<1x90xf32, #tpu.memory_space<vmem>>, vector<1x12xf32>
    %c0_43 = arith.constant 0 : index
    %c36 = arith.constant 36 : index
    %196 = vector.load %arg2[%c0_43, %c36] : memref<1x90xf32, #tpu.memory_space<vmem>>, vector<1x12xf32>
    %cst_44 = arith.constant dense<0.000000e+00> : vector<12xf32>
    %197 = vector.multi_reduction <add>, %194, %cst_44 [0] : vector<8x12xf32> to vector<12xf32>
    %198 = vector.shape_cast %197 : vector<12xf32> to vector<1x12xf32>
    %cst_45 = arith.constant 8.000000e+00 : f32
    %199 = vector.broadcast %cst_45 : f32 to vector<1x12xf32>
    %200 = arith.divf %198, %199 : vector<1x12xf32>
    %201 = vector.broadcast %200 : vector<1x12xf32> to vector<8x12xf32>
    %202 = arith.subf %194, %201 : vector<8x12xf32>
    %203 = arith.mulf %202, %202 : vector<8x12xf32>
    %cst_46 = arith.constant dense<0.000000e+00> : vector<12xf32>
    %204 = vector.multi_reduction <add>, %203, %cst_46 [0] : vector<8x12xf32> to vector<12xf32>
    %205 = vector.shape_cast %204 : vector<12xf32> to vector<1x12xf32>
    %cst_47 = arith.constant 8.000000e+00 : f32
    %206 = vector.broadcast %cst_47 : f32 to vector<1x12xf32>
    %207 = arith.divf %205, %206 : vector<1x12xf32>
    %208 = vector.broadcast %200 : vector<1x12xf32> to vector<8x12xf32>
    %209 = arith.subf %194, %208 : vector<8x12xf32>
    %cst_48 = arith.constant 9.99999974E-6 : f32
    %210 = vector.broadcast %cst_48 : f32 to vector<1x12xf32>
    %211 = arith.addf %207, %210 : vector<1x12xf32>
    %212 = math.rsqrt %211 : vector<1x12xf32>
    %213 = arith.mulf %195, %212 : vector<1x12xf32>
    %214 = vector.broadcast %213 : vector<1x12xf32> to vector<8x12xf32>
    %215 = arith.mulf %209, %214 : vector<8x12xf32>
    %216 = vector.broadcast %196 : vector<1x12xf32> to vector<8x12xf32>
    %217 = arith.addf %215, %216 : vector<8x12xf32>
    %cst_49 = arith.constant 0.000000e+00 : f32
    %218 = vector.broadcast %cst_49 : f32 to vector<8x12xf32>
    %219 = arith.maximumf %217, %218 : vector<8x12xf32>
    %c0_50 = arith.constant 0 : index
    %c0_51 = arith.constant 0 : index
    %220 = vector.load %arg8[%c0_50, %c0_51] : memref<2x8xbf16, #tpu.memory_space<vmem>>, vector<2x8xbf16>
    %221 = arith.truncf %219 : vector<8x12xf32> to vector<8x12xbf16>
    %cst_52 = arith.constant dense<0.000000e+00> : vector<2x12xf32>
    %222 = tpu.matmul %220, %221, %cst_52 {dimension_numbers = #tpu.dot_dimension_numbers<[1], [0], [0], [1], [0, 0, 1, 1], [], []>} : vector<2x8xbf16>, vector<8x12xbf16>, vector<2x12xf32> -> vector<2x12xf32>
    %223 = arith.truncf %222 : vector<2x12xf32> to vector<2x12xbf16>
    %c0_53 = arith.constant 0 : index
    %c0_54 = arith.constant 0 : index
    %224 = vector.load %arg9[%c0_53, %c0_54] : memref<12x16xbf16, #tpu.memory_space<vmem>>, vector<12x16xbf16>
    %cst_55 = arith.constant dense<0.000000e+00> : vector<2x16xf32>
    %225 = tpu.matmul %223, %224, %cst_55 {dimension_numbers = #tpu.dot_dimension_numbers<[1], [0], [0], [1], [0, 0, 1, 1], [], []>} : vector<2x12xbf16>, vector<12x16xbf16>, vector<2x16xf32> -> vector<2x16xf32>
    %c0_56 = arith.constant 0 : index
    %c48 = arith.constant 48 : index
    %226 = vector.load %arg2[%c0_56, %c48] : memref<1x90xf32, #tpu.memory_space<vmem>>, vector<1x16xf32>
    %c0_57 = arith.constant 0 : index
    %c64 = arith.constant 64 : index
    %227 = vector.load %arg2[%c0_57, %c64] : memref<1x90xf32, #tpu.memory_space<vmem>>, vector<1x16xf32>
    %c0_58 = arith.constant 0 : index
    %c80 = arith.constant 80 : index
    %228 = vector.load %arg2[%c0_58, %c80] : memref<1x90xf32, #tpu.memory_space<vmem>>, vector<1x10xf32>
    %cst_59 = arith.constant dense<0.000000e+00> : vector<16xf32>
    %229 = vector.multi_reduction <add>, %225, %cst_59 [0] : vector<2x16xf32> to vector<16xf32>
    %230 = vector.shape_cast %229 : vector<16xf32> to vector<1x16xf32>
    %cst_60 = arith.constant 2.000000e+00 : f32
    %231 = vector.broadcast %cst_60 : f32 to vector<1x16xf32>
    %232 = arith.divf %230, %231 : vector<1x16xf32>
    %233 = vector.broadcast %232 : vector<1x16xf32> to vector<2x16xf32>
    %234 = arith.subf %225, %233 : vector<2x16xf32>
    %235 = arith.mulf %234, %234 : vector<2x16xf32>
    %cst_61 = arith.constant dense<0.000000e+00> : vector<16xf32>
    %236 = vector.multi_reduction <add>, %235, %cst_61 [0] : vector<2x16xf32> to vector<16xf32>
    %237 = vector.shape_cast %236 : vector<16xf32> to vector<1x16xf32>
    %cst_62 = arith.constant 2.000000e+00 : f32
    %238 = vector.broadcast %cst_62 : f32 to vector<1x16xf32>
    %239 = arith.divf %237, %238 : vector<1x16xf32>
    %240 = vector.broadcast %232 : vector<1x16xf32> to vector<2x16xf32>
    %241 = arith.subf %225, %240 : vector<2x16xf32>
    %cst_63 = arith.constant 9.99999974E-6 : f32
    %242 = vector.broadcast %cst_63 : f32 to vector<1x16xf32>
    %243 = arith.addf %239, %242 : vector<1x16xf32>
    %244 = math.rsqrt %243 : vector<1x16xf32>
    %245 = arith.mulf %226, %244 : vector<1x16xf32>
    %246 = vector.broadcast %245 : vector<1x16xf32> to vector<2x16xf32>
    %247 = arith.mulf %241, %246 : vector<2x16xf32>
    %248 = vector.broadcast %227 : vector<1x16xf32> to vector<2x16xf32>
    %249 = arith.addf %247, %248 : vector<2x16xf32>
    %cst_64 = arith.constant 0.000000e+00 : f32
    %250 = vector.broadcast %cst_64 : f32 to vector<2x16xf32>
    %251 = arith.maximumf %249, %250 : vector<2x16xf32>
    %252 = arith.truncf %251 : vector<2x16xf32> to vector<2x16xbf16>
    %c0_65 = arith.constant 0 : index
    %c0_66 = arith.constant 0 : index
    %253 = vector.load %arg10[%c0_65, %c0_66] : memref<16x10xbf16, #tpu.memory_space<vmem>>, vector<16x10xbf16>
    %cst_67 = arith.constant dense<0.000000e+00> : vector<2x10xf32>
    %254 = tpu.matmul %252, %253, %cst_67 {dimension_numbers = #tpu.dot_dimension_numbers<[1], [0], [0], [1], [0, 0, 1, 1], [], []>} : vector<2x16xbf16>, vector<16x10xbf16>, vector<2x10xf32> -> vector<2x10xf32>
    %255 = vector.broadcast %228 : vector<1x10xf32> to vector<2x10xf32>
    %256 = arith.addf %254, %255 : vector<2x10xf32>
    %c0_68 = arith.constant 0 : index
    %c0_69 = arith.constant 0 : index
    %257 = vector.load %arg11[%c0_68, %c0_69] : memref<2x10xf32, #tpu.memory_space<vmem>>, vector<2x10xf32>
    tpu.vector_store %arg11[%c0_68, %c0_69], %256 {strides = array<i32>} : memref<2x10xf32, #tpu.memory_space<vmem>>, vector<2x10xf32>,
    return
  }
}

</mosaic_0001>

<bundles_post_ra>
// kernel: _lambda_.1
= control target key start
LH: loop header
LB: loop body
LE: loop exit
PB: predicated region body
PF: predicated region fallthrough
CT: control target
= control target key end

     0   :  { %v6970_v2 = vmov 1   ;;  %v6975_v6 = vmov 2   ;;  %s6956_s0 = inlined_call_operand.vmem [shape: f32[128,3], index: 0, kind: input, shape index: {}]   ;;  %s6957_s1 = inlined_call_operand.vmem [shape: f32[128,27], index: 1, kind: input, shape index: {}]   ;;  %s6958_s2 = inlined_call_operand.vmem [shape: f32[1,90], index: 2, kind: input, shape index: {}]   ;;  %s6959_s3 = inlined_call_operand.vmem [shape: bf16[27,6], index: 3, kind: input, shape index: {}]   ;;  %s6960_s4 = inlined_call_operand.vmem [shape: bf16[32,128], index: 4, kind: input, shape index: {}]   ;;  %s6961_s5 = inlined_call_operand.vmem [shape: bf16[54,6], index: 5, kind: input, shape index: {}]   ;;  %s6962_s6 = inlined_call_operand.vmem [shape: bf16[8,32], index: 6, kind: input, shape index: {}]   ;;  %s6963_s7 = inlined_call_operand.vmem [shape: bf16[54,12], index: 7, kind: input, shape index: {}]   ;;  %s6964_s8 = inlined_call_operand.vmem [shape: bf16[2,8], index: 8, kind: input, shape index: {}]   ;;  %s6965_s9 = inlined_call_operand.vmem [shape: bf16[12,16], index: 9, kind: input, shape index: {}]   ;;  %s6966_s10 = inlined_call_operand.vmem [shape: bf16[16,10], index: 10, kind: input, shape index: {}]   ;;  %s6967_s11 = inlined_call_operand.hbm [shape: f32[2,10], index: 11, kind: output, shape index: {}]  }
   0x1   :  { %v4392_v0 = vld [vmem:[%s6957_s1 + $0x10] sm:$0xff]  ;;  %v4397_v1 = vld [vmem:[%s6957_s1] sm:$0xff]  ;;  %3747 = vset.pattern.permute.xlu1 %v6970_v2  ;;  %3746 = vset.pattern.permute.xlu0 %v6970_v2  ;;  %v4406_v3 = vld [vmem:[%s6957_s1 + $0x18] sm:$0xff] }
   0x2   :  { %242 = vperm.xlu1 %3747, %v4392_v0   ;;  %236 = vperm.xlu0 %3746, %v4397_v1   ;;  %v4411_v4 = vld [vmem:[%s6957_s1 + $0x8] sm:$0xff]  ;;  %v4418_v5 = vld [vmem:[%s6957_s1 + $0x20] sm:$0xff]  ;;  %v4426_v7 = vld [vmem:[%s6957_s1 + $0x30] sm:$0xff] }
   0x3   :  { %v4431_v8 = vld [vmem:[%s6957_s1 + $0x40] sm:$0xff] }
   0x6   :  { %245 = vperm.xlu1 %3747, %v4406_v3   ;;  %239 = vperm.xlu0 %3746, %v4411_v4  }
   0xa   :  { %3748 = vset.pattern.permute.xlu1 %v6975_v6  ;;  %248 = vperm.xlu0 %3746, %v4418_v5  }
   0xb   :  { %349 = vperm.xlu1 %3748, %v4397_v1  }
   0xe   :  { %254 = vperm.xlu0 %3746, %v4426_v7  }
   0xf   :  { %355 = vperm.xlu1 %3748, %v4392_v0  }
  0x10   :  { %16 = vsyncpa [#allocation3], 0  ;;  %v6979_v9 = vmov 8   ;;  %v6983_v10 = vmov 5   ;;  %v6984_v11 = vmov 7   ;;  %v4450_v12 = vld [vmem:[%s6957_s1 + $0x50] sm:$0xff] }
  0x11   :  { %v4457_v13 = vld [vmem:[%s6957_s1 + $0x60] sm:$0xff]  ;;  %v4472_v14 = vld [vmem:[%s6957_s1 + $0x28] sm:$0xff]  ;;  %v4485_v16 = vld [vmem:[%s6957_s1 + $0x70] sm:$0xff]  ;;  %v6973_v17 = vmov 3   ;;  %v6985_v21 = vmov 6   ;;  %vm72_vm0 = vcmask 1040384  }
  0x12   :  { %260 = vperm.xlu0 %3746, %v4431_v8   ;;  %v4477_v15 = vld [vmem:[%s6957_s1 + $0x48] sm:$0xff]  ;;  %v4493_v18 = vld [vmem:[%s6957_s1 + $0x78] sm:$0xff]  ;;  %v42_v23 = vld [vmem:[%s6956_s0 + $0x10] sm:$0xff]  ;;  %vm978_vm1 = vcmask 1046528   ;;  %vm396_vm2 = vcmask 1041408   ;;  %vm1077_vm3 = vcmask 1045504  }
  0x13   :  { %358 = vperm.xlu1 %3748, %v4406_v3   ;;  %v4504_v19 = vld [vmem:[%s6957_s1 + $0x38] sm:$0xff]  ;;  %v41_v22 = vld [vmem:[%s6956_s0 + $0x8] sm:$0xff]  ;;  %v4551_v24 = vld [vmem:[%s6956_s0] sm:$0xff]  ;;  %v76_v28 = vrot.slane %v42_v23, 7  ;;  %s4289_s17 = smov 3   ;;  %s4290_s18 = smov 6  }
  0x14   :  { %v4516_v20 = vld [vmem:[%s6957_s1 + $0x58] sm:$0xff]  ;;  %v74_v27 = vrot.slane %v41_v22, 7  ;;  %v73_v29 = vrot.slane %v4551_v24, 7  ;;  %s4291_s21 = smov 9   ;;  %s4292_s22 = smov 12   ;;  %vm1848_vm4 = vcmask 1044480  }
  0x15   :  { %v4561_v30 = vld [vmem:[%s6956_s0 + $0x18] sm:$0xff]  ;;  %s4293_s23 = smov 15   ;;  %s4294_s13 = smov 18   ;;  %vm1664_vm5 = vcmask 23552   ;;  %vm1681_vm6 = vcmask 48128   ;;  %vm1698_vm7 = vcmask 72704  }
  0x16   :  { %3756 = vset.pattern.permute.xlu0 %v6979_v9  ;;  %v4565_v32 = vsel %vm72_vm0, %v74_v27, %v76_v28  ;;  %v78_v34 = vrot.slane %v4561_v30, 7  ;;  %v4574_v37 = vsel %vm72_vm0, %v73_v29, %v74_v27  ;;  %s4295_s14 = smov 21   ;;  %s4296_s15 = smov 24   ;;  %vm1715_vm8 = vcmask 97280  }
  0x17   :  { %3749 = vset.pattern.permute.xlu1 %v6983_v10  ;;  %852 = vperm.xlu0 %3756, %v4411_v4   ;;  %7052 = vst [vmem:[#allocation5_spill] sm:$0xff] %v4565_v32  ;;  %7053 = vst [vmem:[#allocation6_spill] sm:$0xff] %v4574_v37  ;;  %vm1732_vm9 = vcmask 121856   ;;  %vm1749_vm10 = vcmask 146432   ;;  %vm1766_vm11 = vcmask 171008   ;;  %vm1783_vm12 = vcmask 195584  }
  0x18   :  { %543 = vperm.xlu1 %3749, %v4397_v1   ;;  %v4592_v44 = vsel %vm72_vm0, %v76_v28, %v78_v34  ;;  %vm1823_vm13 = vcmask 220160   ;;  %vm2416_vm14 = vcmask 1043456   ;;  %vm2621_vm15 = vcmask 1042432   ;;  %s4308_s25 = smov 36   ;;  %s4310_s26 = smov 30  }
  0x19   :  { %7055 = vst [vmem:[#allocation8_spill] sm:$0xff] %v4592_v44  ;;  %s4311_s29 = smov 48   ;;  %s4314_s16 = smov 116  }
  0x1a   :  { %s4326_s28 = smov 64   ;;  %s4327_s12 = smov 80  }
  0x1b   :  { %858 = vperm.xlu0 %3756, %v4406_v3  }
  0x1c   :  { %549 = vperm.xlu1 %3749, %v4392_v0  }
  0x1f   :  { %867 = vperm.xlu0 %3756, %v4426_v7  }
  0x20   :  { %552 = vperm.xlu1 %3749, %v4406_v3  }
  0x23   :  { %873 = vperm.xlu0 %3756, %v4431_v8  }
  0x24   :  { %3750 = vset.pattern.permute.xlu1 %v6984_v11 }
  0x25   :  { %736 = vperm.xlu1 %3750, %v4397_v1  }
  0x27   :  { %879 = vperm.xlu0 %3756, %v4450_v12  }
  0x29   :  { %742 = vperm.xlu1 %3750, %v4392_v0  }
  0x2b   :  { %885 = vperm.xlu0 %3756, %v4457_v13  }
  0x2d   :  { %745 = vperm.xlu1 %3750, %v4406_v3  }
  0x2f   :  { %3782 = vset.pattern.permute.xlu0 %v6975_v6 }
  0x30   :  { %352 = vperm.xlu0 %3782, %v4411_v4  }
  0x31   :  { %3751 = vset.pattern.permute.xlu1 %v6979_v9 }
  0x32   :  { %849 = vperm.xlu1 %3751, %v4397_v1  }
  0x34   :  { %361 = vperm.xlu0 %3782, %v4418_v5  }
  0x36   :  { %855 = vperm.xlu1 %3751, %v4392_v0  }
  0x38   :  { %373 = vperm.xlu0 %3782, %v4431_v8  }
  0x3a   :  { %3752 = vset.pattern.permute.xlu1 %v6970_v2 }
  0x3b   :  { %251 = vperm.xlu1 %3752, %v4472_v14  }
  0x3c   :  { %376 = vperm.xlu0 %3782, %v4477_v15  }
  0x3f   :  { %3753 = vset.pattern.permute.xlu1 %v6973_v17 }
  0x40   :  { %463 = vperm.xlu1 %3753, %v4397_v1   ;;  %391 = vperm.xlu0 %3782, %v4485_v16  }
  0x44   :  { %467 = vperm.xlu1 %3753, %v4411_v4   ;;  %394 = vperm.xlu0 %3782, %v4493_v18  }
  0x48   :  { %3754 = vset.pattern.permute.xlu1 %v6979_v9  ;;  %3786 = vset.pattern.permute.xlu0 %v6983_v10 }
  0x49   :  { %861 = vperm.xlu1 %3754, %v4418_v5   ;;  %546 = vperm.xlu0 %3786, %v4411_v4  }
  0x4d   :  { %3755 = vset.pattern.permute.xlu1 %v6970_v2  ;;  %555 = vperm.xlu0 %3786, %v4418_v5  }
  0x4e   :  { %257 = vperm.xlu1 %3755, %v4504_v19  }
  0x51   :  { %558 = vperm.xlu0 %3786, %v4472_v14  }
  0x52   :  { %3757 = vset.pattern.permute.xlu1 %v6975_v6 }
  0x53   :  { %364 = vperm.xlu1 %3757, %v4472_v14  }
  0x55   :  { %573 = vperm.xlu0 %3786, %v4450_v12  }
  0x57   :  { %367 = vperm.xlu1 %3757, %v4426_v7  }
  0x59   :  { %576 = vperm.xlu0 %3786, %v4516_v20  }
  0x5b   :  { %3758 = vset.pattern.permute.xlu1 %v6973_v17 }
  0x5c   :  { %475 = vperm.xlu1 %3758, %v4406_v3  }
  0x5d   :  { %588 = vperm.xlu0 %3786, %v4493_v18  }
  0x60   :  { %3759 = vset.pattern.permute.xlu1 %v6975_v6 }
  0x61   :  { %370 = vperm.xlu1 %3759, %v4504_v19   ;;  %3790 = vset.pattern.permute.xlu0 %v6984_v11 }
  0x62   :  { %739 = vperm.xlu0 %3790, %v4411_v4  }
  0x65   :  { %3760 = vset.pattern.permute.xlu1 %v6985_v21 }
  0x66   :  { %656 = vperm.xlu1 %3760, %v4397_v1   ;;  %748 = vperm.xlu0 %3790, %v4418_v5  }
  0x6a   :  { %660 = vperm.xlu1 %3760, %v4411_v4   ;;  %751 = vperm.xlu0 %3790, %v4472_v14  }
  0x6e   :  { %3761 = vset.pattern.permute.xlu1 %v6983_v10  ;;  %760 = vperm.xlu0 %3790, %v4431_v8  }
  0x6f   :  { %561 = vperm.xlu1 %3761, %v4426_v7  }
  0x72   :  { %763 = vperm.xlu0 %3790, %v4477_v15  }
  0x73   :  { %3762 = vset.pattern.permute.xlu1 %v6985_v21 }
  0x74   :  { %664 = vperm.xlu1 %3762, %v4392_v0  }
  0x76   :  { %772 = vperm.xlu0 %3790, %v4457_v13  }
  0x78   :  { %3763 = vset.pattern.permute.xlu1 %v6983_v10 }
  0x79   :  { %564 = vperm.xlu1 %3763, %v4504_v19  }
  0x7a   :  { %781 = vperm.xlu0 %3790, %v4493_v18  }
  0x7d   :  { %v243_v25 = vpop.permute.xlu1 %242  ;;  %567 = vperm.xlu1 %3763, %v4431_v8   ;;  %v4554_v26 = vpop.permute.xlu0 %236 }
  0x7e   :  { %3792 = vset.pattern.permute.xlu0 %v6973_v17  ;;  %v286_v35 = vrot.slane %v243_v25, 7 }
  0x7f   :  { %471 = vperm.xlu0 %3792, %v4392_v0  }
  0x81   :  { %v246_v31 = vpop.permute.xlu1 %245  ;;  %3764 = vset.pattern.permute.xlu1 %v6984_v11  ;;  %v4568_v33 = vpop.permute.xlu0 %239 }
  0x82   :  { %v288_v36 = vrot.slane %v246_v31, 7  ;;  %v284_v38 = vrot.slane %v4568_v33, 7  ;;  %754 = vperm.xlu1 %3764, %v4426_v7   ;;  %v283_v31 = vrot.slane %v4554_v26, 7 }
  0x83   :  { %479 = vperm.xlu0 %3792, %v4418_v5  }
  0x84   :  { %v289_v39 = vsel %vm72_vm0, %v286_v35, %v288_v36  ;;  %v287_v40 = vsel %vm72_vm0, %v284_v38, %v286_v35 }
  0x85   :  { %v334_v41 = vmul.f32 %v289_v39, %v4565_v32  ;;  %v4585_v42 = vmul.f32 %v287_v40, %v4574_v37  ;;  %v4587_v43 = vpop.permute.xlu0 %248  ;;  %v285_v39 = vsel %vm72_vm0, %v283_v31, %v284_v38 }
  0x86   :  { %7054 = vst [vmem:[#allocation7_spill] sm:$0xff] %v4587_v43  ;;  %v6969_v45 = vrot.slane %v4587_v43, 7  ;;  %757 = vperm.xlu1 %3764, %v4504_v19   ;;  %v4596_v46 = vpop.permute.xlu1 %349 }
  0x87   :  { %v984_v47 = vrot.slane %v334_v41, 1  ;;  %v982_v48 = vrot.slane %v4585_v42, 1  ;;  %491 = vperm.xlu0 %3792, %v4504_v19   ;;  %v331_v41 = vmul.f32 0.0, %v283_v31  ;;  %v397_v38 = vrot.slane %v4596_v46, 6 }
  0x88   :  { %v291_v49 = vsel %vm72_vm0, %v288_v36, %v6969_v45  ;;  %v4681_v36 = vsel %vm72_vm0, 0.0, %v73_v29 }
  0x89   :  { %v4604_v50 = vmul.f32 %v291_v49, %v4592_v44  ;;  %v4606_v51 = vpop.permute.xlu0 %254  ;;  %v4614_v53 = vsel %vm978_vm1, %v982_v48, %v984_v47  ;;  %7060 = vst [vmem:[#allocation13_spill] sm:$0xff] %v4681_v36  ;;  %v979_v24 = vrot.slane %v331_v41, 1 }
  0x8a   :  { %7057 = vst [vmem:[#allocation10_spill] sm:$0xff] %v4606_v51  ;;  %3765 = vset.pattern.permute.xlu1 %v6979_v9  ;;  %v4609_v52 = vpop.permute.xlu1 %355 }
  0x8b   :  { %7056 = vst [vmem:[#allocation9_spill] sm:$0xff] %v4604_v50  ;;  %v6968_v54 = vrot.slane %v4604_v50, 1  ;;  %864 = vperm.xlu1 %3765, %v4472_v14   ;;  %495 = vperm.xlu0 %3792, %v4431_v8   ;;  %v400_v59 = vrot.slane %v4609_v52, 6 }
  0x8d   :  { %v4619_v55 = vpop.permute.xlu0 %260  ;;  %v4624_v56 = vsel %vm978_vm1, %v984_v47, %v6968_v54  ;;  %v332_v47 = vmul.f32 %v285_v39, %v4681_v36 }
  0x8e   :  { %7058 = vst [vmem:[#allocation11_spill] sm:$0xff] %v4619_v55  ;;  %v4626_v57 = vpop.permute.xlu1 %358 }
  0x8f   :  { %v402_v60 = vrot.slane %v4626_v57, 6  ;;  %3766 = vset.pattern.permute.xlu1 %v6970_v2  ;;  %511 = vperm.xlu0 %3792, %v4457_v13   ;;  %v980_v29 = vrot.slane %v332_v47, 1 }
  0x90   :  { %263 = vperm.xlu1 %3766, %v4477_v15  }
  0x91   :  { %v403_v61 = vsel %vm396_vm2, %v400_v59, %v402_v60  ;;  %v981_v47 = vsel %vm978_vm1, %v979_v24, %v980_v29 }
  0x92   :  { %v4638_v62 = vpop.permute.xlu0 %852  ;;  %v448_v58 = vmul.f32 %v403_v61, %v4565_v32  ;;  %v445_v61 = vmul.f32 0.0, %v397_v38 }
  0x93   :  { %v4640_v63 = vpop.permute.xlu1 %543  ;;  %519 = vperm.xlu0 %3792, %v4485_v16  }
  0x94   :  { %266 = vperm.xlu1 %3766, %v4450_v12  }
  0x96   :  { %v4644_v0 = vpop.permute.xlu0 %858 }
  0x97   :  { %v4646_v1 = vpop.permute.xlu1 %549  ;;  %3796 = vset.pattern.permute.xlu0 %v6985_v21 }
  0x98   :  { %3767 = vset.pattern.permute.xlu1 %v6973_v17  ;;  %668 = vperm.xlu0 %3796, %v4406_v3   ;;  %v593_v25 = vrot.slane %v4646_v1, 6 }
  0x99   :  { %483 = vperm.xlu1 %3767, %v4472_v14  }
  0x9a   :  { %v4652_v22 = vpop.permute.xlu0 %867 }
  0x9b   :  { %v4654_v23 = vpop.permute.xlu1 %552 }
  0x9c   :  { %v595_v27 = vrot.slane %v4654_v23, 6  ;;  %672 = vperm.xlu0 %3796, %v4418_v5  }
  0x9d   :  { %3768 = vset.pattern.permute.xlu1 %v6979_v9 }
  0x9e   :  { %v4665_v3 = vsel %vm396_vm2, %v593_v25, %v595_v27  ;;  %870 = vperm.xlu1 %3768, %v4504_v19   ;;  %v4668_v28 = vpop.permute.xlu0 %873 }
  0xa0   :  { %v4671_v35 = vpop.permute.xlu1 %736  ;;  %692 = vperm.xlu0 %3796, %v4477_v15  }
  0xa2   :  { %3769 = vset.pattern.permute.xlu1 %v6970_v2  ;;  %v4675_v5 = vpop.permute.xlu0 %879  ;;  %v6972_v2 = vmov 0  }
  0xa3   :  { %7059 = vst [vmem:[#allocation12_spill] sm:$0xff] %v4675_v5  ;;  %269 = vperm.xlu1 %3769, %v4516_v20  }
  0xa4   :  { %v4686_v26 = vpop.permute.xlu1 %742  ;;  %696 = vperm.xlu0 %3796, %v4450_v12  }
  0xa6   :  { %v4689_v40 = vpop.permute.xlu0 %885 }
  0xa7   :  { %7061 = vst [vmem:[#allocation14_spill] sm:$0xff] %v4689_v40  ;;  %272 = vperm.xlu1 %3769, %v4457_v13  }
  0xa8   :  { %v4693_v49 = vpop.permute.xlu1 %745  ;;  %704 = vperm.xlu0 %3796, %v4457_v13  }
  0xab   :  { %3770 = vset.pattern.permute.xlu1 %v6975_v6  ;;  %v353_v33 = vpop.permute.xlu0 %352 }
  0xac   :  { %v398_v52 = vrot.slane %v353_v33, 6  ;;  %379 = vperm.xlu1 %3770, %v4450_v12   ;;  %716 = vperm.xlu0 %3796, %v4493_v18  }
  0xad   :  { %v4700_v31 = vpop.permute.xlu1 %849 }
  0xae   :  { %v399_v39 = vsel %vm396_vm2, %v397_v38, %v398_v52  ;;  %v401_v54 = vsel %vm396_vm2, %v398_v52, %v400_v59  ;;  %v983_v59 = vsel %vm978_vm1, %v980_v29, %v982_v48  ;;  %v1083_v29 = vrot.slane %v448_v58, 2 }
  0xaf   :  { %v447_v45 = vmul.f32 %v401_v54, %v4574_v37  ;;  %v4705_v41 = vpop.permute.xlu0 %361  ;;  %v446_v46 = vmul.f32 %v399_v39, %v4681_v36  ;;  %v3801_v48 = vpack.i.bf16 %v983_v59, %v981_v47 }
  0xb0   :  { %v6978_v33 = vrot.slane %v4705_v41, 6  ;;  %3771 = vset.pattern.permute.xlu1 %v6973_v17  ;;  %3800 = vset.pattern.permute.xlu0 %v6972_v2 }
  0xb1   :  { %487 = vperm.xlu1 %3771, %v4426_v7   ;;  %v4717_v54 = vpop.permute.xlu1 %855  ;;  %146 = vperm.xlu0 %3800, %v4411_v4   ;;  %v1081_v24 = vrot.slane %v447_v45, 2  ;;  %v1079_v2 = vrot.slane %v446_v46, 2  ;;  %v1078_v4 = vrot.slane %v445_v61, 2 }
  0xb2   :  { %v405_v52 = vsel %vm396_vm2, %v402_v60, %v6978_v33  ;;  %v641_v33 = vmul.f32 %v4665_v3, %v4592_v44 }
  0xb3   :  { %v4726_v39 = vmul.f32 %v405_v52, %v4592_v44  ;;  %v4728_v42 = vpop.permute.xlu0 %373  ;;  %v4737_v57 = vsel %vm1077_vm3, %v1081_v24, %v1083_v29  ;;  %v1080_v38 = vsel %vm1077_vm3, %v1078_v4, %v1079_v2  ;;  %v1082_v47 = vsel %vm1077_vm3, %v1079_v2, %v1081_v24 }
  0xb4   :  { %v3811_v52 = vpack.i.bf16 %v1082_v47, %v1080_v38  ;;  %v1226_v2 = vrot.slane %v4574_v37, 1  ;;  %v6977_v24 = vrot.slane %v4565_v32, 1  ;;  %v590_v47 = vrot.slane %v4640_v63, 6 }
  0xb5   :  { %v6976_v17 = vrot.slane %v4726_v39, 2  ;;  %3772 = vset.pattern.permute.xlu1 %v6975_v6  ;;  %3802 = vrot.lane.b32.xlu0 %v3801_v48, %s4289_s17  ;;  %v1225_v48 = vrot.slane %v4681_v36, 1 }
  0xb6   :  { %382 = vperm.xlu1 %3772, %v4516_v20   ;;  %v4734_v45 = vpop.permute.xlu1 %251 }
  0xb7   :  { %v4739_v60 = vpop.permute.xlu0 %376  ;;  %v4744_v58 = vsel %vm1077_vm3, %v1083_v29, %v6976_v17  ;;  %v1227_v6 = vsel %vm978_vm1, %v1225_v48, %v1226_v2  ;;  %v1229_v17 = vsel %vm978_vm1, %v1226_v2, %v6977_v24  ;;  %v638_v48 = vmul.f32 %v590_v47, %v4681_v36 }
  0xb9   :  { %166 = vperm.xlu0 %3800, %v4472_v14   ;;  %v1323_v1 = vrot.slane %v638_v48, 2 }
  0xba   :  { %385 = vperm.xlu1 %3772, %v4457_v13  }
  0xbb   :  { %v464_v59 = vpop.permute.xlu1 %463  ;;  %v4752_v61 = vpop.permute.xlu0 %391 }
  0xbc   :  { %7062 = vst [vmem:[#allocation15_spill] sm:$0xff] %v4752_v61  ;;  %v526_v46 = vmul.f32 %v464_v59, %v4681_v36  ;;  %v7074_v61 = vrot.slane %v4728_v42, 6 }
  0xbd   :  { %3812 = vrot.lane.b32.xlu0 %v3811_v52, %s4290_s18 }
  0xbe   :  { %3773 = vset.pattern.permute.xlu1 %v6985_v21 }
  0xbf   :  { %676 = vperm.xlu1 %3773, %v4472_v14   ;;  %v468_v29 = vpop.permute.xlu1 %467  ;;  %v4760_v4 = vpop.permute.xlu0 %394  ;;  %v4774_v14 = vld [vmem:[%s6956_s0 + $0x20] sm:$0xff] }
  0xc0   :  { %7063 = vst [vmem:[#allocation16_spill] sm:$0xff] %v4760_v4  ;;  %v527_v38 = vmul.f32 %v468_v29, %v4574_v37  ;;  %v80_v2 = vrot.slane %v4774_v14, 7 }
  0xc1   :  { %176 = vperm.xlu0 %3800, %v4504_v19  }
  0xc2   :  { %v3821_v52 = vpack.i.bf16 %v527_v38, %v526_v46  ;;  %v3831_v46 = vpack.i.bf16 %v1229_v17, %v1227_v6 }
  0xc3   :  { %3774 = vset.pattern.permute.xlu1 %v6983_v10 }
  0xc4   :  { %570 = vperm.xlu1 %3774, %v4477_v15   ;;  %v4777_v59 = vpop.permute.xlu1 %861  ;;  %v547_v29 = vpop.permute.xlu0 %546 }
  0xc5   :  { %v591_v63 = vrot.slane %v547_v29, 6  ;;  %3822 = vrot.lane.b32.xlu0 %v3821_v52, %s4291_s21 }
  0xc7   :  { %v592_v38 = vsel %vm396_vm2, %v590_v47, %v591_v63  ;;  %v594_v24 = vsel %vm396_vm2, %v591_v63, %v593_v25 }
  0xc8   :  { %v639_v9 = vmul.f32 %v592_v38, %v4574_v37  ;;  %v640_v29 = vmul.f32 %v594_v24, %v4565_v32  ;;  %3775 = vset.pattern.permute.xlu1 %v6985_v21  ;;  %v4791_v6 = vpop.permute.xlu0 %555  ;;  %v4801_v24 = vsel %vm72_vm0, %v78_v34, %v80_v2  ;;  %v899_v21 = vrot.slane %v4717_v54, 6 }
  0xc9   :  { %v6982_v17 = vrot.slane %v4791_v6, 6  ;;  %680 = vperm.xlu1 %3775, %v4426_v7   ;;  %v4795_v47 = vpop.permute.xlu1 %257  ;;  %3832 = vrot.lane.b32.xlu0 %v3831_v46, %s4292_s22  ;;  %7065 = vst [vmem:[#allocation18_spill] sm:$0xff] %v4801_v24  ;;  %v1328_v7 = vrot.slane %v641_v33, 2 }
  0xca   :  { %7064 = vst [vmem:[#allocation17_spill] sm:$0xff] %v4795_v47  ;;  %v1324_v25 = vrot.slane %v639_v9, 2  ;;  %v1326_v3 = vrot.slane %v640_v29, 2 }
  0xcb   :  { %v598_v52 = vsel %vm396_vm2, %v595_v27, %v6982_v17  ;;  %v783_v17 = vrot.slane %v4671_v35, 7 }
  0xcc   :  { %v4809_v14 = vmul.f32 %v598_v52, %v4801_v24  ;;  %v4811_v63 = vpop.permute.xlu0 %558  ;;  %v1325_v9 = vsel %vm1077_vm3, %v1323_v1, %v1324_v25  ;;  %v1327_v30 = vsel %vm1077_vm3, %v1324_v25, %v1326_v3  ;;  %v4820_v23 = vsel %vm1077_vm3, %v1326_v3, %v1328_v7  ;;  %v45_v1 = vld [vmem:[%s6956_s0 + $0x28] sm:$0xff]  ;;  %v4842_v25 = vld [vmem:[%s6956_s0 + $0x38] sm:$0xff]  ;;  %v46_v3 = vld [vmem:[%s6956_s0 + $0x30] sm:$0xff] }
  0xcd   :  { %684 = vperm.xlu1 %3775, %v4504_v19   ;;  %v3841_v48 = vpack.i.bf16 %v1327_v30, %v1325_v9  ;;  %7066 = vst [vmem:[#allocation19_spill] sm:$0xff] %v4820_v23  ;;  %v82_v9 = vrot.slane %v45_v1, 7  ;;  %v84_v19 = vrot.slane %v46_v3, 7  ;;  %v831_v36 = vmul.f32 %v783_v17, %v4574_v37 }
  0xce   :  { %v6981_v34 = vrot.slane %v4809_v14, 2  ;;  %v4817_v46 = vpop.permute.xlu1 %364  ;;  %v7010_v55 = vrot.slane %v4811_v63, 6 }
  0xcf   :  { %3842 = vrot.lane.b32.xlu0 %v3841_v48, %s4293_s23  ;;  %v6991_v48 = vrot.slane %v4842_v25, 7  ;;  %v4865_v1 = vsel %vm72_vm0, %v80_v2, %v82_v9  ;;  %v4869_v35 = vsel %vm72_vm0, %v82_v9, %v84_v19  ;;  %v896_v9 = vrot.slane %v4700_v31, 6 }
  0xd0   :  { %v4823_v27 = vpop.permute.xlu0 %573  ;;  %v4828_v33 = vsel %vm1077_vm3, %v1328_v7, %v6981_v34  ;;  %v788_v7 = vrot.slane %v4693_v49, 7  ;;  %v6987_v34 = vrot.slane %v4817_v46, 6  ;;  %7071 = vst [vmem:[#allocation24_spill] sm:$0xff] %v4865_v1  ;;  %7072 = vst [vmem:[#allocation25_spill] sm:$0xff] %v4869_v35 }
  0xd1   :  { %7067 = vst [vmem:[#allocation20_spill] sm:$0xff] %v4823_v27  ;;  %7068 = vst [vmem:[#allocation21_spill] sm:$0xff] %v4828_v33  ;;  %3776 = vset.pattern.permute.xlu1 %v6983_v10  ;;  %v786_v10 = vrot.slane %v4686_v26, 7  ;;  %v4874_v26 = vsel %vm72_vm0, %v84_v19, %v6991_v48 }
  0xd2   :  { %579 = vperm.xlu1 %3776, %v4457_v13   ;;  %v368_v38 = vpop.permute.xlu1 %367  ;;  %7073 = vst [vmem:[#allocation26_spill] sm:$0xff] %v4874_v26 }
  0xd3   :  { %v408_v52 = vrot.slane %v368_v38, 6  ;;  %v789_v49 = vsel %vm72_vm0, %v786_v10, %v788_v7 }
  0xd4   :  { %v4834_v29 = vpop.permute.xlu0 %576  ;;  %v834_v54 = vmul.f32 %v789_v49, %v4801_v24 }
  0xd5   :  { %7069 = vst [vmem:[#allocation22_spill] sm:$0xff] %v4834_v29 }
  0xd6   :  { %3777 = vset.pattern.permute.xlu1 %v6984_v11  ;;  %v409_v11 = vsel %vm396_vm2, %v6987_v34, %v408_v52 }
  0xd7   :  { %766 = vperm.xlu1 %3777, %v4450_v12   ;;  %v4849_v13 = vpop.permute.xlu1 %475  ;;  %v4879_v2 = vmul.f32 %v409_v11, %v4865_v1 }
  0xd8   :  { %v4852_v30 = vpop.permute.xlu0 %588 }
  0xd9   :  { %7070 = vst [vmem:[#allocation23_spill] sm:$0xff] %v4852_v30  ;;  %v897_v30 = vrot.slane %v4638_v62, 6 }
  0xdb   :  { %769 = vperm.xlu1 %3777, %v4516_v20   ;;  %v900_v31 = vsel %vm396_vm2, %v897_v30, %v899_v21 }
  0xdc   :  { %v371_v3 = vpop.permute.xlu1 %370  ;;  %v946_v50 = vmul.f32 %v900_v31, %v4592_v44 }
  0xdd   :  { %v410_v38 = vrot.slane %v371_v3, 6  ;;  %v740_v34 = vpop.permute.xlu0 %739  ;;  %v7075_v3 = vmov 8  }
  0xde   :  { %v784_v29 = vrot.slane %v740_v34, 7 }
  0xdf   :  { %v411_v4 = vsel %vm396_vm2, %v408_v52, %v410_v38  ;;  %v413_v19 = vsel %vm396_vm2, %v410_v38, %v7074_v61  ;;  %3778 = vset.pattern.permute.xlu1 %v7075_v3  ;;  %v901_v52 = vrot.slane %v4644_v0, 6 }
  0xe0   :  { %v452_v62 = vmul.f32 %v411_v4, %v4869_v35  ;;  %v4890_v48 = vmul.f32 %v413_v19, %v4874_v26  ;;  %v785_v11 = vsel %vm72_vm0, %v783_v17, %v784_v29  ;;  %v787_v34 = vsel %vm72_vm0, %v784_v29, %v786_v10  ;;  %876 = vperm.xlu1 %3778, %v4477_v15   ;;  %v4907_v29 = vld [vmem:[%s6957_s1 + $0x68] sm:$0xff] }
  0xe1   :  { %v832_v49 = vmul.f32 %v785_v11, %v4565_v32  ;;  %v833_v61 = vmul.f32 %v787_v34, %v4592_v44  ;;  %v657_v38 = vpop.permute.xlu1 %656  ;;  %v4899_v40 = vpop.permute.xlu0 %748  ;;  %v6997_v4 = vrot.slane %v4879_v2, 2  ;;  %v1490_v11 = vrot.slane %v834_v54, 1 }
  0xe2   :  { %v1091_v19 = vrot.slane %v452_v62, 2  ;;  %v6996_v10 = vrot.slane %v4899_v40, 7  ;;  %v898_v34 = vsel %vm396_vm2, %v896_v9, %v897_v30  ;;  %v7076_v17 = vmov 1  }
  0xe3   :  { %v1488_v5 = vrot.slane %v833_v61, 1  ;;  %v7077_v33 = vrot.slane %v4890_v48, 2  ;;  %v1486_v30 = vrot.slane %v832_v49, 1  ;;  %v1485_v61 = vrot.slane %v831_v36, 1 }
  0xe4   :  { %v791_v62 = vsel %vm72_vm0, %v788_v7, %v6996_v10  ;;  %3779 = vset.pattern.permute.xlu1 %v7076_v17  ;;  %v4919_v23 = vsel %vm1077_vm3, %v6997_v4, %v1091_v19  ;;  %v7078_v10 = vrot.slane %v4777_v59, 6  ;;  %v719_v47 = vmul.f32 %v657_v38, %v4574_v37 }
  0xe5   :  { %v4924_v0 = vsel %vm1077_vm3, %v1091_v19, %v7077_v33  ;;  %v4927_v54 = vmul.f32 %v791_v62, %v4865_v1  ;;  %275 = vperm.xlu1 %3779, %v4907_v29   ;;  %v661_v31 = vpop.permute.xlu1 %660  ;;  %v4931_v7 = vsel %vm978_vm1, %v1488_v5, %v1490_v11  ;;  %v944_v49 = vmul.f32 %v896_v9, %v4574_v37 }
  0xe6   :  { %v904_v4 = vsel %vm396_vm2, %v901_v52, %v7078_v10  ;;  %v720_v33 = vmul.f32 %v661_v31, %v4565_v32  ;;  %v945_v19 = vmul.f32 %v898_v34, %v4565_v32  ;;  %v902_v43 = vsel %vm396_vm2, %v899_v21, %v901_v52 }
  0xe7   :  { %v7003_v62 = vrot.slane %v4927_v54, 1  ;;  %v1586_v36 = vrot.slane %v946_v50, 2  ;;  %v4945_v51 = vmul.f32 %v904_v4, %v4865_v1  ;;  %v1487_v38 = vsel %vm978_vm1, %v1485_v61, %v1486_v30 }
  0xe8   :  { %v3851_v27 = vpack.i.bf16 %v720_v33, %v719_v47  ;;  %v1489_v9 = vsel %vm978_vm1, %v1486_v30, %v1488_v5  ;;  %v1583_v50 = vrot.slane %v944_v49, 2  ;;  %v1584_v47 = vrot.slane %v945_v19, 2 }
  0xe9   :  { %278 = vperm.xlu1 %3779, %v4485_v16   ;;  %v4953_v10 = vsel %vm978_vm1, %v1490_v11, %v7003_v62  ;;  %v947_v52 = vmul.f32 %v902_v43, %v4801_v24  ;;  %v3861_v4 = vpack.i.bf16 %v1489_v9, %v1487_v38  ;;  %v7002_v31 = vrot.slane %v4945_v51, 2  ;;  %v4962_v11 = vpop.permute.xlu0 %751 }
  0xea   :  { %v562_v34 = vpop.permute.xlu1 %561  ;;  %3852 = vrot.lane.b32.xlu0 %v3851_v27, %s4294_s13  ;;  %v7079_v5 = vmov 3   ;;  %v1587_v30 = vsel %vm1077_vm3, %v1584_v47, %v1586_v36  ;;  %v1585_v43 = vsel %vm1077_vm3, %v1583_v50, %v1584_v47  ;;  %v7080_v49 = vrot.slane %v4817_v46, 6  ;;  %v48_v50 = vld [vmem:[%s6956_s0 + $0x40] sm:$0xff] }
  0xeb   :  { %v1588_v27 = vrot.slane %v947_v52, 2  ;;  %v601_v61 = vrot.slane %v562_v34, 6  ;;  %v7081_v19 = vrot.slane %v4705_v41, 6  ;;  %v3871_v9 = vpack.i.bf16 %v1587_v30, %v1585_v43 }
  0xec   :  { %v7016_v37 = vrot.slane %v4801_v24, 1 }
  0xed   :  { %3780 = vset.pattern.permute.xlu1 %v7079_v5  ;;  %v407_v38 = vsel %vm396_vm2, %v7081_v19, %v7080_v49  ;;  %v1591_v21 = vsel %vm1077_vm3, %v1588_v27, %v7002_v31  ;;  %v602_v41 = vsel %vm396_vm2, %v7010_v55, %v601_v61  ;;  %v1589_v46 = vsel %vm1077_vm3, %v1586_v36, %v1588_v27  ;;  %v4989_v47 = vpop.permute.xlu0 %760 }
  0xee   :  { %499 = vperm.xlu1 %3780, %v4477_v15   ;;  %3862 = vrot.lane.b32.xlu0 %v3861_v4, %s4295_s14  ;;  %v450_v34 = vmul.f32 %v407_v38, %v4801_v24  ;;  %v3881_v4 = vpack.i.bf16 %v1591_v21, %v1589_v46  ;;  %v4992_v43 = vmul.f32 %v602_v41, %v4869_v35  ;;  %v88_v49 = vrot.slane %v48_v50, 7 }
  0xef   :  { %v4966_v33 = vpop.permute.xlu1 %664 }
  0xf0   :  { %v1087_v19 = vrot.slane %v450_v34, 2  ;;  %v7008_v46 = vrot.slane %v4992_v43, 2 }
  0xf1   :  { %v5006_v50 = vpop.permute.xlu0 %763 }
  0xf2   :  { %3781 = vset.pattern.permute.xlu1 %v7075_v3  ;;  %3872 = vrot.lane.b32.xlu0 %v3871_v9, %s4296_s15  ;;  %v7082_v9 = vrot.slane %v4879_v2, 2 }
  0xf3   :  { %882 = vperm.xlu1 %3781, %v4516_v20  }
  0xf4   :  { %v565_v52 = vpop.permute.xlu1 %564  ;;  %v1090_v41 = vsel %vm1077_vm3, %v1087_v19, %v7082_v9 }
  0xf5   :  { %v603_v30 = vrot.slane %v565_v52, 6  ;;  %v5017_v52 = vld [vmem:[%s6956_s0 + $0x48] sm:$0xff] }
  0xf6   :  { %3882 = vrot.lane.b32.xlu0 %v3881_v4, %s4296_s15  ;;  %v7085_v4 = vrot.slane %v4726_v39, 2  ;;  %v7007_v39 = vrot.slane %v5017_v52, 7 }
  0xf7   :  { %v604_v38 = vsel %vm396_vm2, %v601_v61, %v603_v30  ;;  %3783 = vset.pattern.permute.xlu1 %v7076_v17  ;;  %v7083_v17 = vrot.slane %v4842_v25, 7  ;;  %v7086_v25 = vmov 2  }
  0xf8   :  { %v645_v36 = vmul.f32 %v604_v38, %v4874_v26  ;;  %281 = vperm.xlu1 %3783, %v4493_v18   ;;  %v4999_v27 = vpop.permute.xlu1 %567  ;;  %v1088_v38 = vsel %vm1077_vm3, %v7085_v4, %v1087_v19 }
  0xf9   :  { %v7001_v21 = vrot.slane %v4999_v27, 6  ;;  %v5012_v61 = vsel %vm72_vm0, %v7083_v17, %v88_v49 }
  0xfa   :  { %v1336_v34 = vrot.slane %v645_v36, 2  ;;  %186 = vperm.xlu0 %3800, %v4477_v15   ;;  %7084 = vst [vmem:[#allocation27_spill] sm:$0xff] %v5012_v61  ;;  %v3891_v36 = vpack.i.bf16 %v1090_v41, %v1088_v38  ;;  %v5040_v41 = vpop.permute.xlu0 %772 }
  0xfb   :  { %v606_v2 = vsel %vm396_vm2, %v603_v30, %v7001_v21  ;;  %v7005_v30 = vrot.slane %v4962_v11, 7  ;;  %7088 = vst [vmem:[#allocation29_spill] sm:$0xff] %v5040_v41 }
  0xfc   :  { %v5026_v15 = vmul.f32 %v606_v2, %v5012_v61  ;;  %3784 = vset.pattern.permute.xlu1 %v7086_v25  ;;  %v5032_v9 = vsel %vm1077_vm3, %v7008_v46, %v1336_v34  ;;  %v7006_v2 = vrot.slane %v4989_v47, 7  ;;  %v7097_v46 = vmov 5  }
  0xfd   :  { %7087 = vst [vmem:[#allocation28_spill] sm:$0xff] %v5032_v9  ;;  %388 = vperm.xlu1 %3784, %v4907_v29   ;;  %v755_v17 = vpop.permute.xlu1 %754 }
  0xfe   :  { %v7004_v19 = vrot.slane %v5026_v15, 2  ;;  %v794_v4 = vrot.slane %v755_v17, 7  ;;  %3892 = vrot.lane.b32.xlu0 %v3891_v36, %s4290_s18  ;;  %v5056_v36 = vsel %vm72_vm0, %v88_v49, %v7007_v39  ;;  %v5071_v49 = vpop.permute.xlu0 %781 }
  0xff   :  { %7090 = vst [vmem:[#allocation31_spill] sm:$0xff] %v5056_v36  ;;  %7092 = vst [vmem:[#allocation33_spill] sm:$0xff] %v5071_v49  ;;  %v7099_v49 = vrot.slane %v4791_v6, 6 }
 0x100   :  { %v795_v38 = vsel %vm72_vm0, %v7005_v30, %v794_v4  ;;  %v5048_v25 = vsel %vm1077_vm3, %v1336_v34, %v7004_v19 }
 0x101   :  { %7089 = vst [vmem:[#allocation30_spill] sm:$0xff] %v5048_v25  ;;  %3785 = vset.pattern.permute.xlu1 %v7079_v5  ;;  %v758_v21 = vpop.permute.xlu1 %757  ;;  %v5061_v62 = vmul.f32 %v795_v38, %v4874_v26  ;;  %v7101_v25 = vmov 7  }
 0x102   :  { %v796_v31 = vrot.slane %v758_v21, 7  ;;  %503 = vperm.xlu1 %3785, %v4450_v12   ;;  %196 = vperm.xlu0 %3800, %v4516_v20   ;;  %v5094_v39 = vpop.permute.xlu0 %471 }
 0x103   :  { %v7009_v21 = vrot.slane %v5061_v62, 1 }
 0x104   :  { %v797_v34 = vsel %vm72_vm0, %v794_v4, %v796_v31  ;;  %v799_v19 = vsel %vm72_vm0, %v796_v31, %v7006_v2 }
 0x105   :  { %v838_v17 = vmul.f32 %v797_v34, %v5012_v61  ;;  %v5069_v30 = vmul.f32 %v799_v19, %v5056_v36  ;;  %v7094_v34 = vmov 6  }
 0x106   :  { %507 = vperm.xlu1 %3785, %v4516_v20   ;;  %v5074_v12 = vpop.permute.xlu1 %864  ;;  %v480_v55 = vpop.permute.xlu0 %479 }
 0x107   :  { %7091 = vst [vmem:[#allocation32_spill] sm:$0xff] %v5069_v30  ;;  %v1498_v38 = vrot.slane %v838_v17, 1  ;;  %v7012_v4 = vrot.slane %v5069_v30, 1  ;;  %v530_v41 = vmul.f32 %v480_v55, %v4801_v24  ;;  %v7111_v30 = vrot.slane %v5061_v62, 1 }
 0x109   :  { %v5081_v31 = vsel %vm978_vm1, %v7009_v21, %v1498_v38  ;;  %v5087_v19 = vsel %vm978_vm1, %v1498_v38, %v7012_v4  ;;  %v1234_v38 = vrot.slane %v4865_v1, 1  ;;  %v7098_v4 = vrot.slane %v4811_v63, 6 }
 0x10a   :  { %7093 = vst [vmem:[#allocation34_spill] sm:$0xff] %v5081_v31  ;;  %3787 = vset.pattern.permute.xlu1 %v7094_v34  ;;  %7095 = vst [vmem:[#allocation35_spill] sm:$0xff] %v5087_v19 }
 0x10b   :  { %688 = vperm.xlu1 %3787, %v4431_v8   ;;  %v5090_v2 = vpop.permute.xlu1 %263  ;;  %v7018_v8 = vrot.slane %v4869_v35, 1  ;;  %v600_v17 = vsel %vm396_vm2, %v7099_v49, %v7098_v4  ;;  %v1235_v9 = vsel %vm978_vm1, %v7016_v37, %v1234_v38 }
 0x10c   :  { %7096 = vst [vmem:[#allocation36_spill] sm:$0xff] %v5090_v2  ;;  %v643_v19 = vmul.f32 %v600_v17, %v4865_v1  ;;  %v5123_v17 = vpop.permute.xlu0 %491 }
 0x10d   :  { %v1237_v63 = vsel %vm978_vm1, %v1234_v38, %v7018_v8  ;;  %v7107_v8 = vrot.slane %v4962_v11, 7  ;;  %v907_v11 = vrot.slane %v4652_v22, 6 }
 0x10e   :  { %v3911_v49 = vpack.i.bf16 %v1237_v63, %v1235_v9  ;;  %v1332_v4 = vrot.slane %v643_v19, 2 }
 0x10f   :  { %3788 = vset.pattern.permute.xlu1 %v7097_v46  ;;  %v5097_v21 = vpop.permute.xlu1 %266 }
 0x110   :  { %582 = vperm.xlu1 %3788, %v4907_v29   ;;  %v5136_v19 = vpop.permute.xlu0 %495 }
 0x114   :  { %585 = vperm.xlu1 %3788, %v4485_v16   ;;  %v484_v46 = vpop.permute.xlu1 %483 }
 0x115   :  { %v531_v31 = vmul.f32 %v484_v46, %v4865_v1  ;;  %v7100_v46 = vrot.slane %v4992_v43, 2 }
 0x117   :  { %v3901_v6 = vpack.i.bf16 %v531_v31, %v530_v41  ;;  %v1335_v37 = vsel %vm1077_vm3, %v1332_v4, %v7100_v46 }
 0x118   :  { %3789 = vset.pattern.permute.xlu1 %v7094_v34 }
 0x119   :  { %700 = vperm.xlu1 %3789, %v4516_v20   ;;  %v5120_v55 = vpop.permute.xlu1 %870  ;;  %3902 = vrot.lane.b32.xlu0 %v3901_v6, %s4291_s21  ;;  %v7103_v20 = vrot.slane %v4809_v14, 2  ;;  %v50_v6 = vld [vmem:[%s6956_s0 + $0x50] sm:$0xff] }
 0x11b   :  { %v1333_v31 = vsel %vm1077_vm3, %v7103_v20, %v1332_v4  ;;  %v92_v4 = vrot.slane %v50_v6, 7  ;;  %v7108_v6 = vrot.slane %v4899_v40, 7 }
 0x11c   :  { %v3921_v9 = vpack.i.bf16 %v1335_v37, %v1333_v31  ;;  %v905_v31 = vrot.slane %v5074_v12, 6 }
 0x11d   :  { %3791 = vset.pattern.permute.xlu1 %v7101_v25  ;;  %3912 = vrot.lane.b32.xlu0 %v3911_v49, %s4292_s22  ;;  %v5142_v25 = vpop.permute.xlu0 %511  ;;  %v7019_v49 = vrot.slane %v4739_v60, 6 }
 0x11e   :  { %775 = vperm.xlu1 %3791, %v4907_v29   ;;  %v5131_v41 = vpop.permute.xlu1 %269  ;;  %7105 = vst [vmem:[#allocation39_spill] sm:$0xff] %v5142_v25 }
 0x11f   :  { %7102 = vst [vmem:[#allocation37_spill] sm:$0xff] %v5131_v41  ;;  %v7109_v41 = vrot.slane %v5017_v52, 7 }
 0x121   :  { %3922 = vrot.lane.b32.xlu0 %v3921_v9, %s4293_s23  ;;  %v5147_v14 = vpop.permute.xlu0 %519 }
 0x122   :  { %778 = vperm.xlu1 %3791, %v4485_v16   ;;  %v5140_v43 = vpop.permute.xlu1 %272  ;;  %7106 = vst [vmem:[#allocation40_spill] sm:$0xff] %v5147_v14  ;;  %v793_v14 = vsel %vm72_vm0, %v7108_v6, %v7107_v8 }
 0x123   :  { %7104 = vst [vmem:[#allocation38_spill] sm:$0xff] %v5140_v43  ;;  %v5180_v43 = vsel %vm72_vm0, %v7109_v41, %v92_v4 }
 0x125   :  { %v5166_v9 = vpop.permute.xlu0 %668 }
 0x126   :  { %3793 = vset.pattern.permute.xlu1 %v7075_v3 }
 0x127   :  { %888 = vperm.xlu1 %3793, %v4907_v29   ;;  %v380_v38 = vpop.permute.xlu1 %379 }
 0x128   :  { %v416_v37 = vrot.slane %v380_v38, 6 }
 0x12a   :  { %v417_v46 = vsel %vm396_vm2, %v7019_v49, %v416_v37 }
 0x12b   :  { %891 = vperm.xlu1 %3793, %v4485_v16   ;;  %v5163_v16 = vld [vmem:[%s6956_s0 + $0x58] sm:$0xff]  ;;  %v5174_v49 = vmul.f32 %v417_v46, %v5056_v36  ;;  %v836_v46 = vmul.f32 %v793_v14, %v4869_v35  ;;  %v673_v14 = vpop.permute.xlu0 %672 }
 0x12c   :  { %v5149_v63 = vpop.permute.xlu1 %487  ;;  %v7021_v25 = vrot.slane %v5163_v16, 7 }
 0x12d   :  { %v1097_v22 = vrot.slane %v5174_v49, 2 }
 0x12e   :  { %v5201_v2 = vsel %vm72_vm0, %v92_v4, %v7021_v25 }
 0x12f   :  { %3794 = vset.pattern.permute.xlu1 %v7079_v5 }
 0x130   :  { %515 = vperm.xlu1 %3794, %v4907_v29  }
 0x131   :  { %v383_v20 = vpop.permute.xlu1 %382 }
 0x132   :  { %v418_v38 = vrot.slane %v383_v20, 6  ;;  %v7110_v20 = vrot.slane %v4777_v59, 6 }
 0x134   :  { %v419_v12 = vsel %vm396_vm2, %v416_v37, %v418_v38  ;;  %3795 = vset.pattern.permute.xlu1 %v7075_v3  ;;  %v906_v52 = vsel %vm396_vm2, %v7110_v20, %v905_v31  ;;  %v908_v37 = vsel %vm396_vm2, %v905_v31, %v907_v11  ;;  %v909_v3 = vrot.slane %v5120_v55, 6 }
 0x135   :  { %v456_v40 = vmul.f32 %v419_v12, %v5180_v43  ;;  %894 = vperm.xlu1 %3795, %v4493_v18   ;;  %v5187_v8 = vpop.permute.xlu1 %385  ;;  %v7027_v12 = vrot.slane %v4668_v28, 6  ;;  %v949_v20 = vmul.f32 %v906_v52, %v4869_v35  ;;  %v723_v31 = vmul.f32 %v673_v14, %v4865_v1 }
 0x136   :  { %v7022_v41 = vrot.slane %v5187_v8, 6  ;;  %v950_v4 = vmul.f32 %v908_v37, %v4874_v26 }
 0x137   :  { %v1099_v6 = vrot.slane %v456_v40, 2  ;;  %v1494_v40 = vrot.slane %v836_v46, 1  ;;  %v912_v52 = vsel %vm396_vm2, %v909_v3, %v7027_v12  ;;  %v7130_v12 = vld [vmem:[#allocation19_spill] sm:$0xff] }
 0x138   :  { %v421_v59 = vsel %vm396_vm2, %v418_v38, %v7022_v41  ;;  %v910_v38 = vsel %vm396_vm2, %v907_v11, %v909_v3  ;;  %v1594_v11 = vrot.slane %v950_v4, 2  ;;  %v5233_v3 = vmul.f32 %v912_v52, %v5056_v36 }
 0x139   :  { %v5209_v55 = vmul.f32 %v421_v59, %v5201_v2  ;;  %3797 = vset.pattern.permute.xlu1 %v7079_v5  ;;  %v5213_v49 = vsel %vm1077_vm3, %v1097_v22, %v1099_v6  ;;  %v1592_v5 = vrot.slane %v949_v20, 2  ;;  %v1497_v46 = vsel %vm978_vm1, %v1494_v40, %v7111_v30 }
 0x13a   :  { %523 = vperm.xlu1 %3797, %v4493_v18   ;;  %v677_v25 = vpop.permute.xlu1 %676  ;;  %v951_v37 = vmul.f32 %v910_v38, %v5012_v61  ;;  %v7112_v30 = vrot.slane %v4927_v54, 1  ;;  %v7026_v4 = vrot.slane %v5233_v3, 2  ;;  %v7113_v38 = vrot.slane %v4945_v51, 2 }
 0x13b   :  { %v7025_v14 = vrot.slane %v5209_v55, 2  ;;  %v724_v59 = vmul.f32 %v677_v25, %v4869_v35  ;;  %v1595_v52 = vsel %vm1077_vm3, %v1592_v5, %v1594_v11  ;;  %v722_v25 = vmul.f32 %v5166_v9, %v4801_v24 }
 0x13d   :  { %v3931_v41 = vpack.i.bf16 %v724_v59, %v723_v31  ;;  %v5229_v18 = vsel %vm1077_vm3, %v1099_v6, %v7025_v14  ;;  %v1495_v6 = vsel %vm978_vm1, %v7112_v30, %v1494_v40  ;;  %v1596_v31 = vrot.slane %v951_v37, 2  ;;  %v5253_v59 = vld [vmem:[%s6957_s1 + $0x70] sm:$0xff]  ;;  %v7128_v14 = vld [vmem:[#allocation17_spill] sm:$0xff] }
 0x13e   :  { %3798 = vset.pattern.permute.xlu1 %v7094_v34  ;;  %v3941_v20 = vpack.i.bf16 %v1497_v46, %v1495_v6  ;;  %v1593_v34 = vsel %vm1077_vm3, %v7113_v38, %v1592_v5  ;;  %v7115_v40 = vrot.slane %v4728_v42, 6  ;;  %v7116_v30 = vmov 0  }
 0x13f   :  { %708 = vperm.xlu1 %3798, %v4907_v29   ;;  %v5239_v62 = vpop.permute.xlu1 %570  ;;  %3932 = vrot.lane.b32.xlu0 %v3931_v41, %s4294_s13  ;;  %v7114_v41 = vrot.slane %v4739_v60, 6  ;;  %v3951_v46 = vpack.i.bf16 %v1595_v52, %v1593_v34  ;;  %v1597_v5 = vsel %vm1077_vm3, %v1594_v11, %v1596_v31  ;;  %v1599_v37 = vsel %vm1077_vm3, %v1596_v31, %v7026_v4  ;;  %v4248_v60 = vld [vmem:[%s6957_s1] sm:$0xff]  ;;  %v4249_v31 = vld [vmem:[%s6957_s1 + $0x10] sm:$0xff]  ;;  %v4250_v52 = vld [vmem:[%s6957_s1 + $0x18] sm:$0xff] }
 0x140   :  { %v7129_v4 = vld [vmem:[#allocation21_spill] sm:$0xff] }
 0x141   :  { %v415_v51 = vsel %vm396_vm2, %v7115_v40, %v7114_v41  ;;  %v7117_v41 = vrot.slane %v4890_v48, 2  ;;  %v7118_v48 = vpack.i.bf16 %v4624_v56, %v4614_v53  ;;  %v7119_v53 = vpack.i.bf16 %v4744_v58, %v4737_v57 }
 0x142   :  { %v454_v6 = vmul.f32 %v415_v51, %v5012_v61  ;;  %v7120_v56 = vrot.slane %v4565_v32, 1 }
 0x143   :  { %712 = vperm.xlu1 %3798, %v5253_v59   ;;  %3942 = vrot.lane.b32.xlu0 %v3941_v20, %s4295_s14  ;;  %v3961_v20 = vpack.i.bf16 %v1599_v37, %v1597_v5  ;;  %v4252_v5 = vld [vmem:[%s6957_s1 + $0x78] sm:$0xff] }
 0x144   :  { %v5257_v54 = vpop.permute.xlu1 %680  ;;  %v1095_v11 = vrot.slane %v454_v6, 2  ;;  %v1230_v6 = vrot.slane %v4592_v44, 1 }
 0x146   :  { %v1098_v34 = vsel %vm1077_vm3, %v1095_v11, %v1097_v22  ;;  %v1096_v40 = vsel %vm1077_vm3, %v7117_v41, %v1095_v11  ;;  %v4251_v22 = vld [vmem:[%s6957_s1 + $0x20] sm:$0xff]  ;;  %v529_v11 = vmul.f32 %v4849_v13, %v4592_v44  ;;  %v292_v13 = vrot.slane %v4734_v45, 7  ;;  %v7125_v45 = vld [vmem:[#allocation7_spill] sm:$0xff] }
 0x147   :  { %3799 = vset.pattern.permute.xlu1 %v7116_v30  ;;  %3952 = vrot.lane.b32.xlu0 %v3951_v46, %s4296_s15  ;;  %v3971_v51 = vpack.i.bf16 %v1098_v34, %v1096_v40  ;;  %v4253_v30 = vld [vmem:[%s6957_s1 + $0x30] sm:$0xff]  ;;  %v1231_v34 = vsel %vm978_vm1, %v7120_v56, %v1230_v6  ;;  %v607_v40 = vrot.slane %v5239_v62, 6  ;;  %v7028_v56 = vrot.slane %v5012_v61, 1 }
 0x148   :  { %141 = vperm.xlu1 %3799, %v4248_v60   ;;  %v5274_v42 = vpop.permute.xlu1 %684  ;;  %v528_v60 = vmul.f32 %v5094_v39, %v4565_v32 }
 0x14a   :  { %v3826_v41 = vpack.i.bf16 %v529_v11, %v528_v60  ;;  %v7126_v60 = vrot.slane %v7125_v45, 7 }
 0x14b   :  { %3962 = vrot.lane.b32.xlu0 %v3961_v20, %s4296_s15  ;;  %v5313_v20 = vpop.permute.xlu0 %692 }
 0x14c   :  { %151 = vperm.xlu1 %3799, %v4249_v31   ;;  %v293_v11 = vsel %vm72_vm0, %v7126_v60, %v292_v13  ;;  %v534_v60 = vmul.f32 %v5136_v19, %v5012_v61  ;;  %v721_v19 = vmul.f32 %v4966_v33, %v4592_v44 }
 0x14d   :  { %v5280_v38 = vpop.permute.xlu1 %579  ;;  %v336_v45 = vmul.f32 %v293_v11, %v4801_v24 }
 0x14f   :  { %206 = vperm.xlu0 %3800, %v4907_v29  }
 0x150   :  { %156 = vperm.xlu1 %3799, %v4250_v52   ;;  %v7121_v52 = vrot.slane %v4801_v24, 1 }
 0x152   :  { %v5290_v46 = vpop.permute.xlu1 %766  ;;  %v1233_v39 = vsel %vm978_vm1, %v1230_v6, %v7121_v52  ;;  %v1242_v52 = vrot.slane %v5056_v36, 1 }
 0x153   :  { %3972 = vrot.lane.b32.xlu0 %v3971_v51, %s4290_s18  ;;  %v7122_v51 = vld [vmem:[#allocation10_spill] sm:$0xff]  ;;  %v3836_v58 = vpack.i.bf16 %v1233_v39, %v1231_v34  ;;  %v4297_v39 = vmov 65535   ;;  %v7180_v32 = vrot.slane %v5290_v46, 7 }
 0x154   :  { %161 = vperm.xlu1 %3799, %v4251_v22   ;;  %v294_v22 = vrot.slane %v7122_v51, 7  ;;  %v7029_v51 = vrot.slane %v5180_v43, 1 }
 0x156   :  { %v5296_v29 = vpop.permute.xlu1 %769  ;;  %v295_v34 = vsel %vm72_vm0, %v292_v13, %v294_v22  ;;  %v1245_v11 = vsel %vm978_vm1, %v1242_v52, %v7029_v51  ;;  %v3856_v51 = vpack.i.bf16 %v722_v25, %v721_v19  ;;  %v7133_v25 = vrot.slane %v5026_v15, 2 }
 0x157   :  { %216 = vperm.xlu0 %3800, %v4252_v5   ;;  %v7123_v5 = vld [vmem:[#allocation20_spill] sm:$0xff] }
 0x158   :  { %3807 = vrot.lane.b32.xlu1 %v7118_v48, %s4289_s17  ;;  %v7024_v48 = vrot.slane %v7123_v5, 6 }
 0x15a   :  { %v610_v62 = vsel %vm396_vm2, %v607_v40, %v7024_v48 }
 0x15b   :  { %v5305_v37 = vpop.permute.xlu1 %876 }
 0x15c   :  { %171 = vperm.xlu1 %3799, %v4253_v30   ;;  %v5333_v30 = vpop.permute.xlu0 %696 }
 0x160   :  { %v5317_v31 = vpop.permute.xlu1 %275  ;;  %3817 = vrot.lane.b32.xlu1 %v7119_v53, %s4290_s18  ;;  %v7124_v53 = vrot.slane %v4999_v27, 6  ;;  %v7127_v27 = vld [vmem:[#allocation11_spill] sm:$0xff]  ;;  %v5362_v48 = vpop.permute.xlu0 %704 }
 0x162   :  { %v608_v6 = vsel %vm396_vm2, %v7124_v53, %v607_v40  ;;  %v5355_v40 = vmul.f32 %v610_v62, %v5180_v43  ;;  %v1243_v62 = vsel %vm978_vm1, %v7028_v56, %v1242_v52  ;;  %v4225_v56 = vld [vmem:[%s6959_s3 + $0x8] sm:$0x3f]   ;;  %v1849_v52 = vsel %vm1848_vm4, 4294967295, %v4297_v39 }
 0x163   :  { %v3991_v33 = vpack.i.bf16 %v1245_v11, %v1243_v62 }
 0x164   :  { %v5335_v57 = vpop.permute.xlu1 %278  ;;  %3827 = vrot.lane.b32.xlu1 %v3826_v41, %s4291_s21  ;;  %v647_v41 = vmul.f32 %v608_v6, %v5056_v36  ;;  %v296_v6 = vrot.slane %v7128_v14, 7  ;;  %v5392_v44 = vpop.permute.xlu0 %716  ;;  %v7134_v62 = vrot.slane %v5355_v40, 2 }
 0x168   :  { %3837 = vrot.lane.b32.xlu1 %v3836_v58, %s4292_s22  ;;  %v337_v58 = vmul.f32 %v295_v34, %v4865_v1  ;;  %v1340_v34 = vrot.slane %v647_v41, 2 }
 0x169   :  { %v500_v53 = vpop.permute.xlu1 %499 }
 0x16a   :  { %v535_v13 = vmul.f32 %v500_v53, %v5056_v36  ;;  %v7131_v53 = vpack.i.bf16 %v7129_v4, %v7130_v12  ;;  %v1850_v12 = vsel %vm1077_vm3, %v1849_v52, 0  ;;  %v988_v4 = vrot.slane %v336_v45, 1  ;;  %v5419_v52 = vpop.permute.xlu0 %146 }
 0x16b   :  { %v1852_v41 = vand.u32 %v4225_v56, %v1850_v12  ;;  %v1341_v39 = vsel %vm1077_vm3, %v7133_v25, %v1340_v34  ;;  %v1343_v45 = vsel %vm1077_vm3, %v1340_v34, %v7134_v62  ;;  %v800_v25 = vrot.slane %v5006_v50, 7  ;;  %v52_v62 = vld [vmem:[%s6956_s0 + $0x60] sm:$0xff]  ;;  %v5449_v50 = vld [vmem:[%s6956_s0 + $0x68] sm:$0xff] }
 0x16c   :  { %v3981_v9 = vpack.i.bf16 %v535_v13, %v534_v60  ;;  %3847 = vrot.lane.b32.xlu1 %v7131_v53, %s4293_s23  ;;  %v990_v60 = vrot.slane %v337_v58, 1  ;;  %v297_v13 = vsel %vm72_vm0, %v294_v22, %v296_v6  ;;  %v7132_v53 = vrot.slane %v7127_v27, 7  ;;  %v4226_v22 = vld [vmem:[%s6959_s3] sm:$0xff]  }
 0x16d   :  { %3607 = vmatprep.subr.bf16.mxu0 %v1852_v41  ;;  %v338_v56 = vmul.f32 %v297_v13, %v4869_v35  ;;  %v7135_v58 = vld [vmem:[#allocation9_spill] sm:$0xff]  ;;  %v4001_v34 = vpack.i.bf16 %v1343_v45, %v1341_v39 }
 0x16e   :  { %v5384_v1 = vpop.permute.xlu1 %882  ;;  %3982 = vrot.lane.b32.xlu0 %v3981_v9, %s4291_s21  ;;  %v299_v14 = vsel %vm72_vm0, %v296_v6, %v7132_v53  ;;  %3608 = vmatpush3.bf16.msra.mxu0 %v1852_v41  ;;  %v7136_v6 = vrot.slane %v7135_v58, 1  ;;  %v991_v19 = vsel %vm978_vm1, %v988_v4, %v990_v60  ;;  %v7137_v9 = vpack.i.bf16 %v4953_v10, %v4931_v7  ;;  %v5429_v10 = vpop.permute.xlu0 %3802  ;;  %v4254_v53 = vld [vmem:[%s6957_s1 + $0x40] sm:$0xff] }
 0x16f   :  { %3609 = vmatprep.subr.bf16.mxu0 %v4226_v22 }
 0x170   :  { %3857 = vrot.lane.b32.xlu1 %v3856_v51, %s4294_s13  ;;  %v5407_v51 = vmul.f32 %v299_v14, %v4874_v26  ;;  %v989_v11 = vsel %vm978_vm1, %v7136_v6, %v988_v4  ;;  %v7032_v4 = vrot.slane %v5290_v46, 7  ;;  %v7139_v6 = vrot.slane %v4989_v47, 7 }
 0x171   :  { %v3876_v14 = vpack.i.bf16 %v991_v19, %v989_v11  ;;  %v96_v19 = vrot.slane %v52_v62, 7  ;;  %v1238_v62 = vrot.slane %v4874_v26, 1  ;;  %v310_v46 = vrot.slane %v5335_v57, 7 }
 0x172   :  { %3992 = vrot.lane.b32.xlu0 %v3991_v33, %s4292_s22  ;;  %v992_v33 = vrot.slane %v338_v56, 1  ;;  %v7033_v12 = vrot.slane %v5407_v51, 1  ;;  %3610 = vmatpush3.bf16.msra.mxu0 %v4226_v22  ;;  %v803_v22 = vsel %vm72_vm0, %v800_v25, %v7032_v4  ;;  %v7138_v56 = vld [vmem:[#allocation12_spill] sm:$0xff]  ;;  %v801_v11 = vsel %vm72_vm0, %v7139_v6, %v800_v25  ;;  %v4255_v25 = vld [vmem:[%s6957_s1 + $0x50] sm:$0xff] }
 0x173   :  { %v5409_v15 = vpop.permute.xlu1 %281  ;;  %v915_v58 = vrot.slane %v7138_v56, 6  ;;  %v533_v6 = vmul.f32 %v5123_v17, %v4874_v26 }
 0x174   :  { %3867 = vrot.lane.b32.xlu1 %v7137_v9, %s4295_s14  ;;  %v993_v13 = vsel %vm978_vm1, %v990_v60, %v992_v33  ;;  %v995_v7 = vsel %vm978_vm1, %v992_v33, %v7033_v12  ;;  %v913_v60 = vrot.slane %v5305_v37, 6  ;;  %v5456_v9 = vpop.permute.xlu0 %166  ;;  %v7144_v12 = vld [vmem:[#allocation15_spill] sm:$0xff] }
 0x175   :  { %v3886_v45 = vpack.i.bf16 %v995_v7, %v993_v13  ;;  %7140 = vst [vmem:[#allocation10_spill] sm:$0xff] %v5456_v9  ;;  %v917_v7 = vrot.slane %v5384_v1, 6 }
 0x176   :  { %4002 = vrot.lane.b32.xlu0 %v4001_v34, %s4293_s23  ;;  %v5459_v34 = vmul.f32 %v803_v22, %v5201_v2  ;;  %v916_v13 = vsel %vm396_vm2, %v913_v60, %v915_v58 }
 0x178   :  { %v389_v41 = vpop.permute.xlu1 %388  ;;  %3877 = vrot.lane.b32.xlu1 %v3876_v14, %s4289_s17  ;;  %v7141_v14 = vrot.slane %v4668_v28, 6  ;;  %v7143_v28 = vrot.slane %v5163_v16, 7  ;;  %v918_v16 = vsel %vm396_vm2, %v915_v58, %v917_v7  ;;  %v7146_v58 = vpack.i.bf16 %v4924_v0, %v4919_v23 }
 0x179   :  { %v7149_v23 = vrot.slane %v5459_v34, 1 }
 0x17a   :  { %v914_v33 = vsel %vm396_vm2, %v7141_v14, %v913_v60  ;;  %v5476_v56 = vsel %vm72_vm0, %v7143_v28, %v96_v19  ;;  %v954_v60 = vmul.f32 %v916_v13, %v5201_v2  ;;  %v532_v14 = vmul.f32 %v5149_v63, %v4869_v35  ;;  %v5498_v63 = vpop.permute.xlu0 %3812 }
 0x17b   :  { %v953_v1 = vmul.f32 %v914_v33, %v5180_v43  ;;  %v422_v28 = vrot.slane %v389_v41, 6 }
 0x17c   :  { %181 = vperm.xlu1 %3799, %v4254_v53   ;;  %v840_v53 = vmul.f32 %v801_v11, %v5180_v43  ;;  %v728_v11 = vmul.f32 %v5313_v20, %v5180_v43  ;;  %v7145_v20 = vrot.slane %v5449_v50, 7 }
 0x17d   :  { %v5435_v39 = vpop.permute.xlu1 %503 }
 0x17e   :  { %v1502_v47 = vrot.slane %v840_v53, 1  ;;  %v5496_v9 = vsel %vm72_vm0, %v96_v19, %v7145_v20  ;;  %v7148_v53 = vrot.slane %v5012_v61, 1  ;;  %v3906_v19 = vpack.i.bf16 %v533_v6, %v532_v14  ;;  %v7152_v6 = vld [vmem:[#allocation32_spill] sm:$0xff] }
 0x17f   :  { %v955_v20 = vmul.f32 %v918_v16, %v5476_v56  ;;  %v7153_v14 = vrot.slane %v7152_v6, 1 }
 0x180   :  { %3887 = vrot.lane.b32.xlu1 %v3886_v45, %s4289_s17  ;;  %v7142_v45 = vld [vmem:[#allocation14_spill] sm:$0xff]  ;;  %v1505_v0 = vsel %vm978_vm1, %v1502_v47, %v7149_v23  ;;  %v7155_v23 = vrot.slane %v5233_v3, 2 }
 0x181   :  { %v5454_v37 = vpop.permute.xlu1 %507  ;;  %v7034_v22 = vrot.slane %v7142_v45, 6  ;;  %v1503_v16 = vsel %vm978_vm1, %v7153_v14, %v1502_v47 }
 0x183   :  { %v920_v33 = vsel %vm396_vm2, %v917_v7, %v7034_v22  ;;  %v7147_v7 = vrot.slane %v4869_v35, 1  ;;  %v1602_v22 = vrot.slane %v954_v60, 2  ;;  %v7151_v60 = vrot.slane %v7144_v12, 6 }
 0x184   :  { %191 = vperm.xlu1 %3799, %v4255_v25   ;;  %v1241_v25 = vsel %vm978_vm1, %v1238_v62, %v7148_v53  ;;  %v5512_v24 = vmul.f32 %v920_v33, %v5496_v9  ;;  %v4021_v53 = vpack.i.bf16 %v1505_v0, %v1503_v16 }
 0x185   :  { %v1239_v41 = vsel %vm978_vm1, %v7147_v7, %v1238_v62  ;;  %v302_v62 = vrot.slane %v5097_v21, 7 }
 0x186   :  { %v689_v4 = vpop.permute.xlu1 %688  ;;  %v3916_v33 = vpack.i.bf16 %v1241_v25, %v1239_v41  ;;  %v7036_v21 = vrot.slane %v5512_v24, 2  ;;  %v7157_v25 = vrot.slane %v7127_v27, 7  ;;  %v7158_v27 = vld [vmem:[#allocation38_spill] sm:$0xff] }
 0x187   :  { %v727_v13 = vmul.f32 %v689_v4, %v5056_v36  ;;  %v1600_v4 = vrot.slane %v953_v1, 2 }
 0x188   :  { %3897 = vrot.lane.b32.xlu1 %v7146_v58, %s4290_s18  ;;  %v7150_v58 = vrot.slane %v5187_v8, 6  ;;  %v7154_v8 = vld [vmem:[#allocation36_spill] sm:$0xff] }
 0x189   :  { %v4011_v17 = vpack.i.bf16 %v728_v11, %v727_v13  ;;  %v425_v11 = vsel %vm396_vm2, %v422_v28, %v7151_v60  ;;  %v300_v7 = vrot.slane %v7154_v8, 7  ;;  %v5536_v60 = vpop.permute.xlu0 %176 }
 0x18a   :  { %v423_v1 = vsel %vm396_vm2, %v7150_v58, %v422_v28  ;;  %v1601_v28 = vsel %vm1077_vm3, %v7155_v23, %v1600_v4  ;;  %v1603_v58 = vsel %vm1077_vm3, %v1600_v4, %v1602_v22  ;;  %7156 = vst [vmem:[#allocation20_spill] sm:$0xff] %v5536_v60  ;;  %v5541_v6 = vmul.f32 %v425_v11, %v5496_v9 }
 0x18b   :  { %v5523_v13 = vpop.permute.xlu1 %582  ;;  %4012 = vrot.lane.b32.xlu0 %v4011_v17, %s4294_s13  ;;  %v1604_v17 = vrot.slane %v955_v20, 2  ;;  %v303_v3 = vsel %vm72_vm0, %v300_v7, %v302_v62  ;;  %v301_v41 = vsel %vm72_vm0, %v7157_v25, %v300_v7  ;;  %v726_v4 = vmul.f32 %v5274_v42, %v5012_v61 }
 0x18c   :  { %3907 = vrot.lane.b32.xlu1 %v3906_v19, %s4291_s21  ;;  %v458_v19 = vmul.f32 %v423_v1, %v5476_v56  ;;  %v4031_v20 = vpack.i.bf16 %v1603_v58, %v1601_v28  ;;  %v7037_v1 = vrot.slane %v5541_v6, 2  ;;  %v341_v16 = vmul.f32 %v303_v3, %v5056_v36 }
 0x18d   :  { %v1605_v11 = vsel %vm1077_vm3, %v1602_v22, %v1604_v17  ;;  %v1607_v14 = vsel %vm1077_vm3, %v1604_v17, %v7036_v21  ;;  %v5561_v8 = vpop.permute.xlu0 %3822  ;;  %v725_v42 = vmul.f32 %v5257_v54, %v4874_v26  ;;  %v7160_v22 = vld [vmem:[#allocation28_spill] sm:$0xff]  ;;  %v340_v28 = vmul.f32 %v301_v41, %v5012_v61  ;;  %v7162_v17 = vld [vmem:[#allocation37_spill] sm:$0xff]  ;;  %v7175_v26 = vld [vmem:[#allocation39_spill] sm:$0xff] }
 0x18e   :  { %v1103_v0 = vrot.slane %v458_v19, 2  ;;  %v4041_v58 = vpack.i.bf16 %v1607_v14, %v1605_v11  ;;  %v304_v19 = vrot.slane %v7162_v17, 7  ;;  %v7163_v25 = vrot.slane %v5209_v55, 2 }
 0x18f   :  { %v5543_v47 = vpop.permute.xlu1 %585  ;;  %4022 = vrot.lane.b32.xlu0 %v4021_v53, %s4295_s14  ;;  %v7159_v53 = vld [vmem:[#allocation30_spill] sm:$0xff]  ;;  %v3936_v3 = vpack.i.bf16 %v726_v4, %v725_v42  ;;  %v998_v21 = vrot.slane %v341_v16, 1  ;;  %v996_v41 = vrot.slane %v340_v28, 1  ;;  %v7164_v16 = vld [vmem:[#allocation35_spill] sm:$0xff]  ;;  %v7174_v36 = vrot.slane %v7123_v5, 6 }
 0x190   :  { %3917 = vrot.lane.b32.xlu1 %v3916_v33, %s4292_s22  ;;  %v7039_v33 = vrot.slane %v7158_v27, 7  ;;  %v7161_v23 = vpack.i.bf16 %v7159_v53, %v7160_v22  ;;  %v1106_v54 = vsel %vm1077_vm3, %v1103_v0, %v7037_v1  ;;  %v305_v55 = vsel %vm72_vm0, %v302_v62, %v304_v19  ;;  %v7165_v22 = vld [vmem:[#allocation34_spill] sm:$0xff] }
 0x191   :  { %v5587_v14 = vpop.permute.xlu0 %3832  ;;  %v342_v28 = vmul.f32 %v305_v55, %v5180_v43  ;;  %v7167_v62 = vrot.slane %v5407_v51, 1  ;;  %v613_v1 = vrot.slane %v5280_v38, 6  ;;  %v1248_v38 = vrot.slane %v5476_v56, 1 }
 0x192   :  { %v307_v53 = vsel %vm72_vm0, %v304_v19, %v7039_v33  ;;  %v1246_v61 = vrot.slane %v5201_v2, 1 }
 0x193   :  { %4032 = vrot.lane.b32.xlu0 %v4031_v20, %s4296_s15  ;;  %v1104_v20 = vsel %vm1077_vm3, %v7163_v25, %v1103_v0  ;;  %v5590_v42 = vmul.f32 %v307_v53, %v5201_v2  ;;  %v999_v0 = vsel %vm978_vm1, %v996_v41, %v998_v21  ;;  %v997_v17 = vsel %vm978_vm1, %v7167_v62, %v996_v41  ;;  %v5614_v53 = vld [vmem:[%s6956_s0 + $0x78] sm:$0xff] }
 0x194   :  { %v5565_v7 = vpop.permute.xlu1 %700  ;;  %3927 = vrot.lane.b32.xlu1 %v7161_v23, %s4293_s23  ;;  %v4051_v4 = vpack.i.bf16 %v1106_v54, %v1104_v20  ;;  %v7166_v23 = vpack.i.bf16 %v7164_v16, %v7165_v22  ;;  %v3956_v19 = vpack.i.bf16 %v999_v0, %v997_v17  ;;  %v54_v20 = vld [vmem:[%s6956_s0 + $0x70] sm:$0xff]  ;;  %v1000_v54 = vrot.slane %v342_v28, 1  ;;  %v4256_v16 = vld [vmem:[%s6957_s1 + $0x60] sm:$0xff]  ;;  %s4309_s0 = smov 42  }
 0x195   :  { %v5605_v25 = vpop.permute.xlu0 %3842  ;;  %v615_v28 = vrot.slane %v5523_v13, 6  ;;  %v7170_v0 = vld [vmem:[#allocation22_spill] sm:$0xff]  ;;  %v7171_v22 = vrot.slane %v5543_v47, 6  ;;  %v7172_v13 = vrot.slane %v5614_v53, 7 }
 0x197   :  { %4042 = vrot.lane.b32.xlu0 %v4041_v58, %s4296_s15 }
 0x198   :  { %3937 = vrot.lane.b32.xlu1 %v3936_v3, %s4294_s13  ;;  %v7038_v3 = vrot.slane %v5590_v42, 1 }
 0x199   :  { %v5584_v11 = vpop.permute.xlu1 %775  ;;  %v5621_v55 = vpop.permute.xlu0 %3852 }
 0x19a   :  { %v1003_v41 = vsel %vm978_vm1, %v1000_v54, %v7038_v3  ;;  %v7169_v3 = vrot.slane %v5449_v50, 7  ;;  %v1250_v50 = vrot.slane %v5496_v9, 1 }
 0x19b   :  { %4052 = vrot.lane.b32.xlu0 %v4051_v4, %s4290_s18  ;;  %v100_v4 = vrot.slane %v54_v20, 7 }
 0x19c   :  { %3947 = vrot.lane.b32.xlu1 %v7166_v23, %s4295_s14  ;;  %v1001_v23 = vsel %vm978_vm1, %v998_v21, %v1000_v54  ;;  %v618_v21 = vsel %vm396_vm2, %v615_v28, %v7171_v22 }
 0x19d   :  { %v5599_v58 = vpop.permute.xlu1 %778  ;;  %v3966_v17 = vpack.i.bf16 %v1003_v41, %v1001_v23  ;;  %v5637_v33 = vsel %vm72_vm0, %v7169_v3, %v100_v4  ;;  %v5647_v54 = vsel %vm72_vm0, %v100_v4, %v7172_v13  ;;  %v5652_v41 = vpop.permute.xlu0 %3862  ;;  %v7173_v23 = vrot.slane %v7144_v12, 6 }
 0x1a0   :  { %3957 = vrot.lane.b32.xlu1 %v3956_v19, %s4289_s17  ;;  %v7168_v19 = vld [vmem:[#allocation16_spill] sm:$0xff] }
 0x1a1   :  { %v426_v20 = vrot.slane %v7168_v19, 6  ;;  %v5660_v19 = vmul.f32 %v618_v21, %v5637_v33  ;;  %v1251_v21 = vsel %vm978_vm1, %v1248_v38, %v1250_v50 }
 0x1a2   :  { %v5616_v51 = vpop.permute.xlu1 %888 }
 0x1a3   :  { %v427_v22 = vsel %vm396_vm2, %v7173_v23, %v426_v20  ;;  %v5663_v13 = vmul.f32 %v426_v20, %v5647_v54  ;;  %v7176_v23 = vrot.slane %v5637_v33, 1 }
 0x1a4   :  { %201 = vperm.xlu1 %3799, %v4256_v16   ;;  %v611_v16 = vrot.slane %v7170_v0, 6  ;;  %v616_v0 = vsel %vm396_vm2, %v613_v1, %v615_v28  ;;  %v538_v28 = vmul.f32 %v7175_v26, %v5476_v56  ;;  %v537_v26 = vmul.f32 %v5454_v37, %v5201_v2 }
 0x1a5   :  { %v1253_v20 = vsel %vm978_vm1, %v1250_v50, %v7176_v23  ;;  %v1109_v60 = vrot.slane %v5663_v13, 2  ;;  %v5689_v23 = vpop.permute.xlu0 %3872  ;;  %v7177_v37 = vpack.i.bf16 %v5229_v18, %v5213_v49  ;;  %v808_v13 = vrot.slane %v5584_v11, 7 }
 0x1a6   :  { %v5630_v62 = vpop.permute.xlu1 %891  ;;  %v612_v3 = vsel %vm396_vm2, %v7174_v36, %v611_v16  ;;  %v804_v36 = vrot.slane %v5296_v29, 7  ;;  %v536_v29 = vmul.f32 %v5435_v39, %v5180_v43  ;;  %v7179_v39 = vld [vmem:[#allocation29_spill] sm:$0xff] }
 0x1a7   :  { %v649_v50 = vmul.f32 %v612_v3, %v5201_v2  ;;  %v7178_v3 = vrot.slane %v5180_v43, 1 }
 0x1a8   :  { %3967 = vrot.lane.b32.xlu1 %v3966_v17, %s4289_s17  ;;  %v614_v17 = vsel %vm396_vm2, %v611_v16, %v613_v1  ;;  %v651_v1 = vmul.f32 %v616_v0, %v5496_v9  ;;  %v1249_v0 = vsel %vm978_vm1, %v1246_v61, %v1248_v38  ;;  %v805_v49 = vsel %vm72_vm0, %v7180_v32, %v804_v36 }
 0x1a9   :  { %v650_v5 = vmul.f32 %v614_v17, %v5476_v56  ;;  %v3986_v18 = vpack.i.bf16 %v537_v26, %v536_v29  ;;  %v1344_v38 = vrot.slane %v649_v50, 2  ;;  %v842_v26 = vmul.f32 %v805_v49, %v5476_v56 }
 0x1aa   :  { %v308_v50 = vrot.slane %v5317_v31, 7 }
 0x1ab   :  { %v516_v4 = vpop.permute.xlu1 %515  ;;  %v1346_v35 = vrot.slane %v650_v5, 2  ;;  %v1506_v49 = vrot.slane %v842_v26, 1 }
 0x1ac   :  { %v539_v12 = vmul.f32 %v516_v4, %v5496_v9  ;;  %211 = vperm.xlu1 %3799, %v5253_v59   ;;  %v5683_v59 = vmul.f32 %v427_v22, %v5637_v33  ;;  %v4071_v22 = vpack.i.bf16 %v1253_v20, %v1251_v21  ;;  %v806_v4 = vrot.slane %v7179_v39, 7 }
 0x1ad   :  { %v923_v21 = vrot.slane %v5630_v62, 6  ;;  %v7182_v20 = vrot.slane %v5660_v19, 2 }
 0x1ae   :  { %v4061_v16 = vpack.i.bf16 %v539_v12, %v538_v28  ;;  %v1348_v28 = vrot.slane %v651_v1, 2  ;;  %v1247_v12 = vsel %vm978_vm1, %v7178_v3, %v1246_v61  ;;  %v7181_v1 = vrot.slane %v5599_v58, 7 }
 0x1af   :  { %v807_v5 = vsel %vm72_vm0, %v804_v36, %v806_v4  ;;  %v3996_v32 = vpack.i.bf16 %v1249_v0, %v1247_v12  ;;  %v809_v29 = vsel %vm72_vm0, %v806_v4, %v808_v13  ;;  %v5728_v36 = vpop.permute.xlu0 %3882  ;;  %v1347_v0 = vsel %vm1077_vm3, %v1344_v38, %v1346_v35 }
 0x1b0   :  { %v5693_v17 = vpop.permute.xlu1 %894  ;;  %3977 = vrot.lane.b32.xlu1 %v7177_v37, %s4290_s18  ;;  %4062 = vrot.lane.b32.xlu0 %v4061_v16, %s4291_s21  ;;  %v1107_v16 = vrot.slane %v5683_v59, 2  ;;  %v811_v11 = vsel %vm72_vm0, %v808_v13, %v7181_v1  ;;  %v1351_v61 = vsel %vm1077_vm3, %v1348_v28, %v7182_v20  ;;  %v921_v37 = vrot.slane %v5616_v51, 6 }
 0x1b1   :  { %v1349_v39 = vsel %vm1077_vm3, %v1346_v35, %v1348_v28  ;;  %v5731_v57 = vmul.f32 %v811_v11, %v5647_v54  ;;  %v843_v51 = vmul.f32 %v807_v5, %v5496_v9  ;;  %v311_v28 = vsel %vm72_vm0, %v308_v50, %v310_v46 }
 0x1b2   :  { %v924_v31 = vsel %vm396_vm2, %v921_v37, %v923_v21  ;;  %v312_v13 = vrot.slane %v5409_v15, 7  ;;  %v844_v12 = vmul.f32 %v809_v29, %v5637_v33  ;;  %v7184_v35 = vrot.slane %v5355_v40, 2 }
 0x1b3   :  { %v7185_v1 = vrot.slane %v7142_v45, 6  ;;  %v5757_v15 = vsel %vm1077_vm3, %v1107_v16, %v1109_v60  ;;  %v730_v40 = vmul.f32 %v5565_v7, %v5476_v56  ;;  %v5768_v45 = vmul.f32 %v924_v31, %v5647_v54 }
 0x1b4   :  { %3987 = vrot.lane.b32.xlu1 %v3986_v18, %s4291_s21  ;;  %4072 = vrot.lane.b32.xlu0 %v4071_v22, %s4292_s22  ;;  %v4081_v18 = vpack.i.bf16 %v1351_v61, %v1349_v39  ;;  %v7183_v22 = vrot.slane %v5614_v53, 7  ;;  %v1345_v53 = vsel %vm1077_vm3, %v7184_v35, %v1344_v38  ;;  %v7186_v61 = vrot.slane %v7158_v27, 7 }
 0x1b5   :  { %v5724_v3 = vpop.permute.xlu1 %523  ;;  %v922_v11 = vsel %vm396_vm2, %v7185_v1, %v921_v37  ;;  %v4006_v20 = vpack.i.bf16 %v1347_v0, %v1345_v53  ;;  %v1512_v38 = vrot.slane %v5731_v57, 1  ;;  %v731_v29 = vmul.f32 %v5362_v48, %v5496_v9  ;;  %v7187_v0 = vld [vmem:[#allocation13_spill] sm:$0xff] }
 0x1b6   :  { %v5737_v4 = vsel %vm72_vm0, %v7183_v22, 0.0  ;;  %v309_v5 = vsel %vm72_vm0, %v7186_v61, %v308_v50  ;;  %v1508_v60 = vrot.slane %v843_v51, 1  ;;  %v5773_v37 = vmul.f32 %v311_v28, %v5496_v9  ;;  %v7189_v61 = vld [vmem:[#allocation23_spill] sm:$0xff] }
 0x1b7   :  { %v729_v39 = vmul.f32 %v5333_v30, %v5201_v2  ;;  %v313_v7 = vsel %vm72_vm0, %v310_v46, %v312_v13  ;;  %v1510_v50 = vrot.slane %v844_v12, 1  ;;  %v220_v22 = vmul.f32 %v5419_v52, %v7187_v0 }
 0x1b8   :  { %3997 = vrot.lane.b32.xlu1 %v3996_v32, %s4292_s22  ;;  %4082 = vrot.lane.b32.xlu0 %v4081_v18, %s4293_s23  ;;  %v5762_v32 = vpop.permute.xlu0 %186  ;;  %v957_v18 = vmul.f32 %v922_v11, %v5637_v33  ;;  %v3805_v48 = vunpack.i.h.bf16 %v5429_v10  ;;  %v344_v51 = vmul.f32 %v309_v5, %v5476_v56  ;;  %v1610_v30 = vrot.slane %v5768_v45, 2  ;;  %v7200_v45 = vld [vmem:[#allocation5_spill] sm:$0xff] }
 0x1b9   :  { %v4016_v28 = vpack.i.bf16 %v730_v40, %v729_v39  ;;  %v1513_v46 = vsel %vm978_vm1, %v1510_v50, %v1512_v38  ;;  %v7188_v12 = vrot.slane %v5459_v34, 1  ;;  %v1006_v53 = vrot.slane %v5773_v37, 1 }
 0x1ba   :  { %v709_v26 = vpop.permute.xlu1 %708  ;;  %v346_v1 = vmul.f32 %v313_v7, %v5637_v33  ;;  %v347_v11 = vmul.f32 %v312_v13, %v5647_v54  ;;  %v619_v5 = vrot.slane %v7189_v61, 6  ;;  %v3815_v40 = vunpack.i.h.bf16 %v5498_v63 }
 0x1bb   :  { %v732_v27 = vmul.f32 %v709_v26, %v5637_v33  ;;  %v1507_v52 = vsel %vm978_vm1, %v7188_v12, %v1506_v49  ;;  %v1608_v34 = vrot.slane %v957_v18, 2  ;;  %v1004_v37 = vrot.slane %v344_v51, 1 }
 0x1bc   :  { %4007 = vrot.lane.b32.xlu1 %v4006_v20, %s4293_s23  ;;  %v1509_v20 = vsel %vm978_vm1, %v1506_v49, %v1508_v60  ;;  %v5801_v26 = vpop.permute.xlu0 %3892  ;;  %v1666_v13 = vsel %vm1664_vm5, %v220_v22, %v3805_v48  ;;  %v3804_v39 = vunpack.i.l.bf16 %v5429_v10  ;;  %v3814_v18 = vunpack.i.l.bf16 %v5498_v63 }
 0x1bd   :  { %v4091_v31 = vpack.i.bf16 %v732_v27, %v731_v29  ;;  %v1511_v29 = vsel %vm978_vm1, %v1508_v60, %v1510_v50  ;;  %v4026_v49 = vpack.i.bf16 %v1509_v20, %v1507_v52  ;;  %v1611_v7 = vsel %vm1077_vm3, %v1608_v34, %v1610_v30 }
 0x1be   :  { %v5786_v35 = vpop.permute.xlu1 %712  ;;  %v4101_v27 = vpack.i.bf16 %v1513_v46, %v1511_v29  ;;  %v1008_v0 = vrot.slane %v346_v1, 1  ;;  %v1007_v60 = vsel %vm978_vm1, %v1004_v37, %v1006_v53  ;;  %v1683_v50 = vsel %vm1681_vm6, %v1666_v13, %v3815_v40 }
 0x1bf   :  { %4092 = vrot.lane.b32.xlu0 %v4091_v31, %s4294_s13  ;;  %v1010_v31 = vrot.slane %v347_v11, 1  ;;  %v3825_v22 = vunpack.i.h.bf16 %v5561_v8  ;;  %v7190_v51 = vrot.slane %v5512_v24, 2  ;;  %v3835_v46 = vunpack.i.h.bf16 %v5587_v14 }
 0x1c0   :  { %4017 = vrot.lane.b32.xlu1 %v4016_v28, %s4294_s13  ;;  %v5815_v10 = vpop.permute.xlu0 %196  ;;  %v3834_v12 = vunpack.i.l.bf16 %v5587_v14  ;;  %v7191_v1 = vrot.slane %v5590_v42, 1  ;;  %v3824_v20 = vunpack.i.l.bf16 %v5561_v8  ;;  %v3845_v40 = vunpack.i.h.bf16 %v5605_v25 }
 0x1c1   :  { %v1609_v63 = vsel %vm1077_vm3, %v7190_v51, %v1608_v34  ;;  %v3855_v24 = vunpack.i.h.bf16 %v5621_v55  ;;  %v1009_v14 = vsel %vm978_vm1, %v1006_v53, %v1008_v0  ;;  %v1011_v42 = vsel %vm978_vm1, %v1008_v0, %v1010_v31 }
 0x1c2   :  { %v4111_v52 = vpack.i.bf16 %v1611_v7, %v1609_v63  ;;  %v1005_v11 = vsel %vm978_vm1, %v7191_v1, %v1004_v37  ;;  %v1700_v37 = vsel %vm1698_vm7, %v1683_v50, %v3825_v22  ;;  %v3844_v8 = vunpack.i.l.bf16 %v5605_v25 }
 0x1c3   :  { %v142_v28 = vpop.permute.xlu1 %141  ;;  %4102 = vrot.lane.b32.xlu0 %v4101_v27, %s4295_s14  ;;  %v4036_v27 = vpack.i.bf16 %v1007_v60, %v1005_v11  ;;  %v1717_v7 = vsel %vm1715_vm8, %v1700_v37, %v3835_v46  ;;  %v3864_v31 = vunpack.i.l.bf16 %v5652_v41  ;;  %v4046_v25 = vpack.i.bf16 %v1011_v42, %v1009_v14  ;;  %v7196_v37 = vld [vmem:[#allocation33_spill] sm:$0xff] }
 0x1c4   :  { %v219_v48 = vmul.f32 0.0, %v142_v28  ;;  %4027 = vrot.lane.b32.xlu1 %v4026_v49, %s4295_s14  ;;  %v3865_v49 = vunpack.i.h.bf16 %v5652_v41  ;;  %v3875_v28 = vunpack.i.h.bf16 %v5689_v23  ;;  %v1734_v0 = vsel %vm1732_vm9, %v1717_v7, %v3845_v40  ;;  %v5847_v60 = vpop.permute.xlu0 %3902 }
 0x1c5   :  { %v3874_v22 = vunpack.i.l.bf16 %v5689_v23  ;;  %v1751_v46 = vsel %vm1749_vm10, %v1734_v0, %v3855_v24  ;;  %v7193_v41 = vrot.slane %v5543_v47, 6  ;;  %v1256_v1 = vrot.slane %v5737_v4, 1 }
 0x1c6   :  { %v1665_v29 = vsel %vm1664_vm5, %v219_v48, %v3804_v39  ;;  %v1768_v59 = vsel %vm1766_vm11, %v1751_v46, %v3865_v49  ;;  %v541_v47 = vmul.f32 %v5724_v3, %v5647_v54  ;;  %v654_v3 = vmul.f32 %v619_v5, %v5737_v4 }
 0x1c7   :  { %v1682_v34 = vsel %vm1681_vm6, %v1665_v29, %v3814_v18  ;;  %v5831_v13 = vpop.permute.xlu1 %151  ;;  %4112 = vrot.lane.b32.xlu0 %v4111_v52, %s4296_s15  ;;  %v3854_v18 = vunpack.i.l.bf16 %v5621_v55  ;;  %v7192_v55 = vrot.slane %v5541_v6, 2  ;;  %v1254_v52 = vrot.slane %v5647_v54, 1 }
 0x1c8   :  { %v1699_v39 = vsel %vm1698_vm7, %v1682_v34, %v3824_v20  ;;  %4037 = vrot.lane.b32.xlu1 %v4036_v27, %s4289_s17  ;;  %v7194_v27 = vld [vmem:[#allocation40_spill] sm:$0xff]  ;;  %v5880_v34 = vpop.permute.xlu0 %3912 }
 0x1c9   :  { %v1716_v53 = vsel %vm1715_vm8, %v1699_v39, %v3834_v12  ;;  %v1108_v51 = vsel %vm1077_vm3, %v7192_v55, %v1107_v16  ;;  %v620_v12 = vsel %vm396_vm2, %v7193_v41, %v619_v5  ;;  %v1785_v16 = vsel %vm1783_vm12, %v1768_v59, %v3875_v28 }
 0x1ca   :  { %v1733_v50 = vsel %vm1732_vm9, %v1716_v53, %v3844_v8  ;;  %v4056_v11 = vpack.i.bf16 %v5757_v15, %v1108_v51  ;;  %v653_v40 = vmul.f32 %v620_v12, %v5647_v54  ;;  %v540_v24 = vmul.f32 %v7194_v27, %v5637_v33 }
 0x1cb   :  { %v5851_v48 = vpop.permute.xlu1 %156  ;;  %v1750_v63 = vsel %vm1749_vm10, %v1733_v50, %v3854_v18  ;;  %v7195_v15 = vrot.slane %v5637_v33, 1  ;;  %v1257_v42 = vsel %vm978_vm1, %v1254_v52, %v1256_v1  ;;  %v812_v8 = vrot.slane %v7196_v37, 7 }
 0x1cc   :  { %4047 = vrot.lane.b32.xlu1 %v4046_v25, %s4289_s17  ;;  %v1767_v23 = vsel %vm1766_vm11, %v1750_v63, %v3864_v31  ;;  %v4066_v49 = vpack.i.bf16 %v541_v47, %v540_v24  ;;  %v1352_v39 = vrot.slane %v653_v40, 2  ;;  %v7197_v18 = vrot.slane %v5599_v58, 7  ;;  %v5897_v0 = vpop.permute.xlu0 %3922 }
 0x1cd   :  { %v1784_v6 = vsel %vm1783_vm12, %v1767_v23, %v3874_v22  ;;  %v1255_v14 = vsel %vm978_vm1, %v7195_v15, %v1254_v52  ;;  %v925_v53 = vrot.slane %v5693_v17, 6  ;;  %v1354_v5 = vrot.slane %v654_v3, 2  ;;  %v7199_v15 = vld [vmem:[#allocation6_spill] sm:$0xff] }
 0x1ce   :  { %v1800_v20 = vpack.c.bf16 %v1785_v16, %v1784_v6  ;;  %v813_v28 = vsel %vm72_vm0, %v7197_v18, %v812_v8  ;;  %v4076_v61 = vpack.i.bf16 %v1257_v42, %v1255_v14  ;;  %v7198_v50 = vrot.slane %v5660_v19, 2 }
 0x1cf   :  { %v5876_v29 = vpop.permute.xlu1 %161  ;;  %v846_v31 = vmul.f32 %v813_v28, %v5737_v4  ;;  %v1355_v58 = vsel %vm1077_vm3, %v1352_v39, %v1354_v5  ;;  %v926_v17 = vsel %vm396_vm2, %v923_v21, %v925_v53  ;;  %v847_v55 = vmul.f32 0.0, %v812_v8 }
 0x1d0   :  { %4057 = vrot.lane.b32.xlu1 %v4056_v11, %s4290_s18  ;;  %3611 = vmatprep.mubr.msk.bf16.mxu0 %vm1823_vm13, %v1800_v20  ;;  %v1353_v22 = vsel %vm1077_vm3, %v7198_v50, %v1352_v39  ;;  %v5910_v51 = vpop.permute.xlu0 %3932  ;;  %v733_v63 = vmul.f32 %v5786_v35, %v5647_v54  ;;  %v959_v19 = vmul.f32 %v926_v17, %v5737_v4  ;;  %v960_v12 = vmul.f32 0.0, %v925_v53 }
 0x1d1   :  { %v4086_v46 = vpack.i.bf16 %v1355_v58, %v1353_v22  ;;  %v1514_v41 = vrot.slane %v846_v31, 1  ;;  %v734_v59 = vmul.f32 %v5392_v44, %v5737_v4  ;;  %v1516_v62 = vrot.slane %v847_v55, 1 }
 0x1d2   :  { %v1612_v6 = vrot.slane %v959_v19, 2  ;;  %v1614_v16 = vrot.slane %v960_v12, 2  ;;  %v221_v14 = vmul.f32 %v5831_v13, %v7199_v15  ;;  %v3914_v15 = vunpack.i.l.bf16 %v5880_v34 }
 0x1d3   :  { %v3808_v7 = vpop.permute.xlu1 %3807  ;;  %v4096_v21 = vpack.i.bf16 %v734_v59, %v733_v63  ;;  %v1515_v54 = vsel %vm978_vm1, %v1512_v38, %v1514_v41  ;;  %v1517_v35 = vsel %vm978_vm1, %v1514_v41, %v1516_v62  ;;  %v3884_v59 = vunpack.i.l.bf16 %v5728_v36 }
 0x1d4   :  { %4067 = vrot.lane.b32.xlu1 %v4066_v49, %s4291_s21  ;;  %v5922_v1 = vpop.permute.xlu0 %3942  ;;  %v4106_v47 = vpack.i.bf16 %v1517_v35, %v1515_v54  ;;  %v1613_v44 = vsel %vm1077_vm3, %v1610_v30, %v1612_v6  ;;  %v1615_v4 = vsel %vm1077_vm3, %v1612_v6, %v1614_v16  ;;  %v3810_v40 = vunpack.i.h.bf16 %v3808_v7  ;;  %v7202_v54 = vld [vmem:[#allocation10_spill] sm:$0xff]  ;;  %s4298_s21 = smov 122  }
 0x1d5   :  { %v4116_v57 = vpack.i.bf16 %v1615_v4, %v1613_v44  ;;  %v3809_v27 = vunpack.i.l.bf16 %v3808_v7  ;;  %v222_v30 = vmul.f32 %v5851_v48, %v7200_v45  ;;  %v7203_v4 = vld [vmem:[#allocation8_spill] sm:$0xff]  ;;  %v3904_v45 = vunpack.i.l.bf16 %v5847_v60 }
 0x1d7   :  { %v5900_v25 = vpop.permute.xlu1 %171  ;;  %v1668_v28 = vsel %vm1664_vm5, %v222_v30, %v3810_v40  ;;  %v1667_v7 = vsel %vm1664_vm5, %v221_v14, %v3809_v27  ;;  %v3895_v27 = vunpack.i.h.bf16 %v5801_v26  ;;  %v3905_v14 = vunpack.i.h.bf16 %v5847_v60 }
 0x1d8   :  { %4077 = vrot.lane.b32.xlu1 %v4076_v61, %s4292_s22  ;;  %v5930_v20 = vpop.permute.xlu0 %3952 }
 0x1db   :  { %v3818_v23 = vpop.permute.xlu1 %3817 }
 0x1dc   :  { %4087 = vrot.lane.b32.xlu1 %v4086_v46, %s4293_s23  ;;  %v3820_v24 = vunpack.i.h.bf16 %v3818_v23  ;;  %v3819_v3 = vunpack.i.l.bf16 %v3818_v23  ;;  %v5937_v18 = vpop.permute.xlu0 %3962  ;;  %v3885_v23 = vunpack.i.h.bf16 %v5728_v36 }
 0x1de   :  { %v1684_v5 = vsel %vm1681_vm6, %v1667_v7, %v3819_v3  ;;  %v1685_v13 = vsel %vm1681_vm6, %v1668_v28, %v3820_v24  ;;  %v3894_v24 = vunpack.i.l.bf16 %v5801_v26  ;;  %v3915_v3 = vunpack.i.h.bf16 %v5880_v34 }
 0x1df   :  { %v3828_v52 = vpop.permute.xlu1 %3827  ;;  %v3925_v34 = vunpack.i.h.bf16 %v5897_v0  ;;  %v3935_v28 = vunpack.i.h.bf16 %v5910_v51  ;;  %v3934_v7 = vunpack.i.l.bf16 %v5910_v51 }
 0x1e0   :  { %4097 = vrot.lane.b32.xlu1 %v4096_v21, %s4294_s13  ;;  %v3830_v42 = vunpack.i.h.bf16 %v3828_v52  ;;  %v3829_v37 = vunpack.i.l.bf16 %v3828_v52  ;;  %v5947_v63 = vpop.permute.xlu0 %206  ;;  %v7201_v52 = vld [vmem:[#allocation18_spill] sm:$0xff] }
 0x1e1   :  { %v224_v35 = vmul.f32 %v7202_v54, %v7201_v52 }
 0x1e2   :  { %v1701_v48 = vsel %vm1698_vm7, %v1684_v5, %v3829_v37  ;;  %v1702_v22 = vsel %vm1698_vm7, %v1685_v13, %v3830_v42  ;;  %v3945_v5 = vunpack.i.h.bf16 %v5922_v1  ;;  %v3944_v13 = vunpack.i.l.bf16 %v5922_v1 }
 0x1e3   :  { %v3838_v11 = vpop.permute.xlu1 %3837 }
 0x1e4   :  { %4107 = vrot.lane.b32.xlu1 %v4106_v47, %s4295_s14  ;;  %v3840_v8 = vunpack.i.h.bf16 %v3838_v11  ;;  %v3839_v49 = vunpack.i.l.bf16 %v3838_v11  ;;  %v5969_v30 = vpop.permute.xlu0 %3972 }
 0x1e6   :  { %v1718_v58 = vsel %vm1715_vm8, %v1701_v48, %v3839_v49  ;;  %v1719_v17 = vsel %vm1715_vm8, %v1702_v22, %v3840_v8  ;;  %v3924_v49 = vunpack.i.l.bf16 %v5897_v0  ;;  %v3954_v48 = vunpack.i.l.bf16 %v5930_v20 }
 0x1e7   :  { %v3848_v38 = vpop.permute.xlu1 %3847 }
 0x1e8   :  { %4117 = vrot.lane.b32.xlu1 %v4116_v57, %s4296_s15  ;;  %v3850_v53 = vunpack.i.h.bf16 %v3848_v38  ;;  %v3849_v61 = vunpack.i.l.bf16 %v3848_v38  ;;  %v223_v57 = vmul.f32 %v5876_v29, %v7203_v4  ;;  %v7205_v4 = vld [vmem:[#allocation20_spill] sm:$0xff] }
 0x1ea   :  { %v1735_v46 = vsel %vm1732_vm9, %v1718_v58, %v3849_v61  ;;  %v1736_v41 = vsel %vm1732_vm9, %v1719_v17, %v3850_v53  ;;  %v5994_v17 = vpop.permute.xlu0 %216 }
 0x1eb   :  { %v3858_v39 = vpop.permute.xlu1 %3857 }
 0x1ec   :  { %v3860_v31 = vunpack.i.h.bf16 %v3858_v39  ;;  %v3859_v50 = vunpack.i.l.bf16 %v3858_v39 }
 0x1ee   :  { %v1752_v62 = vsel %vm1749_vm10, %v1735_v46, %v3859_v50  ;;  %v1753_v21 = vsel %vm1749_vm10, %v1736_v41, %v3860_v31  ;;  %v3955_v50 = vunpack.i.h.bf16 %v5930_v20 }
 0x1ef   :  { %v3868_v55 = vpop.permute.xlu1 %3867 }
 0x1f0   :  { %v3870_v19 = vunpack.i.h.bf16 %v3868_v55  ;;  %v3869_v12 = vunpack.i.l.bf16 %v3868_v55 }
 0x1f2   :  { %v1769_v6 = vsel %vm1766_vm11, %v1752_v62, %v3869_v12  ;;  %v1770_v16 = vsel %vm1766_vm11, %v1753_v21, %v3870_v19 }
 0x1f3   :  { %v3878_v47 = vpop.permute.xlu1 %3877  ;;  %v1786_v11 = vsel %vm1783_vm12, %v1769_v6, %v3884_v59  ;;  %v1787_v44 = vsel %vm1783_vm12, %v1770_v16, %v3885_v23  ;;  %v6002_v23 = vpop.permute.xlu0 %3982 }
 0x1f4   :  { %v3880_v36 = vunpack.i.h.bf16 %v3878_v47  ;;  %v3879_v38 = vunpack.i.l.bf16 %v3878_v47  ;;  %v1801_v40 = vpack.c.bf16 %v1787_v44, %v1786_v11  ;;  %v7204_v44 = vld [vmem:[#allocation25_spill] sm:$0xff] }
 0x1f6   :  { %v1669_v42 = vsel %vm1664_vm5, %v223_v57, %v3879_v38  ;;  %v1670_v29 = vsel %vm1664_vm5, %v224_v35, %v3880_v36  ;;  %3612 = vmatmul.mubr.msk.bf16.vlgmr.msra.gmra.mxu0 %vm1823_vm13, %v1801_v40  ;;  %v226_v57 = vmul.f32 %v7205_v4, %v7204_v44  ;;  %v7206_v36 = vld [vmem:[#allocation24_spill] sm:$0xff]  ;;  %v3985_v44 = vunpack.i.h.bf16 %v6002_v23 }
 0x1f7   :  { %v1686_v37 = vsel %vm1681_vm6, %v1669_v42, %v3894_v24  ;;  %v1687_v26 = vsel %vm1681_vm6, %v1670_v29, %v3895_v27  ;;  %v5976_v8 = vpop.permute.xlu1 %181  ;;  %v6005_v59 = vpop.permute.xlu0 %3992  ;;  %v225_v38 = vmul.f32 %v5900_v25, %v7206_v36  ;;  %v3984_v4 = vunpack.i.l.bf16 %v6002_v23 }
 0x1f8   :  { %v1703_v60 = vsel %vm1698_vm7, %v1686_v37, %v3904_v45  ;;  %v1704_v39 = vsel %vm1698_vm7, %v1687_v26, %v3905_v14 }
 0x1f9   :  { %v1720_v53 = vsel %vm1715_vm8, %v1703_v60, %v3914_v15  ;;  %v1721_v61 = vsel %vm1715_vm8, %v1704_v39, %v3915_v3 }
 0x1fa   :  { %v1737_v31 = vsel %vm1732_vm9, %v1720_v53, %v3924_v49  ;;  %v1738_v0 = vsel %vm1732_vm9, %v1721_v61, %v3925_v34 }
 0x1fb   :  { %v3888_v22 = vpop.permute.xlu1 %3887  ;;  %v1754_v58 = vsel %vm1749_vm10, %v1737_v31, %v3934_v7  ;;  %v1755_v51 = vsel %vm1749_vm10, %v1738_v0, %v3935_v28  ;;  %v6007_v6 = vpop.permute.xlu0 %4002  ;;  %v3965_v0 = vunpack.i.h.bf16 %v5937_v18 }
 0x1fc   :  { %v1771_v55 = vsel %vm1766_vm11, %v1754_v58, %v3944_v13  ;;  %v1772_v46 = vsel %vm1766_vm11, %v1755_v51, %v3945_v5  ;;  %v3890_v52 = vunpack.i.h.bf16 %v3888_v22  ;;  %v3889_v54 = vunpack.i.l.bf16 %v3888_v22 }
 0x1fd   :  { %v1788_v1 = vsel %vm1783_vm12, %v1771_v55, %v3954_v48  ;;  %v1789_v41 = vsel %vm1783_vm12, %v1772_v46, %v3955_v50  ;;  %v3964_v50 = vunpack.i.l.bf16 %v5937_v18  ;;  %v7207_v55 = vld [vmem:[#allocation27_spill] sm:$0xff] }
 0x1fe   :  { %v1802_v12 = vpack.c.bf16 %v1789_v41, %v1788_v1  ;;  %v1671_v14 = vsel %vm1664_vm5, %v225_v38, %v3889_v54  ;;  %v1672_v45 = vsel %vm1664_vm5, %v226_v57, %v3890_v52  ;;  %v228_v46 = vmul.f32 %v5762_v32, %v7207_v55 }
 0x1ff   :  { %v6000_v19 = vpop.permute.xlu1 %191  ;;  %v6009_v35 = vpop.permute.xlu0 %4012  ;;  %v3975_v54 = vunpack.i.h.bf16 %v5969_v30  ;;  %v3994_v32 = vunpack.i.l.bf16 %v6005_v59 }
 0x200   :  { %3615 = vmatprep.mubr.msk.bf16.mxu0 %vm1823_vm13, %v1802_v12 }
 0x203   :  { %v3898_v20 = vpop.permute.xlu1 %3897  ;;  %v4023_v60 = vpop.permute.xlu0 %4022 }
 0x204   :  { %v3900_v47 = vunpack.i.h.bf16 %v3898_v20  ;;  %v3899_v11 = vunpack.i.l.bf16 %v3898_v20  ;;  %v7208_v20 = vld [vmem:[#allocation26_spill] sm:$0xff] }
 0x206   :  { %v1688_v37 = vsel %vm1681_vm6, %v1671_v14, %v3899_v11  ;;  %v1689_v26 = vsel %vm1681_vm6, %v1672_v45, %v3900_v47  ;;  %v3974_v47 = vunpack.i.l.bf16 %v5969_v30  ;;  %v3995_v11 = vunpack.i.h.bf16 %v6005_v59 }
 0x207   :  { %v3908_v62 = vpop.permute.xlu1 %3907  ;;  %v4033_v18 = vpop.permute.xlu0 %4032  ;;  %v4005_v30 = vunpack.i.h.bf16 %v6007_v6  ;;  %v4004_v59 = vunpack.i.l.bf16 %v6007_v6  ;;  %v4025_v45 = vunpack.i.h.bf16 %v4023_v60 }
 0x208   :  { %v3910_v40 = vunpack.i.h.bf16 %v3908_v62  ;;  %v3909_v27 = vunpack.i.l.bf16 %v3908_v62  ;;  %v227_v62 = vmul.f32 %v5976_v8, %v7208_v20 }
 0x20a   :  { %v1705_v25 = vsel %vm1698_vm7, %v1688_v37, %v3909_v27  ;;  %v1706_v39 = vsel %vm1698_vm7, %v1689_v26, %v3910_v40  ;;  %v4035_v26 = vunpack.i.h.bf16 %v4033_v18 }
 0x20b   :  { %v3918_v21 = vpop.permute.xlu1 %3917 }
 0x20c   :  { %v3920_v24 = vunpack.i.h.bf16 %v3918_v21  ;;  %v3919_v3 = vunpack.i.l.bf16 %v3918_v21 }
 0x20e   :  { %v1722_v28 = vsel %vm1715_vm8, %v1705_v25, %v3919_v3  ;;  %v1723_v7 = vsel %vm1715_vm8, %v1706_v39, %v3920_v24  ;;  %v4015_v24 = vunpack.i.h.bf16 %v6009_v35  ;;  %v4014_v3 = vunpack.i.l.bf16 %v6009_v35 }
 0x20f   :  { %v3928_v16 = vpop.permute.xlu1 %3927 }
 0x210   :  { %v3930_v42 = vunpack.i.h.bf16 %v3928_v16  ;;  %v3929_v29 = vunpack.i.l.bf16 %v3928_v16 }
 0x212   :  { %v1739_v61 = vsel %vm1732_vm9, %v1722_v28, %v3929_v29  ;;  %v1740_v5 = vsel %vm1732_vm9, %v1723_v7, %v3930_v42  ;;  %v4024_v42 = vunpack.i.l.bf16 %v4023_v60  ;;  %v6058_v29 = vpop.permute.xlu0 %4042 }
 0x213   :  { %v3938_v15 = vpop.permute.xlu1 %3937 }
 0x214   :  { %v3940_v34 = vunpack.i.h.bf16 %v3938_v15  ;;  %v3939_v49 = vunpack.i.l.bf16 %v3938_v15 }
 0x216   :  { %v1756_v48 = vsel %vm1749_vm10, %v1739_v61, %v3939_v49  ;;  %v1757_v22 = vsel %vm1749_vm10, %v1740_v5, %v3940_v34  ;;  %v4034_v34 = vunpack.i.l.bf16 %v4033_v18  ;;  %v6070_v5 = vpop.permute.xlu0 %4052 }
 0x217   :  { %v3948_v53 = vpop.permute.xlu1 %3947 }
 0x218   :  { %v3950_v13 = vunpack.i.h.bf16 %v3948_v53  ;;  %v3949_v31 = vunpack.i.l.bf16 %v3948_v53 }
 0x21a   :  { %v1773_v58 = vsel %vm1766_vm11, %v1756_v48, %v3949_v31  ;;  %v1774_v51 = vsel %vm1766_vm11, %v1757_v22, %v3950_v13 }
 0x21b   :  { %v3958_v1 = vpop.permute.xlu1 %3957  ;;  %v1790_v41 = vsel %vm1783_vm12, %v1773_v58, %v3964_v50  ;;  %v1791_v12 = vsel %vm1783_vm12, %v1774_v51, %v3965_v0 }
 0x21c   :  { %v3960_v21 = vunpack.i.h.bf16 %v3958_v1  ;;  %v3959_v16 = vunpack.i.l.bf16 %v3958_v1  ;;  %v1803_v52 = vpack.c.bf16 %v1791_v12, %v1790_v41  ;;  %v230_v41 = vmul.f32 %v5815_v10, %v5180_v43  ;;  %v7209_v12 = vld [vmem:[#allocation31_spill] sm:$0xff] }
 0x21d   :  { %v229_v20 = vmul.f32 %v6000_v19, %v7209_v12 }
 0x21e   :  { %v1673_v57 = vsel %vm1664_vm5, %v227_v62, %v3959_v16  ;;  %v1674_v8 = vsel %vm1664_vm5, %v228_v46, %v3960_v21  ;;  %3616 = vmatmul.mubr.msk.bf16.gmra.mxu0 %vm1823_vm13, %v1803_v52 }
 0x21f   :  { %v1690_v36 = vsel %vm1681_vm6, %v1673_v57, %v3974_v47  ;;  %v1691_v38 = vsel %vm1681_vm6, %v1674_v8, %v3975_v54  ;;  %v6048_v40 = vpop.permute.xlu1 %201 }
 0x220   :  { %v1707_v27 = vsel %vm1698_vm7, %v1690_v36, %v3984_v4  ;;  %v1708_v23 = vsel %vm1698_vm7, %v1691_v38, %v3985_v44 }
 0x221   :  { %v1724_v15 = vsel %vm1715_vm8, %v1707_v27, %v3994_v32  ;;  %v1725_v14 = vsel %vm1715_vm8, %v1708_v23, %v3995_v11 }
 0x222   :  { %v1741_v37 = vsel %vm1732_vm9, %v1724_v15, %v4004_v59  ;;  %v1742_v6 = vsel %vm1732_vm9, %v1725_v14, %v4005_v30  ;;  %v6073_v31 = vpop.permute.xlu0 %4062  ;;  %v4044_v15 = vunpack.i.l.bf16 %v6058_v29 }
 0x223   :  { %v3968_v49 = vpop.permute.xlu1 %3967  ;;  %v1758_v25 = vsel %vm1749_vm10, %v1741_v37, %v4014_v3  ;;  %v1759_v39 = vsel %vm1749_vm10, %v1742_v6, %v4015_v24  ;;  %v4045_v3 = vunpack.i.h.bf16 %v6058_v29  ;;  %v231_v29 = vmul.f32 %v6048_v40, %v5201_v2 }
 0x224   :  { %v1775_v35 = vsel %vm1766_vm11, %v1758_v25, %v4024_v42  ;;  %v1776_v28 = vsel %vm1766_vm11, %v1759_v39, %v4025_v45  ;;  %v3970_v58 = vunpack.i.h.bf16 %v3968_v49  ;;  %v3969_v51 = vunpack.i.l.bf16 %v3968_v49 }
 0x225   :  { %v1792_v7 = vsel %vm1783_vm12, %v1775_v35, %v4034_v34  ;;  %v1793_v60 = vsel %vm1783_vm12, %v1776_v28, %v4035_v26  ;;  %v232_v26 = vmul.f32 %v5947_v63, %v5476_v56  ;;  %v4065_v56 = vunpack.i.h.bf16 %v6073_v31 }
 0x226   :  { %v1804_v53 = vpack.c.bf16 %v1793_v60, %v1792_v7  ;;  %v6075_v50 = vpop.permute.xlu0 %4072  ;;  %v1675_v54 = vsel %vm1664_vm5, %v229_v20, %v3969_v51  ;;  %v1676_v47 = vsel %vm1664_vm5, %v230_v41, %v3970_v58  ;;  %v4055_v7 = vunpack.i.h.bf16 %v6070_v5 }
 0x227   :  { %v6068_v61 = vpop.permute.xlu1 %211  ;;  %v4054_v60 = vunpack.i.l.bf16 %v6070_v5  ;;  %v4064_v63 = vunpack.i.l.bf16 %v6073_v31 }
 0x228   :  { %3619 = vmatprep.mubr.msk.bf16.mxu0 %vm1823_vm13, %v1804_v53  ;;  %v4075_v53 = vunpack.i.h.bf16 %v6075_v50 }
 0x22a   :  { %v6077_v55 = vpop.permute.xlu0 %4082 }
 0x22b   :  { %v3978_v13 = vpop.permute.xlu1 %3977  ;;  %v4085_v5 = vunpack.i.h.bf16 %v6077_v55  ;;  %v4084_v58 = vunpack.i.l.bf16 %v6077_v55 }
 0x22c   :  { %v3980_v46 = vunpack.i.h.bf16 %v3978_v13  ;;  %v3979_v1 = vunpack.i.l.bf16 %v3978_v13  ;;  %v4074_v13 = vunpack.i.l.bf16 %v6075_v50 }
 0x22e   :  { %v1692_v4 = vsel %vm1681_vm6, %v1675_v54, %v3979_v1  ;;  %v1693_v57 = vsel %vm1681_vm6, %v1676_v47, %v3980_v46 }
 0x22f   :  { %v3988_v0 = vpop.permute.xlu1 %3987 }
 0x230   :  { %v3990_v62 = vunpack.i.h.bf16 %v3988_v0  ;;  %v3989_v18 = vunpack.i.l.bf16 %v3988_v0 }
 0x231   :  { %v4093_v11 = vpop.permute.xlu0 %4092 }
 0x232   :  { %v1709_v19 = vsel %vm1698_vm7, %v1692_v4, %v3989_v18  ;;  %v1710_v8 = vsel %vm1698_vm7, %v1693_v57, %v3990_v62  ;;  %v4095_v46 = vunpack.i.h.bf16 %v4093_v11  ;;  %v4094_v1 = vunpack.i.l.bf16 %v4093_v11 }
 0x233   :  { %v3998_v48 = vpop.permute.xlu1 %3997 }
 0x234   :  { %v4000_v21 = vunpack.i.h.bf16 %v3998_v48  ;;  %v3999_v16 = vunpack.i.l.bf16 %v3998_v48 }
 0x235   :  { %v4103_v42 = vpop.permute.xlu0 %4102 }
 0x236   :  { %v1726_v36 = vsel %vm1715_vm8, %v1709_v19, %v3999_v16  ;;  %v1727_v38 = vsel %vm1715_vm8, %v1710_v8, %v4000_v21  ;;  %v4105_v20 = vunpack.i.h.bf16 %v4103_v42  ;;  %v4104_v62 = vunpack.i.l.bf16 %v4103_v42 }
 0x237   :  { %v4008_v22 = vpop.permute.xlu1 %4007 }
 0x238   :  { %v4010_v32 = vunpack.i.h.bf16 %v4008_v22  ;;  %v4009_v44 = vunpack.i.l.bf16 %v4008_v22 }
 0x239   :  { %v4113_v50 = vpop.permute.xlu0 %4112 }
 0x23a   :  { %v1743_v59 = vsel %vm1732_vm9, %v1726_v36, %v4009_v44  ;;  %v1744_v27 = vsel %vm1732_vm9, %v1727_v38, %v4010_v32  ;;  %v4115_v16 = vunpack.i.h.bf16 %v4113_v50 }
 0x23b   :  { %v4018_v52 = vpop.permute.xlu1 %4017 }
 0x23c   :  { %v4020_v43 = vunpack.i.h.bf16 %v4018_v52  ;;  %v4019_v10 = vunpack.i.l.bf16 %v4018_v52  ;;  %v4114_v52 = vunpack.i.l.bf16 %v4113_v50  ;;  %v6157_v50 = vld [vmem:[%s6958_s2] sm:$0x1] }
 0x23e   :  { %v1760_v14 = vsel %vm1749_vm10, %v1743_v59, %v4019_v10  ;;  %v1761_v45 = vsel %vm1749_vm10, %v1744_v27, %v4020_v43  ;;  %v234_v27 = vmul.f32 %v5994_v17, %v5637_v33 }
 0x23f   :  { %v4028_v30 = vpop.permute.xlu1 %4027 }
 0x240   :  { %v4030_v23 = vunpack.i.h.bf16 %v4028_v30  ;;  %v4029_v24 = vunpack.i.l.bf16 %v4028_v30 }
 0x242   :  { %v1777_v37 = vsel %vm1766_vm11, %v1760_v14, %v4029_v24  ;;  %v1778_v6 = vsel %vm1766_vm11, %v1761_v45, %v4030_v23  ;;  %v233_v23 = vmul.f32 %v6068_v61, %v5496_v9 }
 0x243   :  { %v4038_v34 = vpop.permute.xlu1 %4037  ;;  %v1794_v49 = vsel %vm1783_vm12, %v1777_v37, %v4044_v15  ;;  %v1795_v25 = vsel %vm1783_vm12, %v1778_v6, %v4045_v3 }
 0x244   :  { %v4040_v39 = vunpack.i.h.bf16 %v4038_v34  ;;  %v4039_v35 = vunpack.i.l.bf16 %v4038_v34  ;;  %v1805_v28 = vpack.c.bf16 %v1795_v25, %v1794_v49 }
 0x246   :  { %v1677_v0 = vsel %vm1664_vm5, %v231_v29, %v4039_v35  ;;  %v1678_v48 = vsel %vm1664_vm5, %v232_v26, %v4040_v39  ;;  %3620 = vmatmul.mubr.msk.bf16.gmra.mxu0 %vm1823_vm13, %v1805_v28 }
 0x247   :  { %v1694_v2 = vsel %vm1681_vm6, %v1677_v0, %v4054_v60  ;;  %v1695_v40 = vsel %vm1681_vm6, %v1678_v48, %v4055_v7  ;;  %v4048_v22 = vpop.permute.xlu1 %4047 }
 0x248   :  { %v1711_v51 = vsel %vm1698_vm7, %v1694_v2, %v4064_v63  ;;  %v1712_v31 = vsel %vm1698_vm7, %v1695_v40, %v4065_v56  ;;  %v4050_v8 = vunpack.i.h.bf16 %v4048_v22  ;;  %v4049_v36 = vunpack.i.l.bf16 %v4048_v22 }
 0x249   :  { %v1728_v41 = vsel %vm1715_vm8, %v1711_v51, %v4074_v13  ;;  %v1729_v12 = vsel %vm1715_vm8, %v1712_v31, %v4075_v53 }
 0x24a   :  { %v1745_v18 = vsel %vm1732_vm9, %v1728_v41, %v4084_v58  ;;  %v1746_v21 = vsel %vm1732_vm9, %v1729_v12, %v4085_v5  ;;  %v1679_v45 = vsel %vm1664_vm5, %v233_v23, %v4049_v36  ;;  %v1680_v42 = vsel %vm1664_vm5, %v234_v27, %v4050_v8 }
 0x24b   :  { %v4058_v55 = vpop.permute.xlu1 %4057  ;;  %v1762_v54 = vsel %vm1749_vm10, %v1745_v18, %v4094_v1  ;;  %v1763_v47 = vsel %vm1749_vm10, %v1746_v21, %v4095_v46  ;;  %v2065_v5 = vlaneseq  ;;  %vm2763_vm5 = vcmask 343040  }
 0x24c   :  { %v1779_v32 = vsel %vm1766_vm11, %v1762_v54, %v4104_v62  ;;  %v1780_v11 = vsel %vm1766_vm11, %v1763_v47, %v4105_v20  ;;  %v4060_v30 = vunpack.i.h.bf16 %v4058_v55  ;;  %v4059_v59 = vunpack.i.l.bf16 %v4058_v55 }
 0x24d   :  { %v1796_v44 = vsel %vm1783_vm12, %v1779_v32, %v4114_v52  ;;  %v1797_v4 = vsel %vm1783_vm12, %v1780_v11, %v4115_v16  ;;  %v6152_v58 = vshrl.u32 %v2065_v5, 7  ;;  %v4300_v5 = vmov 11  }
 0x24e   :  { %v1806_v57 = vpack.c.bf16 %v1797_v4, %v1796_v44  ;;  %v1696_v34 = vsel %vm1681_vm6, %v1679_v45, %v4059_v59  ;;  %v1697_v49 = vsel %vm1681_vm6, %v1680_v42, %v4060_v30 }
 0x24f   :  { %v4068_v43 = vpop.permute.xlu1 %4067  ;;  %v6160_v51 = vsub.s32 0, %v6152_v58 }
 0x250   :  { %3623 = vmatprep.mubr.msk.bf16.mxu0 %vm1823_vm13, %v1806_v57  ;;  %v4070_v24 = vunpack.i.h.bf16 %v4068_v43  ;;  %v4069_v3 = vunpack.i.l.bf16 %v4068_v43 }
 0x251   :  { %v6164_v31 = vrot.slane %v6157_v50, %v6160_v51 }
 0x252   :  { %v1713_v17 = vsel %vm1698_vm7, %v1696_v34, %v4069_v3  ;;  %v1714_v9 = vsel %vm1698_vm7, %v1697_v49, %v4070_v24  ;;  %vm2758_vm7 = vcmask 293888  }
 0x253   :  { %v4078_v10 = vpop.permute.xlu1 %4077  ;;  %2091 = vrot.lane.b32.xlu0 %v6164_v31, %s4298_s21 }
 0x254   :  { %v4080_v15 = vunpack.i.h.bf16 %v4078_v10  ;;  %v4079_v14 = vunpack.i.l.bf16 %v4078_v10 }
 0x256   :  { %v1730_v39 = vsel %vm1715_vm8, %v1713_v17, %v4079_v14  ;;  %v1731_v35 = vsel %vm1715_vm8, %v1714_v9, %v4080_v15 }
 0x257   :  { %v4088_v19 = vpop.permute.xlu1 %4087 }
 0x258   :  { %v4090_v37 = vunpack.i.h.bf16 %v4088_v19  ;;  %v4089_v6 = vunpack.i.l.bf16 %v4088_v19 }
 0x25a   :  { %v1747_v28 = vsel %vm1732_vm9, %v1730_v39, %v4089_v6  ;;  %v1748_v7 = vsel %vm1732_vm9, %v1731_v35, %v4090_v37  ;;  %vm2768_vm9 = vcmask 392192  }
 0x25b   :  { %v4098_v38 = vpop.permute.xlu1 %4097 }
 0x25c   :  { %v4100_v25 = vunpack.i.h.bf16 %v4098_v38  ;;  %v4099_v33 = vunpack.i.l.bf16 %v4098_v38 }
 0x25e   :  { %v1764_v53 = vsel %vm1749_vm10, %v1747_v28, %v4099_v33  ;;  %v1765_v13 = vsel %vm1749_vm10, %v1748_v7, %v4100_v25  ;;  %v4299_v7 = vmov 10  }
 0x25f   :  { %v4108_v26 = vpop.permute.xlu1 %4107  ;;  %4121 = vset.pattern.permute.xlu1 %v4299_v7  ;;  %4122 = vset.pattern.permute.xlu0 %v4299_v7 }
 0x260   :  { %v4110_v61 = vunpack.i.h.bf16 %v4108_v26  ;;  %v4109_v29 = vunpack.i.l.bf16 %v4108_v26 }
 0x262   :  { %v1781_v0 = vsel %vm1766_vm11, %v1764_v53, %v4109_v29  ;;  %v1782_v48 = vsel %vm1766_vm11, %v1765_v13, %v4110_v61  ;;  %v4227_v13 = vld [vmem:[%s6960_s4] sm:$0xff]   ;;  %vm7051_vm11 = vcmask 441344  }
 0x263   :  { %v4118_v60 = vpop.permute.xlu1 %4117  ;;  %3643 = vmatprep.mubr.bf16.mxu1 %v4227_v13 }
 0x264   :  { %v4120_v56 = vunpack.i.h.bf16 %v4118_v60  ;;  %v4119_v63 = vunpack.i.l.bf16 %v4118_v60  ;;  %v6234_v60 = vld [vmem:[%s6957_s1] sm:$0xff] }
 0x265   :  { %2347 = vperm.xlu1 %4121, %v6234_v60  }
 0x266   :  { %v1798_v2 = vsel %vm1783_vm12, %v1781_v0, %v4119_v63  ;;  %v1799_v40 = vsel %vm1783_vm12, %v1782_v48, %v4120_v56  ;;  %v6243_v56 = vld [vmem:[%s6957_s1 + $0x10] sm:$0xff]  ;;  %v6249_v48 = vld [vmem:[%s6957_s1 + $0x18] sm:$0xff] }
 0x267   :  { %v1807_v22 = vpack.c.bf16 %v1799_v40, %v1798_v2  ;;  %v6254_v2 = vld [vmem:[%s6957_s1 + $0x8] sm:$0xff] }
 0x268   :  { %2350 = vperm.xlu0 %4122, %v6254_v2  }
 0x269   :  { %3624 = vmatmul.mubr.msk.bf16.gmra.mxu0 %vm1823_vm13, %v1807_v22  ;;  %2353 = vperm.xlu1 %4121, %v6243_v56   ;;  %vm4315_vm13 = vmmov 0  }
 0x26c   :  { %4123 = vset.pattern.permute.xlu0 %v4300_v5 }
 0x26d   :  { %2356 = vperm.xlu1 %4121, %v6249_v48   ;;  %2376 = vperm.xlu0 %4123, %v6234_v60  }
 0x271   :  { %4124 = vset.pattern.permute.xlu1 %v4300_v5  ;;  %2385 = vperm.xlu0 %4123, %v6249_v48  }
 0x272   :  { %2379 = vperm.xlu1 %4124, %v6254_v2  }
 0x276   :  { %2382 = vperm.xlu1 %4124, %v6243_v56  }
 0x2b6   :  { %v6167_v46 = vpop.f32.mrf.mxu0 }
 0x2b7   :  { %v1955_v55 = vsel %vm1681_vm6, %v6167_v46, 0.0 }
 0x2b8   :  { %v6169_v1 = vpop.f32.mrf.mxu0 }
 0x2b9   :  { %v1952_v21 = vsel %vm1681_vm6, %v6169_v1, 0.0 }
 0x2ba   :  { %v6171_v41 = vpop.f32.mrf.mxu0 }
 0x2bb   :  { %v1957_v11 = vsel %vm1681_vm6, %v6171_v41, 0.0 }
 0x2bc   :  { %v6173_v12 = vpop.f32.mrf.mxu0 }
 0x2bd   :  { %v1953_v18 = vsel %vm1681_vm6, %v6173_v12, 0.0 }
 0x2be   :  { %v1954_v16 = vadd.f32 %v1953_v18, %v1952_v21 }
 0x2c0   :  { %v1956_v54 = vadd.f32 %v1955_v55, %v1954_v16 }
 0x2c2   :  { %v1958_v4 = vadd.f32 %v1957_v11, %v1956_v54 }
 0x2de   :  { %v6175_v20 = vpop.f32.mrf.mxu0 }
 0x2df   :  { %v1963_v36 = vsel %vm1681_vm6, %v6175_v20, 0.0 }
 0x2e0   :  { %v6177_v62 = vpop.f32.mrf.mxu0 }
 0x2e1   :  { %v1959_v44 = vsel %vm1681_vm6, %v6177_v62, 0.0 }
 0x2e2   :  { %v6183_v52 = vpop.f32.mrf.mxu0  ;;  %v1960_v43 = vadd.f32 %v1959_v44, %v1958_v4  ;;  %v4301_v44 = vmov 12  }
 0x2e3   :  { %v1965_v59 = vsel %vm1681_vm6, %v6183_v52, 0.0  ;;  %4126 = vset.pattern.permute.xlu0 %v4301_v44  ;;  %4125 = vset.pattern.permute.xlu1 %v4301_v44 }
 0x2e4   :  { %v6187_v47 = vpop.f32.mrf.mxu0  ;;  %2408 = vperm.xlu0 %4126, %v6254_v2   ;;  %2405 = vperm.xlu1 %4125, %v6234_v60  }
 0x2e5   :  { %v1961_v57 = vsel %vm1681_vm6, %v6187_v47, 0.0 }
 0x2e6   :  { %v1962_v19 = vadd.f32 %v1961_v57, %v1960_v43 }
 0x2e8   :  { %v1964_v38 = vadd.f32 %v1963_v36, %v1962_v19  ;;  %2411 = vperm.xlu1 %4125, %v6243_v56  }
 0x2ea   :  { %v1966_v23 = vadd.f32 %v1965_v59, %v1964_v38  ;;  %v4302_v59 = vmov 14  }
 0x2eb   :  { %4127 = vset.pattern.permute.xlu0 %v4302_v59 }
 0x2ec   :  { %2435 = vperm.xlu0 %4127, %v6234_v60   ;;  %2414 = vperm.xlu1 %4125, %v6249_v48  }
 0x2f0   :  { %2444 = vperm.xlu0 %4127, %v6249_v48   ;;  %4128 = vset.pattern.permute.xlu1 %v4302_v59 }
 0x2f1   :  { %2438 = vperm.xlu1 %4128, %v6254_v2  }
 0x2f5   :  { %2441 = vperm.xlu1 %4128, %v6243_v56  }
 0x306   :  { %v6189_v32 = vpop.f32.mrf.mxu0 }
 0x307   :  { %v1971_v14 = vsel %vm1681_vm6, %v6189_v32, 0.0 }
 0x308   :  { %v6197_v10 = vpop.f32.mrf.mxu0 }
 0x309   :  { %v1967_v27 = vsel %vm1681_vm6, %v6197_v10, 0.0 }
 0x30a   :  { %v6199_v8 = vpop.f32.mrf.mxu0  ;;  %v1968_v3 = vadd.f32 %v1967_v27, %v1966_v23 }
 0x30b   :  { %v1973_v6 = vsel %vm1681_vm6, %v6199_v8, 0.0 }
 0x30c   :  { %v6203_v30 = vpop.f32.mrf.mxu0 }
 0x30d   :  { %v1969_v24 = vsel %vm1681_vm6, %v6203_v30, 0.0 }
 0x30e   :  { %v1970_v15 = vadd.f32 %v1969_v24, %v1968_v3 }
 0x310   :  { %v1972_v45 = vadd.f32 %v1971_v14, %v1970_v15 }
 0x312   :  { %v1974_v34 = vadd.f32 %v1973_v6, %v1972_v45 }
 0x329   :  { %v6213_v42 = vpop.f32.mrf.mxu0 }
 0x32a   :  { %v1979_v61 = vsel %vm1681_vm6, %v6213_v42, 0.0 }
 0x32b   :  { %v6215_v37 = vpop.f32.mrf.mxu0 }
 0x32c   :  { %v1975_v26 = vsel %vm1681_vm6, %v6215_v37, 0.0 }
 0x32d   :  { %v6221_v49 = vpop.f32.mrf.mxu0  ;;  %v1976_v25 = vadd.f32 %v1975_v26, %v1974_v34 }
 0x32e   :  { %v1981_v39 = vsel %vm1681_vm6, %v6221_v49, 0.0 }
 0x32f   :  { %v6223_v33 = vpop.f32.mrf.mxu0 }
 0x330   :  { %v1977_v17 = vsel %vm1681_vm6, %v6223_v33, 0.0 }
 0x331   :  { %v1978_v9 = vadd.f32 %v1977_v17, %v1976_v25 }
 0x333   :  { %v1980_v29 = vadd.f32 %v1979_v61, %v1978_v9 }
 0x335   :  { %v1982_v35 = vadd.f32 %v1981_v39, %v1980_v29  ;;  %v4303_v39 = vmov 16  }
 0x336   :  { %4130 = vset.pattern.permute.xlu0 %v4303_v39  ;;  %4129 = vset.pattern.permute.xlu1 %v4303_v39 }
 0x337   :  { %v1983_v28 = vrot.slane %v1982_v35, 4  ;;  %2487 = vperm.xlu0 %4130, %v6254_v2   ;;  %2484 = vperm.xlu1 %4129, %v6234_v60  }
 0x339   :  { %v1984_v53 = vadd.f32 %v1983_v28, %v1982_v35 }
 0x33b   :  { %v1985_v63 = vrot.slane %v1984_v53, 2  ;;  %2490 = vperm.xlu1 %4129, %v6243_v56  }
 0x33d   :  { %v1986_v0 = vadd.f32 %v1985_v63, %v1984_v53 }
 0x33f   :  { %v1987_v40 = vrot.slane %v1986_v0, 1  ;;  %2493 = vperm.xlu1 %4129, %v6249_v48  }
 0x341   :  { %v1988_v22 = vadd.f32 %v1987_v40, %v1986_v0 }
 0x343   :  { %v6258_v18 = vmul.f32 0.0078125, %v1988_v22 }
 0x345   :  { %v6263_v21 = vsub.f32 %v6169_v1, %v6258_v18  ;;  %v6267_v16 = vsub.f32 %v6173_v12, %v6258_v18  ;;  %v6272_v55 = vsub.f32 %v6167_v46, %v6258_v18  ;;  %v6277_v54 = vsub.f32 %v6171_v41, %v6258_v18 }
 0x346   :  { %v6286_v12 = vsub.f32 %v6177_v62, %v6258_v18  ;;  %v6293_v41 = vsub.f32 %v6187_v47, %v6258_v18  ;;  %v6302_v19 = vsub.f32 %v6175_v20, %v6258_v18  ;;  %v6309_v27 = vsub.f32 %v6183_v52, %v6258_v18 }
 0x347   :  { %v2007_v1 = vmul.f32 %v6263_v21, %v6263_v21  ;;  %v2008_v11 = vmul.f32 %v6267_v16, %v6267_v16  ;;  %v2009_v46 = vmul.f32 %v6272_v55, %v6272_v55  ;;  %v2010_v4 = vmul.f32 %v6277_v54, %v6277_v54 }
 0x348   :  { %v2011_v36 = vmul.f32 %v6286_v12, %v6286_v12  ;;  %v2012_v23 = vmul.f32 %v6293_v41, %v6293_v41  ;;  %v6318_v3 = vsub.f32 %v6197_v10, %v6258_v18  ;;  %v2013_v15 = vmul.f32 %v6302_v19, %v6302_v19 }
 0x349   :  { %v2023_v57 = vsel %vm1681_vm6, %v2007_v1, 0.0  ;;  %v2024_v43 = vsel %vm1681_vm6, %v2008_v11, 0.0  ;;  %v2026_v47 = vsel %vm1681_vm6, %v2009_v46, 0.0  ;;  %v2028_v24 = vsel %vm1681_vm6, %v2010_v4, 0.0 }
 0x34a   :  { %v2025_v62 = vadd.f32 %v2024_v43, %v2023_v57  ;;  %v2030_v52 = vsel %vm1681_vm6, %v2011_v36, 0.0  ;;  %v6325_v45 = vsub.f32 %v6203_v30, %v6258_v18  ;;  %v2014_v6 = vmul.f32 %v6309_v27, %v6309_v27 }
 0x34b   :  { %v2032_v26 = vsel %vm1681_vm6, %v2012_v23, 0.0  ;;  %v6334_v10 = vsub.f32 %v6189_v32, %v6258_v18  ;;  %v2015_v25 = vmul.f32 %v6318_v3, %v6318_v3  ;;  %v2034_v30 = vsel %vm1681_vm6, %v2013_v15, 0.0 }
 0x34c   :  { %v2027_v38 = vadd.f32 %v2026_v47, %v2025_v62  ;;  %v6341_v9 = vsub.f32 %v6199_v8, %v6258_v18  ;;  %v2016_v61 = vmul.f32 %v6325_v45, %v6325_v45  ;;  %v2036_v29 = vsel %vm1681_vm6, %v2014_v6, 0.0 }
 0x34d   :  { %v6349_v32 = vsub.f32 %v6215_v37, %v6258_v18  ;;  %v2017_v28 = vmul.f32 %v6334_v10, %v6334_v10  ;;  %v2038_v8 = vsel %vm1681_vm6, %v2015_v25, 0.0  ;;  %v6357_v53 = vsub.f32 %v6223_v33, %v6258_v18 }
 0x34e   :  { %v2029_v20 = vadd.f32 %v2028_v24, %v2027_v38  ;;  %v2018_v13 = vmul.f32 %v6341_v9, %v6341_v9  ;;  %v2040_v63 = vsel %vm1681_vm6, %v2016_v61, 0.0  ;;  %v4304_v37 = vmov 17  }
 0x34f   :  { %4131 = vset.pattern.permute.xlu0 %v4304_v37  ;;  %v2005_v40 = vsub.f32 %v6213_v42, %v6258_v18  ;;  %v2019_v22 = vmul.f32 %v6349_v32, %v6349_v32  ;;  %v2042_v5 = vsel %vm1681_vm6, %v2017_v28, 0.0  ;;  %v2006_v1 = vsub.f32 %v6221_v49, %v6258_v18  ;;  %4132 = vset.pattern.permute.xlu1 %v4304_v37 }
 0x350   :  { %v2031_v14 = vadd.f32 %v2030_v52, %v2029_v20  ;;  %2513 = vperm.xlu0 %4131, %v6234_v60   ;;  %v2020_v11 = vmul.f32 %v6357_v53, %v6357_v53  ;;  %v2044_v46 = vsel %vm1681_vm6, %v2018_v13, 0.0  ;;  %v4305_v18 = vmov 15   ;;  %2516 = vperm.xlu1 %4132, %v6254_v2  }
 0x351   :  { %v2021_v42 = vmul.f32 %v2005_v40, %v2005_v40  ;;  %v2046_v4 = vsel %vm1681_vm6, %v2019_v22, 0.0  ;;  %v2022_v43 = vmul.f32 %v2006_v1, %v2006_v1  ;;  %v4306_v24 = vmov 9  }
 0x352   :  { %v2033_v34 = vadd.f32 %v2032_v26, %v2031_v14  ;;  %v2048_v62 = vsel %vm1681_vm6, %v2020_v11, 0.0 }
 0x353   :  { %v2050_v49 = vsel %vm1681_vm6, %v2021_v42, 0.0  ;;  %v2052_v38 = vsel %vm1681_vm6, %v2022_v43, 0.0 }
 0x354   :  { %v2035_v17 = vadd.f32 %v2034_v30, %v2033_v34  ;;  %2522 = vperm.xlu0 %4131, %v6249_v48   ;;  %2519 = vperm.xlu1 %4132, %v6243_v56   ;;  %v7046_v30 = vmov 0.0  }
 0x356   :  { %v2037_v35 = vadd.f32 %v2036_v29, %v2035_v17  ;;  %v6392_v17 = vrot.slane %v7046_v30, 1 }
 0x358   :  { %v2039_v7 = vadd.f32 %v2038_v8, %v2037_v35  ;;  %4134 = vset.pattern.permute.xlu0 %v4305_v18  ;;  %4133 = vset.pattern.permute.xlu1 %v4305_v18  ;;  %v7045_v39 = vmax.f32 %v6392_v17, 0.0 }
 0x359   :  { %2468 = vperm.xlu0 %4134, %v6254_v2   ;;  %2464 = vperm.xlu1 %4133, %v6234_v60  }
 0x35a   :  { %v2041_v0 = vadd.f32 %v2040_v63, %v2039_v7 }
 0x35c   :  { %v2043_v33 = vadd.f32 %v2042_v5, %v2041_v0 }
 0x35d   :  { %4135 = vset.pattern.permute.xlu0 %v4306_v24  ;;  %2472 = vperm.xlu1 %4133, %v6243_v56  }
 0x35e   :  { %v2045_v44 = vadd.f32 %v2044_v46, %v2043_v33  ;;  %2324 = vperm.xlu0 %4135, %v6234_v60   ;;  %v6399_v60 = vpop.permute.xlu0 %2091 }
 0x360   :  { %v2047_v57 = vadd.f32 %v2046_v4, %v2045_v44 }
 0x361   :  { %2476 = vperm.xlu1 %4133, %v6249_v48  }
 0x362   :  { %v2049_v36 = vadd.f32 %v2048_v62, %v2047_v57  ;;  %2339 = vperm.xlu0 %4135, %v6249_v48  }
 0x364   :  { %v2051_v47 = vadd.f32 %v2050_v49, %v2049_v36 }
 0x365   :  { %4136 = vset.pattern.permute.xlu1 %v4306_v24 }
 0x366   :  { %v2053_v59 = vadd.f32 %v2052_v38, %v2051_v47  ;;  %2329 = vperm.xlu1 %4136, %v6254_v2  }
 0x368   :  { %v2054_v23 = vrot.slane %v2053_v59, 4 }
 0x36a   :  { %v2055_v20 = vadd.f32 %v2054_v23, %v2053_v59  ;;  %2334 = vperm.xlu1 %4136, %v6243_v56  }
 0x36c   :  { %v2056_v15 = vrot.slane %v2055_v20, 2 }
 0x36e   :  { %v2057_v52 = vadd.f32 %v2056_v15, %v2055_v20 }
 0x370   :  { %v2058_v14 = vrot.slane %v2057_v52, 1 }
 0x372   :  { %v2059_v6 = vadd.f32 %v2058_v14, %v2057_v52 }
 0x374   :  { %v2060_v26 = vmul.f32 0.0078125, %v2059_v6 }
 0x376   :  { %v2061_v34 = vadd.f32 1e-05, %v2060_v26 }
 0x378   :  { %4239 = vrsqrt.f32 %v2061_v34 }
 0x385   :  { %v4240_v25 = vpop.eup %4239 }
 0x386   :  { %v2063_v61 = vmul.f32 %v4240_v25, %v6157_v50 }
 0x388   :  { %v6397_v29 = vrot.slane %v2063_v61, %v6160_v51 }
 0x38a   :  { %v2083_v48 = vmul.f32 %v6397_v29, %v6357_v53  ;;  %v2084_v2 = vmul.f32 %v6397_v29, %v2005_v40  ;;  %v2085_v35 = vmul.f32 %v6397_v29, %v2006_v1  ;;  %v2082_v28 = vmul.f32 %v6397_v29, %v6349_v32 }
 0x38b   :  { %v2080_v50 = vmul.f32 %v6397_v29, %v6334_v10  ;;  %v2081_v56 = vmul.f32 %v6397_v29, %v6341_v9  ;;  %v2078_v8 = vmul.f32 %v6397_v29, %v6318_v3  ;;  %v2079_v7 = vmul.f32 %v6397_v29, %v6325_v45 }
 0x38c   :  { %v2108_v53 = vadd.f32 %v6399_v60, %v2084_v2  ;;  %v2109_v13 = vadd.f32 %v6399_v60, %v2085_v35  ;;  %v2106_v63 = vadd.f32 %v6399_v60, %v2082_v28  ;;  %v2107_v32 = vadd.f32 %v6399_v60, %v2083_v48 }
 0x38d   :  { %v2104_v0 = vadd.f32 %v6399_v60, %v2080_v50  ;;  %v2105_v10 = vadd.f32 %v6399_v60, %v2081_v56  ;;  %v2102_v9 = vadd.f32 %v6399_v60, %v2078_v8  ;;  %v2103_v37 = vadd.f32 %v6399_v60, %v2079_v7 }
 0x38e   :  { %v2124_v3 = vmax.f32 %v2108_v53, 0.0  ;;  %v2125_v40 = vmax.f32 %v2109_v13, 0.0  ;;  %v2122_v22 = vmax.f32 %v2106_v63, 0.0  ;;  %v2123_v45 = vmax.f32 %v2107_v32, 0.0 }
 0x38f   :  { %v2120_v5 = vmax.f32 %v2104_v0, 0.0  ;;  %v2121_v33 = vmax.f32 %v2105_v10, 0.0  ;;  %v2118_v1 = vmax.f32 %v2102_v9, 0.0  ;;  %v2119_v11 = vmax.f32 %v2103_v37, 0.0 }
 0x390   :  { %v2170_v46 = vrot.slane %v2124_v3, 1  ;;  %v2172_v44 = vrot.slane %v2125_v40, 1  ;;  %v2166_v42 = vrot.slane %v2122_v22, 1  ;;  %v2168_v4 = vrot.slane %v2123_v45, 1 }
 0x391   :  { %v2162_v57 = vrot.slane %v2120_v5, 1  ;;  %v2164_v43 = vrot.slane %v2121_v33, 1  ;;  %v2158_v62 = vrot.slane %v2118_v1, 1  ;;  %v2160_v36 = vrot.slane %v2119_v11, 1 }
 0x392   :  { %v2173_v49 = vsel %vm978_vm1, %v2170_v46, %v2172_v44  ;;  %v2175_v18 = vsel %vm978_vm1, %v2172_v44, %v6392_v17  ;;  %v2169_v47 = vsel %vm978_vm1, %v2166_v42, %v2168_v4  ;;  %v2171_v38 = vsel %vm978_vm1, %v2168_v4, %v2170_v46 }
 0x393   :  { %v2206_v59 = vmax.f32 %v2124_v3, %v2173_v49  ;;  %v2207_v23 = vmax.f32 %v2125_v40, %v2175_v18  ;;  %v2204_v24 = vmax.f32 %v2122_v22, %v2169_v47  ;;  %v2205_v20 = vmax.f32 %v2123_v45, %v2171_v38 }
 0x394   :  { %v2165_v15 = vsel %vm978_vm1, %v2162_v57, %v2164_v43  ;;  %v2167_v52 = vsel %vm978_vm1, %v2164_v43, %v2166_v42  ;;  %v2161_v14 = vsel %vm978_vm1, %v2158_v62, %v2160_v36  ;;  %v2163_v6 = vsel %vm978_vm1, %v2160_v36, %v2162_v57 }
 0x395   :  { %v2225_v26 = vmax.f32 %v2206_v59, %v2207_v23  ;;  %v2226_v34 = vmax.f32 %v2207_v23, %v7045_v39  ;;  %v2223_v25 = vmax.f32 %v2204_v24, %v2205_v20  ;;  %v2224_v61 = vmax.f32 %v2205_v20, %v2206_v59 }
 0x396   :  { %v2202_v48 = vmax.f32 %v2120_v5, %v2165_v15  ;;  %v2203_v2 = vmax.f32 %v2121_v33, %v2167_v52  ;;  %v6435_v35 = vmax.f32 %v2118_v1, %v2161_v14  ;;  %v2201_v28 = vmax.f32 %v2119_v11, %v2163_v6 }
 0x397   :  { %v2238_v50 = vpack.c.bf16 %v2226_v34, %v2225_v26  ;;  %v2237_v56 = vpack.c.bf16 %v2224_v61, %v2223_v25  ;;  %v2076_v8 = vmul.f32 %v6397_v29, %v6302_v19  ;;  %v2077_v7 = vmul.f32 %v6397_v29, %v6309_v27 }
 0x398   :  { %v2221_v53 = vmax.f32 %v2202_v48, %v2203_v2  ;;  %v2222_v13 = vmax.f32 %v2203_v2, %v2204_v24  ;;  %v2219_v63 = vmax.f32 %v6435_v35, %v2201_v28  ;;  %v2220_v32 = vmax.f32 %v2201_v28, %v2202_v48 }
 0x399   :  { %3627 = vmatprep.subr.bf16.mxu1 %v2238_v50  ;;  %v2100_v0 = vadd.f32 %v6399_v60, %v2076_v8  ;;  %v2101_v10 = vadd.f32 %v6399_v60, %v2077_v7  ;;  %v2074_v9 = vmul.f32 %v6397_v29, %v6286_v12  ;;  %v2075_v37 = vmul.f32 %v6397_v29, %v6293_v41 }
 0x39a   :  { %3628 = vmatpush3.bf16.msra.mxu1 %v2238_v50  ;;  %v2236_v19 = vpack.c.bf16 %v2222_v13, %v2221_v53  ;;  %v2235_v3 = vpack.c.bf16 %v2220_v32, %v2219_v63  ;;  %v2072_v27 = vmul.f32 %v6397_v29, %v6272_v55  ;;  %v2073_v40 = vmul.f32 %v6397_v29, %v6277_v54 }
 0x39b   :  { %3629 = vmatprep.subr.bf16.mxu1 %v2237_v56  ;;  %v2116_v22 = vmax.f32 %v2100_v0, 0.0  ;;  %v2117_v45 = vmax.f32 %v2101_v10, 0.0  ;;  %v2098_v5 = vadd.f32 %v6399_v60, %v2074_v9  ;;  %v2099_v33 = vadd.f32 %v6399_v60, %v2075_v37  ;;  %v6471_v10 = vpop.permute.xlu1 %2347 }
 0x39c   :  { %v2096_v12 = vadd.f32 %v6399_v60, %v2072_v27  ;;  %v2097_v41 = vadd.f32 %v6399_v60, %v2073_v40  ;;  %v2070_v1 = vmul.f32 %v6397_v29, %v6263_v21  ;;  %v2071_v55 = vmul.f32 %v6397_v29, %v6267_v16 }
 0x39d   :  { %v2154_v11 = vrot.slane %v2116_v22, 1  ;;  %v2156_v46 = vrot.slane %v2117_v45, 1  ;;  %v2114_v54 = vmax.f32 %v2098_v5, 0.0  ;;  %v2115_v44 = vmax.f32 %v2099_v33, 0.0 }
 0x39e   :  { %3630 = vmatpush3.bf16.msra.mxu1 %v2237_v56  ;;  %v2112_v42 = vmax.f32 %v2096_v12, 0.0  ;;  %v2113_v4 = vmax.f32 %v2097_v41, 0.0  ;;  %v2094_v57 = vadd.f32 %v6399_v60, %v2070_v1  ;;  %v2095_v43 = vadd.f32 %v6399_v60, %v2071_v55 }
 0x39f   :  { %3631 = vmatprep.subr.bf16.mxu1 %v2236_v19  ;;  %v2157_v36 = vsel %vm978_vm1, %v2154_v11, %v2156_v46  ;;  %v2159_v49 = vsel %vm978_vm1, %v2156_v46, %v2158_v62  ;;  %v2150_v21 = vrot.slane %v2114_v54, 1  ;;  %v2152_v18 = vrot.slane %v2115_v44, 1  ;;  %v2354_v37 = vpop.permute.xlu1 %2353 }
 0x3a0   :  { %v2198_v47 = vmax.f32 %v2116_v22, %v2157_v36  ;;  %v2199_v16 = vmax.f32 %v2117_v45, %v2159_v49  ;;  %v2146_v29 = vrot.slane %v2112_v42, 1  ;;  %v2148_v38 = vrot.slane %v2113_v4, 1 }
 0x3a1   :  { %v2153_v59 = vsel %vm978_vm1, %v2150_v21, %v2152_v18  ;;  %v2155_v23 = vsel %vm978_vm1, %v2152_v18, %v2154_v11  ;;  %v2110_v24 = vmax.f32 %v2094_v57, 0.0  ;;  %v2111_v20 = vmax.f32 %v2095_v43, 0.0  ;;  %v2351_v11 = vpop.permute.xlu0 %2350 }
 0x3a2   :  { %3632 = vmatpush3.bf16.msra.mxu1 %v2236_v19  ;;  %v2217_v15 = vmax.f32 %v2198_v47, %v2199_v16  ;;  %v2218_v60 = vmax.f32 %v2199_v16, %v6435_v35  ;;  %v2196_v52 = vmax.f32 %v2114_v54, %v2153_v59  ;;  %v2197_v14 = vmax.f32 %v2115_v44, %v2155_v23  ;;  %v4228_v19 = vld [vmem:[%s6960_s4 + $0x8] sm:$0xff]  }
 0x3a3   :  { %3633 = vmatprep.subr.bf16.mxu1 %v2235_v3  ;;  %v2149_v62 = vsel %vm978_vm1, %v2146_v29, %v2148_v38  ;;  %v2151_v6 = vsel %vm978_vm1, %v2148_v38, %v2150_v21  ;;  %v2143_v26 = vrot.slane %v2110_v24, 1  ;;  %v2144_v34 = vrot.slane %v2111_v20, 1  ;;  %v6476_v27 = vpop.permute.xlu1 %2356 }
 0x3a4   :  { %v2215_v25 = vmax.f32 %v2196_v52, %v2197_v14  ;;  %v2216_v61 = vmax.f32 %v2197_v14, %v2198_v47  ;;  %v2234_v48 = vpack.c.bf16 %v2218_v60, %v2217_v15  ;;  %v2194_v2 = vmax.f32 %v2112_v42, %v2149_v62 }
 0x3a5   :  { %v2195_v28 = vmax.f32 %v2113_v4, %v2151_v6  ;;  %v2145_v50 = vsel %vm978_vm1, %v2143_v26, %v2144_v34  ;;  %v2147_v56 = vsel %vm978_vm1, %v2144_v34, %v2146_v29  ;;  %v2363_v40 = vrot.slane %v6476_v27, 7  ;;  %v6489_v46 = vpop.permute.xlu0 %2376 }
 0x3a6   :  { %3634 = vmatpush3.bf16.msra.mxu1 %v2235_v3  ;;  %v2233_v35 = vpack.c.bf16 %v2216_v61, %v2215_v25  ;;  %v2192_v53 = vmax.f32 %v2110_v24, %v2145_v50  ;;  %v2193_v13 = vmax.f32 %v2111_v20, %v2147_v56  ;;  %v2361_v3 = vrot.slane %v2354_v37, 7 }
 0x3a7   :  { %3635 = vmatprep.subr.bf16.mxu1 %v2234_v48  ;;  %v2213_v8 = vmax.f32 %v2194_v2, %v2195_v28  ;;  %v2214_v7 = vmax.f32 %v2195_v28, %v2196_v52  ;;  %v2380_v45 = vpop.permute.xlu1 %2379  ;;  %v2358_v16 = vrot.slane %v6471_v10, 7  ;;  %v2359_v29 = vrot.slane %v2351_v11, 7 }
 0x3a8   :  { %v2211_v32 = vmax.f32 %v2192_v53, %v2193_v13  ;;  %v2212_v0 = vmax.f32 %v2193_v13, %v2194_v2  ;;  %v6483_v22 = vsel %vm72_vm0, %v2361_v3, %v2363_v40  ;;  %v2388_v38 = vrot.slane %v2380_v45, 6 }
 0x3a9   :  { %v2232_v63 = vpack.c.bf16 %v2214_v7, %v2213_v8  ;;  %v6493_v44 = vpop.permute.xlu0 %2385  ;;  %v2387_v59 = vrot.slane %v6489_v46, 6  ;;  %v6511_v62 = vsel %vm72_vm0, %v2358_v16, %v2359_v29  ;;  %v6514_v6 = vsel %vm72_vm0, %v2359_v29, %v2361_v3 }
 0x3aa   :  { %3636 = vmatpush3.bf16.msra.mxu1 %v2234_v48  ;;  %v2231_v9 = vpack.c.bf16 %v2212_v0, %v2211_v32  ;;  %v2392_v24 = vrot.slane %v6493_v44, 6 }
 0x3ab   :  { %3637 = vmatprep.subr.bf16.mxu1 %v2233_v35  ;;  %v2383_v5 = vpop.permute.xlu1 %2382  ;;  %v6517_v26 = vsel %vm396_vm2, %v2387_v59, %v2388_v38 }
 0x3ac   :  { %v2390_v23 = vrot.slane %v2383_v5, 6 }
 0x3ad   :  { %v2409_v4 = vpop.permute.xlu0 %2408 }
 0x3ae   :  { %3638 = vmatpush3.bf16.msra.mxu1 %v2233_v35  ;;  %v2418_v14 = vrot.slane %v2409_v4, 4  ;;  %v6520_v25 = vsel %vm396_vm2, %v2388_v38, %v2390_v23  ;;  %v6530_v53 = vsel %vm396_vm2, %v2390_v23, %v2392_v24 }
 0x3af   :  { %3639 = vmatprep.subr.bf16.mxu1 %v2232_v63  ;;  %v6485_v33 = vpop.permute.xlu1 %2405 }
 0x3b0   :  { %v2417_v15 = vrot.slane %v6485_v33, 4 }
 0x3b1   :  { %v6495_v43 = vpop.permute.xlu0 %2435 }
 0x3b2   :  { %3640 = vmatpush3.bf16.msra.mxu1 %v2232_v63  ;;  %v2446_v48 = vrot.slane %v6495_v43, 2  ;;  %v6538_v63 = vsel %vm2416_vm14, %v2417_v15, %v2418_v14 }
 0x3b3   :  { %3641 = vmatprep.subr.bf16.mxu1 %v2231_v9  ;;  %v2412_v12 = vpop.permute.xlu1 %2411 }
 0x3b4   :  { %v2420_v60 = vrot.slane %v2412_v12, 4 }
 0x3b5   :  { %v6497_v49 = vpop.permute.xlu0 %2444 }
 0x3b6   :  { %3642 = vmatpush3.bf16.msra.mxu1 %v2231_v9  ;;  %v2451_v50 = vrot.slane %v6497_v49, 2  ;;  %v6541_v32 = vsel %vm2416_vm14, %v2418_v14, %v2420_v60 }
 0x3b7   :  { %3659 = vmatprep.subr.bf16.mxu1 %v7046_v30  ;;  %v6487_v41 = vpop.permute.xlu1 %2414 }
 0x3b8   :  { %v2422_v52 = vrot.slane %v6487_v41, 4 }
 0x3b9   :  { %3644 = vmatmul.mubr.bf16.vlgmr.msra.gmra.mxu1 %v4228_v19  ;;  %v2488_v21 = vpop.permute.xlu0 %2487 }
 0x3ba   :  { %v2496_v8 = vrot.slane %v2488_v21, 7  ;;  %v6535_v13 = vsel %vm2416_vm14, %v2420_v60, %v2422_v52 }
 0x3bb   :  { %v2439_v1 = vpop.permute.xlu1 %2438 }
 0x3bc   :  { %v2447_v61 = vrot.slane %v2439_v1, 2 }
 0x3be   :  { %v6548_v45 = vsel %vm1077_vm3, %v2446_v48, %v2447_v61 }
 0x3bf   :  { %v2442_v55 = vpop.permute.xlu1 %2441 }
 0x3c0   :  { %v2449_v2 = vrot.slane %v2442_v55, 2 }
 0x3c2   :  { %v6551_v5 = vsel %vm1077_vm3, %v2447_v61, %v2449_v2  ;;  %v6557_v1 = vsel %vm1077_vm3, %v2449_v2, %v2451_v50 }
 0x3c3   :  { %v6491_v54 = vpop.permute.xlu1 %2484 }
 0x3c4   :  { %v2495_v56 = vrot.slane %v6491_v54, 7 }
 0x3c6   :  { %v6562_v55 = vsel %vm72_vm0, %v2495_v56, %v2496_v8 }
 0x3c7   :  { %v2491_v42 = vpop.permute.xlu1 %2490 }
 0x3c8   :  { %v2498_v35 = vrot.slane %v2491_v42, 7 }
 0x3ca   :  { %v2499_v11 = vsel %vm72_vm0, %v2496_v8, %v2498_v35 }
 0x3cb   :  { %v2494_v57 = vpop.permute.xlu1 %2493  ;;  %v6501_v47 = vpop.permute.xlu0 %2513 }
 0x3cc   :  { %v2500_v34 = vrot.slane %v2494_v57, 7  ;;  %v7048_v9 = vrot.slane %v6501_v47, 6 }
 0x3ce   :  { %v6543_v0 = vmul.f32 0.0, %v2500_v34  ;;  %v2501_v4 = vsel %vm72_vm0, %v2498_v35, %v2500_v34  ;;  %vm2753_vm0 = vcmask 244736  }
 0x3cf   :  { %v2517_v36 = vpop.permute.xlu1 %2516  ;;  %v6523_v28 = vpop.permute.xlu0 %2522 }
 0x3d0   :  { %v2525_v10 = vrot.slane %v2517_v36, 6  ;;  %v7050_v37 = vrot.slane %v6523_v28, 6  ;;  %v2697_v21 = vrot.slane %v6543_v0, 1 }
 0x3d2   :  { %v6567_v46 = vmul.f32 0.0, %v7050_v37  ;;  %v6577_v29 = vsel %vm396_vm2, %v7048_v9, %v2525_v10 }
 0x3d3   :  { %v6499_v18 = vpop.permute.xlu1 %2519 }
 0x3d4   :  { %v7049_v33 = vrot.slane %v6499_v18, 6 }
 0x3d6   :  { %v6586_v14 = vsel %vm396_vm2, %v2525_v10, %v7049_v33 }
 0x3d7   :  { %v6506_v20 = vpop.permute.xlu1 %2464 }
 0x3db   :  { %v2473_v19 = vpop.permute.xlu1 %2472 }
 0x3df   :  { %v2477_v35 = vpop.permute.xlu1 %2476 }
 0x479   :  { %v3645_v7 = vpop.f32.mrf.mxu1 }
 0x47a   :  { %v2307_v57 = vrot.slane %v3645_v7, 3 }
 0x47b   :  { %v2285_v3 = vpop.f32.mrf.mxu1 }
 0x47c   :  { %v2304_v12 = vrot.slane %v2285_v3, 3  ;;  %v6607_v3 = vld [vmem:[%s6961_s5 + $0x18] ss:$0 sps:$4 sm:$0x77]  }
 0x47d   :  { %v3646_v42 = vpop.f32.mrf.mxu1  ;;  %3697 = vmatprep.subr.msk.bf16.mxu0 %vm2621_vm15, %v6607_v3 }
 0x47e   :  { %v6571_v43 = vsel %vm1848_vm4, 0.0, %v2304_v12  ;;  %v2309_v36 = vrot.slane %v3646_v42, 3 }
 0x47f   :  { %v2370_v38 = vmul.f32 %v2358_v16, %v6571_v43  ;;  %v6581_v23 = vmul.f32 %v2387_v59, %v6571_v43  ;;  %v2288_v60 = vpop.f32.mrf.mxu1  ;;  %v6589_v34 = vmul.f32 %v2417_v15, %v6571_v43  ;;  %v6598_v16 = vmul.f32 %v2446_v48, %v6571_v43 }
 0x480   :  { %v6592_v61 = vsel %vm1848_vm4, %v2307_v57, %v2309_v36  ;;  %v6595_v2 = vsel %vm1848_vm4, %v2309_v36, 0.0  ;;  %v2622_v8 = vrot.slane %v6571_v43, 5  ;;  %v2305_v0 = vrot.slane %v2288_v60, 3 }
 0x481   :  { %v2546_v59 = vrot.slane %v2370_v38, 1  ;;  %v2572_v7 = vrot.slane %v6581_v23, 2  ;;  %v2481_v15 = vmul.f32 %v2473_v19, %v6592_v61  ;;  %v2482_v10 = vmul.f32 %v2477_v35, %v6595_v2  ;;  %v2469_v23 = vpop.permute.xlu0 %2468 }
 0x482   :  { %v2627_v42 = vrot.slane %v6592_v61, 5  ;;  %v2629_v48 = vrot.slane %v6595_v2, 5  ;;  %v6612_v36 = vmul.f32 %v2499_v11, %v6592_v61  ;;  %v2510_v38 = vmul.f32 %v2501_v4, %v6595_v2 }
 0x483   :  { %v2598_v60 = vrot.slane %v6589_v34, 4  ;;  %v6617_v19 = vsel %vm1848_vm4, %v2304_v12, %v2305_v0  ;;  %v6620_v35 = vsel %vm1848_vm4, %v2305_v0, %v2307_v57  ;;  %v4137_v39 = vpack.i.bf16 %v2482_v10, %v2481_v15 }
 0x484   :  { %v2479_v30 = vmul.f32 %v6506_v20, %v6617_v19  ;;  %v2480_v11 = vmul.f32 %v2469_v23, %v6620_v35  ;;  %v2625_v4 = vrot.slane %v6620_v35, 5  ;;  %v2373_v9 = vmul.f32 %v6483_v22, %v6592_v61 }
 0x485   :  { %4138 = vrot.lane.b32.xlu0 %v4137_v39, %s4308_s25  ;;  %v2630_v12 = vsel %vm2621_vm15, %v2627_v42, %v2629_v48  ;;  %v2623_v57 = vrot.slane %v6617_v19, 5  ;;  %v2693_v0 = vrot.slane %v6612_v36, 1  ;;  %v2695_v15 = vrot.slane %v2510_v38, 1 }
 0x486   :  { %v4142_v10 = vpack.i.bf16 %v2480_v11, %v2479_v30  ;;  %v2628_v20 = vsel %vm2621_vm15, %v2625_v4, %v2627_v42  ;;  %v2371_v23 = vmul.f32 %v6511_v62, %v6617_v19  ;;  %v2372_v33 = vmul.f32 %v6514_v6, %v6620_v35 }
 0x487   :  { %v4152_v22 = vpack.i.bf16 %v2630_v12, %v2628_v20  ;;  %v2624_v37 = vsel %vm2621_vm15, %v2622_v8, %v2623_v57  ;;  %v2626_v39 = vsel %vm2621_vm15, %v2623_v57, %v2625_v4  ;;  %v2696_v48 = vsel %vm978_vm1, %v2693_v0, %v2695_v15 }
 0x488   :  { %4143 = vrot.lane.b32.xlu1 %v4142_v10, %s4308_s25  ;;  %v4147_v30 = vpack.i.bf16 %v2626_v39, %v2624_v37  ;;  %v2698_v42 = vsel %vm978_vm1, %v2695_v15, %v2697_v21  ;;  %v2547_v38 = vrot.slane %v2371_v23, 1  ;;  %v2549_v11 = vrot.slane %v2372_v33, 1 }
 0x489   :  { %4153 = vrot.lane.b32.xlu0 %v4152_v22, %s4296_s15  ;;  %v4157_v62 = vpack.i.bf16 %v2698_v42, %v2696_v48  ;;  %v2374_v6 = vmul.f32 %v2363_v40, %v6595_v2  ;;  %v2551_v8 = vrot.slane %v2373_v9, 1  ;;  %v2400_v4 = vmul.f32 %v6517_v26, %v6617_v19 }
 0x48a   :  { %v2548_v12 = vsel %vm978_vm1, %v2546_v59, %v2547_v38  ;;  %v2550_v57 = vsel %vm978_vm1, %v2547_v38, %v2549_v11  ;;  %v2401_v37 = vmul.f32 %v6520_v25, %v6620_v35  ;;  %v2402_v33 = vmul.f32 %v6530_v53, %v6592_v61 }
 0x48b   :  { %v4162_v21 = vpack.i.bf16 %v2550_v57, %v2548_v12  ;;  %v2552_v15 = vsel %vm978_vm1, %v2549_v11, %v2551_v8  ;;  %v2553_v10 = vrot.slane %v2374_v6, 1  ;;  %v2573_v27 = vrot.slane %v2400_v4, 2 }
 0x48c   :  { %4148 = vrot.lane.b32.xlu1 %v4147_v30, %s4296_s15  ;;  %v2575_v40 = vrot.slane %v2401_v37, 2  ;;  %v2403_v26 = vmul.f32 %v2392_v24, %v6595_v2  ;;  %v2577_v9 = vrot.slane %v2402_v33, 2  ;;  %v2430_v59 = vmul.f32 %v6538_v63, %v6617_v19 }
 0x48d   :  { %4158 = vrot.lane.b32.xlu0 %v4157_v62, %s4309_s0  ;;  %v2554_v25 = vsel %vm978_vm1, %v2551_v8, %v2553_v10  ;;  %v2574_v53 = vsel %vm1077_vm3, %v2572_v7, %v2573_v27  ;;  %v2431_v20 = vmul.f32 %v6541_v32, %v6620_v35  ;;  %v2432_v23 = vmul.f32 %v6535_v13, %v6592_v61 }
 0x48e   :  { %v2648_v44 = vrot.slane %v6598_v16, 6  ;;  %v4167_v24 = vpack.i.bf16 %v2554_v25, %v2552_v15  ;;  %v2576_v22 = vsel %vm1077_vm3, %v2573_v27, %v2575_v40  ;;  %v2579_v39 = vrot.slane %v2403_v26, 2 }
 0x48f   :  { %v2578_v63 = vsel %vm1077_vm3, %v2575_v40, %v2577_v9  ;;  %v2599_v48 = vrot.slane %v2430_v59, 4  ;;  %v2601_v30 = vrot.slane %v2431_v20, 4  ;;  %v2433_v7 = vmul.f32 %v2422_v52, %v6595_v2 }
 0x490   :  { %4163 = vrot.lane.b32.xlu1 %v4162_v21, %s4290_s18  ;;  %v4172_v32 = vpack.i.bf16 %v2576_v22, %v2574_v53  ;;  %v2603_v42 = vrot.slane %v2432_v23, 4  ;;  %v2459_v13 = vmul.f32 %v6548_v45, %v6617_v19  ;;  %v2460_v16 = vmul.f32 %v6551_v5, %v6620_v35 }
 0x491   :  { %4168 = vrot.lane.b32.xlu0 %v4167_v24, %s4290_s18  ;;  %v2580_v38 = vsel %vm1077_vm3, %v2577_v9, %v2579_v39  ;;  %v2600_v11 = vsel %vm2416_vm14, %v2598_v60, %v2599_v48  ;;  %v2602_v41 = vsel %vm2416_vm14, %v2599_v48, %v2601_v30  ;;  %v2605_v52 = vrot.slane %v2433_v7, 4 }
 0x492   :  { %v4177_v62 = vpack.i.bf16 %v2580_v38, %v2578_v63  ;;  %v2604_v6 = vsel %vm2416_vm14, %v2601_v30, %v2603_v42  ;;  %v2649_v8 = vrot.slane %v2459_v13, 6  ;;  %v2651_v4 = vrot.slane %v2460_v16, 6 }
 0x493   :  { %v2606_v45 = vsel %vm2416_vm14, %v2603_v42, %v2605_v52  ;;  %v2461_v5 = vmul.f32 %v6557_v1, %v6592_v61  ;;  %v2462_v12 = vmul.f32 %v2451_v50, %v6595_v2  ;;  %v2507_v34 = vmul.f32 %v2495_v56, %v6617_v19  ;;  %v2330_v42 = vpop.permute.xlu1 %2329 }
 0x494   :  { %v7210_v60 = vrot.slane %v6523_v28, 6  ;;  %v7211_v57 = vrot.slane %v6499_v18, 6  ;;  %4173 = vrot.lane.b32.xlu1 %v4172_v32, %s4292_s22  ;;  %v4182_v33 = vpack.i.bf16 %v2602_v41, %v2600_v11  ;;  %v4187_v21 = vpack.i.bf16 %v2606_v45, %v2604_v6  ;;  %v4230_v18 = vld [vmem:[%s6961_s5 + $0x10] sm:$0xff]   ;;  %v2325_v32 = vpop.permute.xlu0 %2324 }
 0x495   :  { %v2508_v1 = vmul.f32 %v6562_v55, %v6620_v35  ;;  %4178 = vrot.lane.b32.xlu0 %v4177_v62, %s4292_s22  ;;  %v2650_v49 = vsel %vm396_vm2, %v2648_v44, %v2649_v8  ;;  %v2652_v54 = vsel %vm396_vm2, %v2649_v8, %v2651_v4  ;;  %v2653_v50 = vrot.slane %v2461_v5, 6 }
 0x496   :  { %v2530_v37 = vsel %vm396_vm2, %v7211_v57, %v7210_v60  ;;  %v2655_v56 = vrot.slane %v2462_v12, 6  ;;  %v2690_v28 = vrot.slane %v2507_v34, 1  ;;  %v2538_v10 = vmul.f32 %v6586_v14, %v6592_v61 }
 0x497   :  { %v2691_v15 = vrot.slane %v2508_v1, 1  ;;  %v2539_v27 = vmul.f32 %v2530_v37, %v6595_v2  ;;  %v2654_v55 = vsel %vm396_vm2, %v2651_v4, %v2653_v50  ;;  %v7212_v40 = vrot.slane %v6501_v47, 6  ;;  %v4231_v47 = vld [vmem:[%s6961_s5 + $0x8] sm:$0xff]   ;;  %v2335_v16 = vpop.permute.xlu1 %2334 }
 0x498   :  { %v2537_v9 = vmul.f32 %v6577_v29, %v6620_v35  ;;  %v2811_v59 = vsel %vm2621_vm15, %v6607_v3, 0  ;;  %4183 = vrot.lane.b32.xlu1 %v4182_v33, %s4294_s13  ;;  %v2719_v25 = vrot.slane %v2538_v10, 2  ;;  %v2656_v14 = vsel %vm396_vm2, %v2653_v50, %v2655_v56  ;;  %v2340_v13 = vpop.permute.xlu0 %2339 }
 0x499   :  { %v2536_v26 = vmul.f32 %v7212_v40, %v6617_v19  ;;  %3648 = vmatpush3.bf16.msra.mxu0 %v2811_v59  ;;  %4188 = vrot.lane.b32.xlu0 %v4187_v21, %s4294_s13  ;;  %v2721_v2 = vrot.slane %v2539_v27, 2  ;;  %v2723_v53 = vrot.slane %v6567_v46, 2  ;;  %v4192_v29 = vpack.i.bf16 %v2652_v54, %v2650_v49  ;;  %v4232_v46 = vld [vmem:[%s6961_s5] sm:$0xff]   ;;  %s4313_s5 = smov 110  }
 0x49a   :  { %3649 = vmatprep.subr.bf16.mxu0 %v4230_v18  ;;  %v4197_v20 = vpack.i.bf16 %v2656_v14, %v2654_v55  ;;  %v2692_v3 = vsel %vm978_vm1, %v2690_v28, %v2691_v15  ;;  %v2694_v23 = vsel %vm978_vm1, %v2691_v15, %v2693_v0  ;;  %v2717_v24 = vrot.slane %v2537_v9, 2 }
 0x49b   :  { %v2716_v44 = vrot.slane %v2536_v26, 2  ;;  %v2722_v22 = vsel %vm1077_vm3, %v2719_v25, %v2721_v2  ;;  %v2724_v39 = vsel %vm1077_vm3, %v2721_v2, %v2723_v53  ;;  %v4202_v36 = vpack.i.bf16 %v2694_v23, %v2692_v3 }
 0x49c   :  { %4193 = vrot.lane.b32.xlu1 %v4192_v29, %s4310_s26  ;;  %v4212_v63 = vpack.i.bf16 %v2724_v39, %v2722_v22  ;;  %v2720_v48 = vsel %vm1077_vm3, %v2717_v24, %v2719_v25  ;;  %v7213_v7 = vmov 0.0   ;;  %v2342_v4 = vmul.f32 %v2325_v32, %v6571_v43 }
 0x49d   :  { %3650 = vmatpush3.bf16.msra.mxu0 %v4230_v18  ;;  %4198 = vrot.lane.b32.xlu0 %v4197_v20, %s4310_s26  ;;  %v2718_v0 = vsel %vm1077_vm3, %v2716_v44, %v2717_v24  ;;  %v2345_v45 = vmul.f32 %v2340_v13, %v6592_v61  ;;  %v2344_v12 = vmul.f32 %v2335_v16, %v6620_v35 }
 0x49e   :  { %3651 = vmatprep.subr.bf16.mxu0 %v4231_v47  ;;  %v4207_v30 = vpack.i.bf16 %v2720_v48, %v2718_v0  ;;  %v2343_v57 = vmul.f32 %v2330_v42, %v6617_v19  ;;  %3663 = vmatprep.mubr.msk.bf16.mxu1 %vm4315_vm13, %v7213_v7 }
 0x4a0   :  { %4203 = vrot.lane.b32.xlu1 %v4202_v36, %s4309_s0 }
 0x4a1   :  { %3652 = vmatpush3.bf16.msra.mxu0 %v4231_v47  ;;  %4213 = vrot.lane.b32.xlu0 %v4212_v63, %s4311_s29 }
 0x4a2   :  { %3653 = vmatprep.subr.bf16.mxu0 %v4232_v46 }
 0x4a4   :  { %4208 = vrot.lane.b32.xlu1 %v4207_v30, %s4311_s29 }
 0x4a5   :  { %3654 = vmatpush3.bf16.msra.mxu0 %v4232_v46 }
 0x4a6   :  { %3667 = vmatprep.subr.bf16.mxu0 %v7213_v7 }
 0x4f7   :  { %v6748_v38 = vpop.permute.xlu0 %4138 }
 0x4f8   :  { %v4141_v33 = vunpack.i.h.bf16 %v6748_v38  ;;  %v4140_v43 = vunpack.i.l.bf16 %v6748_v38 }
 0x4fa   :  { %v6750_v11 = vpop.permute.xlu1 %4143 }
 0x4fb   :  { %v4154_v41 = vpop.permute.xlu0 %4153  ;;  %v4145_v61 = vunpack.i.l.bf16 %v6750_v11 }
 0x4fc   :  { %v4156_v35 = vunpack.i.h.bf16 %v4154_v41  ;;  %v4155_v18 = vunpack.i.l.bf16 %v4154_v41 }
 0x4fe   :  { %v4149_v52 = vpop.permute.xlu1 %4148 }
 0x4ff   :  { %v6752_v62 = vpop.permute.xlu0 %4158  ;;  %v4151_v44 = vunpack.i.h.bf16 %v4149_v52  ;;  %v4150_v24 = vunpack.i.l.bf16 %v4149_v52 }
 0x500   :  { %v4161_v36 = vunpack.i.h.bf16 %v6752_v62  ;;  %v4160_v63 = vunpack.i.l.bf16 %v6752_v62 }
 0x502   :  { %v4164_v6 = vpop.permute.xlu1 %4163 }
 0x503   :  { %v4169_v8 = vpop.permute.xlu0 %4168  ;;  %v4166_v34 = vunpack.i.h.bf16 %v4164_v6  ;;  %v4165_v60 = vunpack.i.l.bf16 %v4164_v6 }
 0x504   :  { %v4171_v21 = vunpack.i.h.bf16 %v4169_v8  ;;  %v4170_v1 = vunpack.i.l.bf16 %v4169_v8 }
 0x505   :  { %v2737_v19 = vsel %vm1681_vm6, %v2342_v4, %v4165_v60  ;;  %v2738_v15 = vsel %vm1681_vm6, %v2343_v57, %v4166_v34 }
 0x506   :  { %v4174_v5 = vpop.permute.xlu1 %4173  ;;  %v2740_v40 = vsel %vm1681_vm6, %v2345_v45, %v4171_v21  ;;  %v2739_v26 = vsel %vm1681_vm6, %v2344_v12, %v4170_v1 }
 0x507   :  { %v4179_v37 = vpop.permute.xlu0 %4178  ;;  %v4176_v49 = vunpack.i.h.bf16 %v4174_v5  ;;  %v4175_v54 = vunpack.i.l.bf16 %v4174_v5 }
 0x508   :  { %v4181_v50 = vunpack.i.h.bf16 %v4179_v37  ;;  %v4180_v56 = vunpack.i.l.bf16 %v4179_v37  ;;  %v4146_v37 = vunpack.i.h.bf16 %v6750_v11 }
 0x509   :  { %v2741_v25 = vsel %vm1715_vm8, %v2737_v19, %v4175_v54  ;;  %v2742_v14 = vsel %vm1715_vm8, %v2738_v15, %v4176_v49 }
 0x50a   :  { %v4184_v28 = vpop.permute.xlu1 %4183  ;;  %v2743_v2 = vsel %vm1715_vm8, %v2739_v26, %v4180_v56  ;;  %v2744_v47 = vsel %vm1715_vm8, %v2740_v40, %v4181_v50 }
 0x50b   :  { %v4186_v10 = vunpack.i.h.bf16 %v4184_v28  ;;  %v4185_v27 = vunpack.i.l.bf16 %v4184_v28  ;;  %v4189_v55 = vpop.permute.xlu0 %4188 }
 0x50c   :  { %v4191_v9 = vunpack.i.h.bf16 %v4189_v55  ;;  %v4190_v59 = vunpack.i.l.bf16 %v4189_v55 }
 0x50d   :  { %v2745_v53 = vsel %vm1749_vm10, %v2741_v25, %v4185_v27  ;;  %v2746_v29 = vsel %vm1749_vm10, %v2742_v14, %v4186_v10 }
 0x50e   :  { %v2747_v20 = vsel %vm1749_vm10, %v2743_v2, %v4190_v59  ;;  %v2748_v3 = vsel %vm1749_vm10, %v2744_v47, %v4191_v9  ;;  %v4194_v23 = vpop.permute.xlu1 %4193  ;;  %v2749_v30 = vsel %vm1783_vm12, %v2745_v53, %v4150_v24  ;;  %v2750_v32 = vsel %vm1783_vm12, %v2746_v29, %v4151_v44 }
 0x50f   :  { %v4196_v22 = vunpack.i.h.bf16 %v4194_v23  ;;  %v4195_v39 = vunpack.i.l.bf16 %v4194_v23  ;;  %v4199_v46 = vpop.permute.xlu0 %4198  ;;  %v2751_v42 = vsel %vm1783_vm12, %v2747_v20, %v4155_v18  ;;  %v2752_v13 = vsel %vm1783_vm12, %v2748_v3, %v4156_v35 }
 0x510   :  { %v4201_v0 = vunpack.i.h.bf16 %v4199_v46  ;;  %v4200_v48 = vunpack.i.l.bf16 %v4199_v46 }
 0x511   :  { %v2754_v16 = vsel %vm2753_vm0, %v2749_v30, %v4195_v39  ;;  %v2755_v38 = vsel %vm2753_vm0, %v2750_v32, %v4196_v22 }
 0x512   :  { %v2756_v41 = vsel %vm2753_vm0, %v2751_v42, %v4200_v48  ;;  %v2757_v52 = vsel %vm2753_vm0, %v2752_v13, %v4201_v0  ;;  %v4204_v6 = vpop.permute.xlu1 %4203  ;;  %v2759_v21 = vsel %vm2758_vm7, %v2754_v16, %v4145_v61 }
 0x513   :  { %v2761_v62 = vsel %vm2758_vm7, %v2756_v41, %v4140_v43  ;;  %v2762_v8 = vsel %vm2758_vm7, %v2757_v52, %v4141_v33  ;;  %v4206_v4 = vunpack.i.h.bf16 %v4204_v6  ;;  %v4205_v45 = vunpack.i.l.bf16 %v4204_v6  ;;  %v4214_v5 = vpop.permute.xlu0 %4213 }
 0x514   :  { %v4216_v12 = vunpack.i.h.bf16 %v4214_v5  ;;  %v4215_v34 = vunpack.i.l.bf16 %v4214_v5  ;;  %v2766_v60 = vsel %vm2763_vm5, %v2761_v62, %v4160_v63  ;;  %v2767_v57 = vsel %vm2763_vm5, %v2762_v8, %v4161_v36 }
 0x515   :  { %v2760_v33 = vsel %vm2758_vm7, %v2755_v38, %v4146_v37  ;;  %v2764_v35 = vsel %vm2763_vm5, %v2759_v21, %v4205_v45 }
 0x516   :  { %v2771_v1 = vsel %vm2768_vm9, %v2766_v60, %v4215_v34  ;;  %v2772_v49 = vsel %vm2768_vm9, %v2767_v57, %v4216_v12  ;;  %v4209_v54 = vpop.permute.xlu1 %4208  ;;  %v2765_v18 = vsel %vm2763_vm5, %v2760_v33, %v4206_v4  ;;  %v4312_v12 = vmov 1966171168  }
 0x517   :  { %v2774_v50 = vpack.c.bf16 %v2772_v49, %v2771_v1  ;;  %v4211_v56 = vunpack.i.h.bf16 %v4209_v54  ;;  %v4210_v43 = vunpack.i.l.bf16 %v4209_v54  ;;  %v2903_v34 = vunpack.c.l.s4 %v4312_v12  ;;  %v4257_v54 = vld [vmem:[%s6958_s2] sm:$0x1] }
 0x518   :  { %v2987_v12 = vld [vmem:[%s6962_s6] sm:$0xf] }
 0x519   :  { %v2769_v28 = vsel %vm2768_vm9, %v2764_v35, %v4210_v43  ;;  %v2770_v11 = vsel %vm2768_vm9, %v2765_v18, %v4211_v56  ;;  %v2904_v60 = vunpack.c.0.s8 %v2903_v34  ;;  %v4258_v56 = vld [vmem:[%s6957_s1] sm:$0xff]  ;;  %v4318_v43 = vmov 21  }
 0x51a   :  { %v2773_v61 = vpack.c.bf16 %v2770_v11, %v2769_v28  ;;  %v4319_v35 = vmov 23   ;;  %v4320_v18 = vmov 24   ;;  %v4321_v28 = vmov 26  }
 0x51b   :  { %v6823_v57 = vsub.s32 %v2904_v60, %v6152_v58  ;;  %v4316_v58 = vmov 20   ;;  %v4322_v11 = vmov 25  }
 0x51c   :  { %3655 = vmatprep.mubr.msk.bf16.mxu0 %vm7051_vm11, %v2773_v61  ;;  %4218 = vset.pattern.permute.xlu1 %v4316_v58  ;;  %v4323_v61 = vmov 18  }
 0x51d   :  { %3656 = vmatmul.mubr.msk.bf16.vlgmr.msra.gmra.mxu0 %vm7051_vm11, %v2774_v50  ;;  %vm2990_vm11 = vcmask 261120  }
 0x51e   :  { %3675 = vmatprep.mubr.msk.bf16.mxu0 %vm4315_vm13, %v7213_v7 }
 0x5dd   :  { %v3657_v19 = vpop.f32.mrf.mxu0 }
 0x5de   :  { %v2865_v9 = vsel %vm1681_vm6, %v3657_v19, 0.0 }
 0x5df   :  { %v2847_v15 = vpop.f32.mrf.mxu0 }
 0x5e0   :  { %v2862_v55 = vsel %vm1681_vm6, %v2847_v15, 0.0 }
 0x5e1   :  { %v3658_v10 = vpop.f32.mrf.mxu0 }
 0x5e2   :  { %v2867_v25 = vsel %vm1681_vm6, %v3658_v10, 0.0 }
 0x5e3   :  { %v2850_v27 = vpop.f32.mrf.mxu0 }
 0x5e4   :  { %v2863_v40 = vsel %vm1681_vm6, %v2850_v27, 0.0 }
 0x5e5   :  { %v2864_v26 = vadd.f32 %v2863_v40, %v2862_v55 }
 0x5e7   :  { %v2866_v59 = vadd.f32 %v2865_v9, %v2864_v26 }
 0x5e9   :  { %v2868_v14 = vadd.f32 %v2867_v25, %v2866_v59 }
 0x5eb   :  { %v2869_v2 = vrot.slane %v2868_v14, 4 }
 0x5ed   :  { %v2870_v47 = vadd.f32 %v2869_v2, %v2868_v14 }
 0x5ef   :  { %v2871_v53 = vrot.slane %v2870_v47, 2 }
 0x5f1   :  { %v2872_v29 = vadd.f32 %v2871_v53, %v2870_v47 }
 0x5f3   :  { %v2873_v20 = vrot.slane %v2872_v29, 1 }
 0x5f5   :  { %v2874_v3 = vadd.f32 %v2873_v20, %v2872_v29 }
 0x5f7   :  { %v2876_v23 = vmul.f32 0.03125, %v2874_v3 }
 0x5f9   :  { %v6802_v44 = vsub.f32 %v2847_v15, %v2876_v23  ;;  %v6804_v24 = vsub.f32 %v2850_v27, %v2876_v23  ;;  %v6806_v22 = vsub.f32 %v3657_v19, %v2876_v23  ;;  %v6808_v39 = vsub.f32 %v3658_v10, %v2876_v23 }
 0x5fb   :  { %v2881_v46 = vmul.f32 %v6802_v44, %v6802_v44  ;;  %v2882_v36 = vmul.f32 %v6804_v24, %v6804_v24  ;;  %v2883_v63 = vmul.f32 %v6806_v22, %v6806_v22  ;;  %v2884_v0 = vmul.f32 %v6808_v39, %v6808_v39 }
 0x5fd   :  { %v2885_v48 = vsel %vm1681_vm6, %v2881_v46, 0.0  ;;  %v2886_v30 = vsel %vm1681_vm6, %v2882_v36, 0.0  ;;  %v2888_v42 = vsel %vm1681_vm6, %v2883_v63, 0.0  ;;  %v2890_v16 = vsel %vm1681_vm6, %v2884_v0, 0.0 }
 0x5fe   :  { %v2887_v32 = vadd.f32 %v2886_v30, %v2885_v48 }
 0x600   :  { %v2889_v13 = vadd.f32 %v2888_v42, %v2887_v32 }
 0x602   :  { %v2891_v38 = vadd.f32 %v2890_v16, %v2889_v13 }
 0x604   :  { %v2892_v41 = vrot.slane %v2891_v38, 4 }
 0x606   :  { %v2893_v52 = vadd.f32 %v2892_v41, %v2891_v38 }
 0x608   :  { %v2894_v6 = vrot.slane %v2893_v52, 2 }
 0x60a   :  { %v2895_v62 = vadd.f32 %v2894_v6, %v2893_v52 }
 0x60c   :  { %v2896_v8 = vrot.slane %v2895_v62, 1 }
 0x60e   :  { %v2897_v4 = vadd.f32 %v2896_v8, %v2895_v62 }
 0x610   :  { %v2898_v45 = vmul.f32 0.03125, %v2897_v4 }
 0x612   :  { %v2899_v5 = vadd.f32 1e-05, %v2898_v45 }
 0x614   :  { %4241 = vrsqrt.f32 %v2899_v5 }
 0x621   :  { %v4242_v37 = vpop.eup %4241 }
 0x622   :  { %v2908_v21 = vrot.slane %v4242_v37, %v6823_v57 }
 0x624   :  { %v2915_v1 = vrot.slane %v2908_v21, %v6823_v57 }
 0x626   :  { %2916 = vrot.lane.b32.xlu1 %v2915_v1, %s4292_s22  ;;  %v4233_v1 = vld [vmem:[%s6963_s7 + $0x18] ss:$0 sps:$4 sm:$0x77]  }
 0x62a   :  { %2932 = vrot.lane.b32.xlu1 %v6164_v31, %s4313_s5  ;;  %v4317_v31 = vmov 19  }
 0x62b   :  { %4217 = vset.pattern.permute.xlu0 %v4317_v31  ;;  %v4234_v31 = vld [vmem:[%s6963_s7 + $0x10] sm:$0xff]  }
 0x62e   :  { %3054 = vperm.xlu1 %4218, %v4258_v56  }
 0x632   :  { %4219 = vset.pattern.permute.xlu1 %v4318_v43 }
 0x633   :  { %3061 = vperm.xlu1 %4219, %v4258_v56  }
 0x637   :  { %4221 = vset.pattern.permute.xlu1 %v4320_v18 }
 0x638   :  { %3075 = vperm.xlu1 %4221, %v4258_v56  }
 0x63c   :  { %4222 = vset.pattern.permute.xlu1 %v4322_v11 }
 0x63d   :  { %3082 = vperm.xlu1 %4222, %v4258_v56  }
 0x641   :  { %4224 = vset.pattern.permute.xlu1 %v4323_v61 }
 0x642   :  { %3042 = vperm.xlu1 %4224, %v4258_v56  }
 0x698   :  { %v2917_v49 = vpop.permute.xlu1 %2916 }
 0x699   :  { %v2919_v33 = vmul.f32 %v4257_v54, %v2917_v49  ;;  %v3200_v54 = vsel %vm2621_vm15, %v4233_v1, 0 }
 0x69a   :  { %3668 = vmatpush3.bf16.msra.mxu0 %v3200_v54 }
 0x69b   :  { %v2924_v50 = vrot.slane %v2919_v33, %v6160_v51  ;;  %3669 = vmatprep.subr.bf16.mxu0 %v7213_v7 }
 0x69c   :  { %v2933_v15 = vpop.permute.xlu1 %2932 }
 0x69d   :  { %2925 = vrot.lane.b32.xlu0 %v2924_v50, %s4314_s16 }
 0x69e   :  { %3670 = vmatpush3.bf16.msra.mxu0 %v4234_v31 }
 0x69f   :  { %3671 = vmatprep.subr.bf16.mxu0 %v7213_v7 }
 0x6a1   :  { %3047 = vperm.xlu0 %4217, %v4258_v56  }
 0x6a5   :  { %4220 = vset.pattern.permute.xlu0 %v4319_v35 }
 0x6a6   :  { %3068 = vperm.xlu0 %4220, %v4258_v56  }
 0x6a9   :  { %v3055_v34 = vpop.permute.xlu1 %3054 }
 0x6aa   :  { %4223 = vset.pattern.permute.xlu0 %v4321_v28  ;;  %v3056_v35 = vrot.slane %v3055_v34, 6 }
 0x6ab   :  { %3089 = vperm.xlu0 %4223, %v4258_v56  }
 0x6ae   :  { %v3062_v37 = vpop.permute.xlu1 %3061 }
 0x6af   :  { %v3063_v56 = vrot.slane %v3062_v37, 6 }
 0x6b3   :  { %v3076_v49 = vpop.permute.xlu1 %3075 }
 0x6b4   :  { %v3077_v61 = vrot.slane %v3076_v49, 4 }
 0x70f   :  { %v2926_v19 = vpop.permute.xlu0 %2925 }
 0x710   :  { %v2928_v10 = vmul.f32 %v2926_v19, %v6802_v44  ;;  %v2929_v27 = vmul.f32 %v2926_v19, %v6804_v24  ;;  %v2930_v55 = vmul.f32 %v2926_v19, %v6806_v22  ;;  %v2931_v40 = vmul.f32 %v2926_v19, %v6808_v39 }
 0x711   :  { %v7214_v44 = vmax.f32 %v6392_v17, 0.0 }
 0x712   :  { %v2935_v26 = vadd.f32 %v2933_v15, %v2928_v10  ;;  %v2936_v9 = vadd.f32 %v2933_v15, %v2929_v27  ;;  %v2937_v59 = vadd.f32 %v2933_v15, %v2930_v55  ;;  %v2938_v25 = vadd.f32 %v2933_v15, %v2931_v40  ;;  %v3083_v27 = vpop.permute.xlu1 %3082 }
 0x713   :  { %v2977_v46 = vrot.slane %v7214_v44, 4 }
 0x714   :  { %v2939_v14 = vmax.f32 %v2935_v26, 0.0  ;;  %v2940_v2 = vmax.f32 %v2936_v9, 0.0  ;;  %v2941_v47 = vmax.f32 %v2937_v59, 0.0  ;;  %v2942_v53 = vmax.f32 %v2938_v25, 0.0  ;;  %v4235_v59 = vld [vmem:[%s6963_s7 + $0x8] sm:$0xff]  }
 0x715   :  { %v3084_v25 = vrot.slane %v3083_v27, 3  ;;  %3672 = vmatpush3.bf16.msra.mxu0 %v4235_v59 }
 0x716   :  { %v2947_v29 = vrot.slane %v2939_v14, 1  ;;  %v2948_v20 = vrot.slane %v2940_v2, 1  ;;  %v2950_v3 = vrot.slane %v2941_v47, 1  ;;  %v2952_v23 = vrot.slane %v2942_v53, 1  ;;  %3673 = vmatprep.subr.bf16.mxu0 %v7213_v7 }
 0x718   :  { %v2949_v24 = vsel %vm978_vm1, %v2947_v29, %v2948_v20  ;;  %v2951_v22 = vsel %vm978_vm1, %v2948_v20, %v2950_v3  ;;  %v2953_v39 = vsel %vm978_vm1, %v2950_v3, %v2952_v23  ;;  %v2954_v36 = vsel %vm978_vm1, %v2952_v23, %v6392_v17 }
 0x719   :  { %v2959_v63 = vmax.f32 %v2939_v14, %v2949_v24  ;;  %v2960_v0 = vmax.f32 %v2940_v2, %v2951_v22  ;;  %v2961_v48 = vmax.f32 %v2941_v47, %v2953_v39  ;;  %v2962_v30 = vmax.f32 %v2942_v53, %v2954_v36 }
 0x71b   :  { %v2970_v32 = vrot.slane %v2959_v63, 4  ;;  %v2971_v42 = vrot.slane %v2960_v0, 4  ;;  %v2973_v13 = vrot.slane %v2961_v48, 4  ;;  %v2975_v16 = vrot.slane %v2962_v30, 4 }
 0x71c   :  { %v3048_v60 = vpop.permute.xlu0 %3047 }
 0x71d   :  { %v2976_v38 = vsel %vm2416_vm14, %v2973_v13, %v2975_v16  ;;  %v2978_v41 = vsel %vm2416_vm14, %v2975_v16, %v2977_v46  ;;  %v2972_v52 = vsel %vm2416_vm14, %v2970_v32, %v2971_v42  ;;  %v2974_v6 = vsel %vm2416_vm14, %v2971_v42, %v2973_v13 }
 0x71e   :  { %v2985_v62 = vmax.f32 %v2961_v48, %v2976_v38  ;;  %v2986_v8 = vmax.f32 %v2962_v30, %v2978_v41  ;;  %v2983_v17 = vmax.f32 %v2959_v63, %v2972_v52  ;;  %v2984_v45 = vmax.f32 %v2960_v0, %v2974_v6  ;;  %v4236_v38 = vld [vmem:[%s6963_s7] sm:$0xff]  }
 0x71f   :  { %v3049_v50 = vrot.slane %v3048_v60, 7  ;;  %3674 = vmatpush3.bf16.msra.mxu0 %v4236_v38 }
 0x720   :  { %v2989_v4 = vpack.c.bf16 %v2986_v8, %v2985_v62  ;;  %v2988_v5 = vpack.c.bf16 %v2984_v45, %v2983_v17  ;;  %3691 = vmatprep.subr.bf16.mxu0 %v7213_v7 }
 0x721   :  { %v3069_v21 = vpop.permute.xlu0 %3068 }
 0x722   :  { %3660 = vmatpush3.bf16.msra.mxu1 %v2989_v4  ;;  %v3070_v19 = vrot.slane %v3069_v21, 4  ;;  %v3043_v21 = vpop.permute.xlu1 %3042 }
 0x723   :  { %3661 = vmatprep.subr.bf16.mxu1 %v7213_v7 }
 0x726   :  { %3662 = vmatpush3.bf16.msra.mxu1 %v2988_v5  ;;  %v3090_v11 = vpop.permute.xlu0 %3089 }
 0x727   :  { %3679 = vmatprep.subr.bf16.mxu1 %v7213_v7  ;;  %v3091_v14 = vrot.slane %v3090_v11, 2 }
 0x729   :  { %3664 = vmatmul.mubr.msk.bf16.vlgmr.msra.gmra.mxu1 %vm2990_vm11, %v2987_v12 }
 0x72a   :  { %3681 = vmatprep.mubr.msk.bf16.mxu1 %vm4315_vm13, %v7213_v7 }
 0x7e9   :  { %v3028_v33 = vpop.f32.mrf.mxu1 }
 0x7ea   :  { %v3035_v58 = vrot.slane %v3028_v33, 5 }
 0x7eb   :  { %v3665_v43 = vpop.f32.mrf.mxu1 }
 0x7ec   :  { %v6871_v18 = vsel %vm2621_vm15, 0.0, %v3035_v58  ;;  %v3038_v28 = vsel %vm2621_vm15, %v3035_v58, 0.0 }
 0x7ed   :  { %v3031_v15 = vpop.f32.mrf.mxu1  ;;  %v3121_v10 = vrot.slane %v6871_v18, 3  ;;  %v3122_v55 = vrot.slane %v3038_v28, 3  ;;  %v3051_v40 = vmul.f32 %v3049_v50, %v6871_v18  ;;  %v3052_v26 = vmul.f32 %v3049_v50, %v3038_v28 }
 0x7ee   :  { %v3058_v9 = vmul.f32 %v3056_v35, %v6871_v18  ;;  %v3059_v47 = vmul.f32 %v3056_v35, %v3038_v28  ;;  %v3065_v53 = vmul.f32 %v3063_v56, %v6871_v18  ;;  %v3066_v46 = vmul.f32 %v3063_v56, %v3038_v28 }
 0x7ef   :  { %v3666_v2 = vpop.f32.mrf.mxu1  ;;  %v3123_v29 = vsel %vm1848_vm4, %v3121_v10, %v3122_v55  ;;  %v3097_v20 = vrot.slane %v3051_v40, 1  ;;  %v3098_v3 = vrot.slane %v3052_v26, 1  ;;  %v3079_v22 = vmul.f32 %v3077_v61, %v6871_v18 }
 0x7f0   :  { %v3105_v23 = vrot.slane %v3058_v9, 2  ;;  %3124 = vrot.lane.b32.xlu0 %v3123_v29, %s4296_s15  ;;  %v3106_v44 = vrot.slane %v3059_v47, 2  ;;  %v3113_v24 = vrot.slane %v3065_v53, 2  ;;  %v3080_v36 = vmul.f32 %v3077_v61, %v3038_v28 }
 0x7f1   :  { %v3099_v39 = vsel %vm978_vm1, %v3097_v20, %v3098_v3  ;;  %v3072_v63 = vmul.f32 %v3070_v19, %v6871_v18  ;;  %v3073_v0 = vmul.f32 %v3070_v19, %v3038_v28  ;;  %v3093_v48 = vmul.f32 %v3091_v14, %v6871_v18 }
 0x7f2   :  { %3100 = vrot.lane.b32.xlu1 %v3099_v39, %s4290_s18  ;;  %v3114_v30 = vrot.slane %v3066_v46, 2  ;;  %v3094_v32 = vmul.f32 %v3091_v14, %v3038_v28  ;;  %v3107_v42 = vsel %vm1077_vm3, %v3105_v23, %v3106_v44  ;;  %v3137_v13 = vrot.slane %v3079_v22, 4 }
 0x7f3   :  { %v3138_v16 = vrot.slane %v3080_v36, 4  ;;  %v3129_v41 = vrot.slane %v3072_v63, 4  ;;  %v3130_v6 = vrot.slane %v3073_v0, 4  ;;  %v3086_v62 = vmul.f32 %v3084_v25, %v6871_v18 }
 0x7f4   :  { %3108 = vrot.lane.b32.xlu0 %v3107_v42, %s4292_s22  ;;  %v3115_v52 = vsel %vm1077_vm3, %v3113_v24, %v3114_v30  ;;  %v3087_v8 = vmul.f32 %v3084_v25, %v3038_v28  ;;  %v3153_v4 = vrot.slane %v3093_v48, 6  ;;  %v3154_v17 = vrot.slane %v3094_v32, 6  ;;  %s4324_s22 = smov 92  }
 0x7f5   :  { %v3139_v45 = vsel %vm2416_vm14, %v3137_v13, %v3138_v16  ;;  %v3131_v5 = vsel %vm2416_vm14, %v3129_v41, %v3130_v6  ;;  %v3145_v12 = vrot.slane %v3086_v62, 5  ;;  %v3045_v49 = vmul.f32 %v3043_v21, %v6871_v18  ;;  %v3242_v13 = vld [vmem:[%s6958_s2] sm:$0x1] }
 0x7f6   :  { %3116 = vrot.lane.b32.xlu1 %v3115_v52, %s4294_s13  ;;  %v3146_v34 = vrot.slane %v3087_v8, 5  ;;  %v3155_v60 = vsel %vm396_vm2, %v3153_v4, %v3154_v17  ;;  %vm7215_vm1 = vcmask 441344   ;;  %v3296_v16 = vrot.slane %v3242_v13, %v6160_v51  ;;  %s4325_s13 = smov 104  }
 0x7f7   :  { %vm3304_vm2 = vcmask 64512   ;;  %vm3406_vm4 = vcmask 123904  }
 0x7f8   :  { %3140 = vrot.lane.b32.xlu0 %v3139_v45, %s4308_s25  ;;  %v3147_v37 = vsel %vm2621_vm15, %v3145_v12, %v3146_v34  ;;  %v3302_v12 = vld [vmem:[%s6964_s8] sm:$0x1] }
 0x7f9   :  { %v4237_v34 = vld [vmem:[%s6965_s9] sm:$0x3f]  }
 0x7fa   :  { %3132 = vrot.lane.b32.xlu1 %v3131_v5, %s4310_s26 }
 0x7fc   :  { %3156 = vrot.lane.b32.xlu0 %v3155_v60, %s4311_s29  ;;  %v3363_v60 = vsel %vm1077_vm3, %v4237_v34, 0  ;;  %vm3478_vm3 = vcmask 130048  }
 0x7fe   :  { %3148 = vrot.lane.b32.xlu1 %v3147_v37, %s4309_s0 }
 0x862   :  { %v3125_v1 = vpop.permute.xlu0 %3124 }
 0x864   :  { %v3101_v54 = vpop.permute.xlu1 %3100 }
 0x865   :  { %v3159_v33 = vsel %vm1681_vm6, %v3045_v49, %v3101_v54  ;;  %vm3522_vm6 = vcmask 74752  }
 0x866   :  { %v3109_v50 = vpop.permute.xlu0 %3108 }
 0x867   :  { %v3160_v58 = vsel %vm1715_vm8, %v3159_v33, %v3109_v50 }
 0x868   :  { %v3117_v31 = vpop.permute.xlu1 %3116 }
 0x869   :  { %v3161_v56 = vsel %vm1749_vm10, %v3160_v58, %v3117_v31 }
 0x86a   :  { %v3141_v43 = vpop.permute.xlu0 %3140  ;;  %v3162_v35 = vsel %vm1783_vm12, %v3161_v56, %v3125_v1 }
 0x86c   :  { %v3133_v28 = vpop.permute.xlu1 %3132 }
 0x86d   :  { %v3163_v11 = vsel %vm2753_vm0, %v3162_v35, %v3133_v28 }
 0x86e   :  { %v3164_v61 = vsel %vm2758_vm7, %v3163_v11, %v3141_v43  ;;  %v3157_v15 = vpop.permute.xlu0 %3156 }
 0x870   :  { %v3149_v19 = vpop.permute.xlu1 %3148 }
 0x871   :  { %v3165_v18 = vsel %vm2763_vm5, %v3164_v61, %v3149_v19 }
 0x872   :  { %v3166_v10 = vsel %vm2768_vm9, %v3165_v18, %v3157_v15 }
 0x873   :  { %v3167_v27 = vpack.c.bf16 %v3166_v10, %v3166_v10 }
 0x875   :  { %3676 = vmatmul.mubr.msk.bf16.vlgmr.msra.gmra.mxu0 %vm7215_vm1, %v3167_v27 }
 0x876   :  { %3693 = vmatprep.mubr.msk.bf16.mxu0 %vm4315_vm13, %v7213_v7 }
 0x935   :  { %v3236_v55 = vpop.f32.mrf.mxu0 }
 0x936   :  { %v3243_v40 = vsel %vm1715_vm8, %v3236_v55, 0.0 }
 0x937   :  { %v3244_v26 = vrot.slane %v3243_v40, 4  ;;  %v3677_v9 = vpop.f32.mrf.mxu0 }
 0x939   :  { %v3245_v59 = vadd.f32 %v3244_v26, %v3243_v40  ;;  %v3239_v25 = vpop.f32.mrf.mxu0 }
 0x93b   :  { %v3246_v14 = vrot.slane %v3245_v59, 2  ;;  %v3678_v2 = vpop.f32.mrf.mxu0 }
 0x93d   :  { %v3247_v47 = vadd.f32 %v3246_v14, %v3245_v59 }
 0x93f   :  { %v3248_v53 = vrot.slane %v3247_v47, 1 }
 0x941   :  { %v3249_v29 = vadd.f32 %v3248_v53, %v3247_v47 }
 0x943   :  { %v3251_v20 = vmul.f32 0.125, %v3249_v29  ;;  %v3405_v29 = vld [vmem:[%s6958_s2] sm:$0x1]  ;;  %s4328_s2 = smov [#allocation2]  }
 0x945   :  { %v3252_v3 = vsub.f32 %v3236_v55, %v3251_v20  ;;  %v3460_v20 = vrot.slane %v3405_v29, %v6160_v51 }
 0x947   :  { %v3253_v23 = vmul.f32 %v3252_v3, %v3252_v3 }
 0x949   :  { %v3254_v44 = vsel %vm1715_vm8, %v3253_v23, 0.0 }
 0x94a   :  { %v3255_v46 = vrot.slane %v3254_v44, 4 }
 0x94c   :  { %v3256_v24 = vadd.f32 %v3255_v46, %v3254_v44 }
 0x94e   :  { %v3257_v22 = vrot.slane %v3256_v24, 2 }
 0x950   :  { %v3258_v39 = vadd.f32 %v3257_v22, %v3256_v24 }
 0x952   :  { %v3259_v36 = vrot.slane %v3258_v39, 1 }
 0x954   :  { %v3260_v63 = vadd.f32 %v3259_v36, %v3258_v39 }
 0x956   :  { %v3261_v0 = vmul.f32 0.125, %v3260_v63 }
 0x958   :  { %v3262_v48 = vadd.f32 1e-05, %v3261_v0 }
 0x95a   :  { %4243 = vrsqrt.f32 %v3262_v48 }
 0x967   :  { %v4244_v30 = vpop.eup %4243 }
 0x968   :  { %v3271_v32 = vrot.slane %v4244_v30, %v6823_v57 }
 0x96a   :  { %v3278_v42 = vrot.slane %v3271_v32, %v6823_v57 }
 0x96c   :  { %3279 = vrot.lane.b32.xlu1 %v3278_v42, %s4296_s15 }
 0x970   :  { %3297 = vrot.lane.b32.xlu1 %v3296_v16, %s4324_s22 }
 0x9de   :  { %v3280_v38 = vpop.permute.xlu1 %3279 }
 0x9df   :  { %v3282_v41 = vmul.f32 %v3280_v38, %v3242_v13 }
 0x9e1   :  { %v3287_v52 = vrot.slane %v3282_v41, %v6160_v51 }
 0x9e2   :  { %v3298_v62 = vpop.permute.xlu1 %3297 }
 0x9e3   :  { %3288 = vrot.lane.b32.xlu0 %v3287_v52, %s4325_s13 }
 0xa55   :  { %v3289_v6 = vpop.permute.xlu0 %3288 }
 0xa56   :  { %v3291_v8 = vmul.f32 %v3289_v6, %v3252_v3  ;;  %v4238_v3 = vld [vmem:[%s6966_s10] sm:$0xff]   ;;  %s3530_s10 = sshll.u32 %s4328_s2, 4  ;;  %s3531_s10 = int_to_ptr.vmem [resolvable:$true] %s3530_s10 }
 0xa57   :  { %3692 = vmatpush3.bf16.msra.mxu0 %v4238_v3  ;;  %s4259_s16 = scalar_lea.vmem %s3531_s10, 32  ;;  %p4264_p1 = scmp.lt.s32.totalorder %s3531_s10, %s3531_s10 }
 0xa58   :  { %v3300_v4 = vadd.f32 %v3298_v62, %v3291_v8  ;;  %p4260_p0 = scmp.ne.s32.totalorder %s3531_s10, %s4259_s16  ;;  %p4265_p2 = scmp.lt.s32.totalorder %s4259_s16, %s4259_s16 }
 0xa5a   :  { %v3301_v17 = vmax.f32 %v3300_v4, 0.0  ;;  %p4266_p3 = por %p4265_p2, %p4264_p1 }
 0xa5c   :  { %v3303_v45 = vpack.c.bf16 %v3301_v17, %v3301_v17  ;;  %p4267_p4 = pnand %p4266_p3, %p4260_p0 }
 0xa5e   :  { %v3309_v5 = vsel %vm2416_vm14, %v3303_v45, 0 }
 0xa5f   :  { %3680 = vmatpush3.bf16.msra.mxu1 %v3309_v5 }
 0xa60   :  { %3685 = vmatprep.subr.bf16.mxu1 %v7213_v7 }
 0xa62   :  { %3682 = vmatmul.mubr.msk.bf16.vlgmr.msra.gmra.mxu1 %vm3304_vm2, %v3302_v12 }
 0xa63   :  { %3687 = vmatprep.mubr.msk.bf16.mxu1 %vm4315_vm13, %v7213_v7  ;;  %3686 = vmatpush3.bf16.msra.mxu1 %v3363_v60 }
 0xb22   :  { %v3345_v37 = vpop.f32.mrf.mxu1 }
 0xb23   :  { %v3351_v21 = vpack.c.bf16 %v3345_v37, %v3345_v37 }
 0xb24   :  { %v3683_v1 = vpop.f32.mrf.mxu1 }
 0xb25   :  { %3688 = vmatmul.mubr.msk.bf16.vlgmr.msra.gmra.mxu1 %vm1715_vm8, %v3351_v21 }
 0xb26   :  { %v3348_v49 = vpop.f32.mrf.mxu1 }
 0xb28   :  { %v3684_v54 = vpop.f32.mrf.mxu1 }
 0xbe5   :  { %v3399_v33 = vpop.f32.mrf.mxu1 }
 0xbe6   :  { %v3407_v50 = vsel %vm3406_vm4, %v3399_v33, 0.0 }
 0xbe7   :  { %v3408_v58 = vrot.slane %v3407_v50, 4  ;;  %v3689_v31 = vpop.f32.mrf.mxu1 }
 0xbe9   :  { %v3409_v7 = vadd.f32 %v3408_v58, %v3407_v50  ;;  %v3402_v56 = vpop.f32.mrf.mxu1 }
 0xbeb   :  { %v3410_v43 = vrot.slane %v3409_v7, 2  ;;  %v3690_v35 = vpop.f32.mrf.mxu1 }
 0xbed   :  { %v3411_v28 = vadd.f32 %v3410_v43, %v3409_v7 }
 0xbef   :  { %v3412_v11 = vrot.slane %v3411_v28, 1 }
 0xbf1   :  { %v3413_v61 = vadd.f32 %v3412_v11, %v3411_v28 }
 0xbf3   :  { %v3415_v19 = vmul.f32 0.5, %v3413_v61 }
 0xbf5   :  { %v3416_v15 = vsub.f32 %v3399_v33, %v3415_v19 }
 0xbf7   :  { %v3417_v18 = vmul.f32 %v3416_v15, %v3416_v15 }
 0xbf9   :  { %v3418_v10 = vsel %vm3406_vm4, %v3417_v18, 0.0 }
 0xbfa   :  { %v3419_v27 = vrot.slane %v3418_v10, 4 }
 0xbfc   :  { %v3420_v55 = vadd.f32 %v3419_v27, %v3418_v10 }
 0xbfe   :  { %v3421_v40 = vrot.slane %v3420_v55, 2 }
 0xc00   :  { %v3422_v26 = vadd.f32 %v3421_v40, %v3420_v55 }
 0xc02   :  { %v3423_v9 = vrot.slane %v3422_v26, 1 }
 0xc04   :  { %v3424_v59 = vadd.f32 %v3423_v9, %v3422_v26 }
 0xc06   :  { %v3425_v25 = vmul.f32 0.5, %v3424_v59 }
 0xc08   :  { %v3426_v14 = vadd.f32 1e-05, %v3425_v25 }
 0xc0a   :  { %4245 = vrsqrt.f32 %v3426_v14 }
 0xc17   :  { %v4246_v2 = vpop.eup %4245 }
 0xc18   :  { %v3435_v47 = vrot.slane %v4246_v2, %v6823_v57 }
 0xc1a   :  { %v3442_v53 = vrot.slane %v3435_v47, %v6823_v57 }
 0xc1c   :  { %3443 = vrot.lane.b32.xlu0 %v3442_v53, %s4311_s29 }
 0xc20   :  { %3461 = vrot.lane.b32.xlu0 %v3460_v20, %s4326_s28 }
 0xc8e   :  { %v3444_v23 = vpop.permute.xlu0 %3443 }
 0xc8f   :  { %v3446_v44 = vmul.f32 %v3444_v23, %v3405_v29 }
 0xc91   :  { %v3451_v46 = vrot.slane %v3446_v44, %v6160_v51 }
 0xc92   :  { %v3462_v24 = vpop.permute.xlu0 %3461 }
 0xc93   :  { %3452 = vrot.lane.b32.xlu1 %v3451_v46, %s4327_s12 }
 0xc97   :  { %3475 = vrot.lane.b32.xlu1 %v3460_v20, %s4311_s29 }
 0xd05   :  { %v3453_v57 = vpop.permute.xlu1 %3452 }
 0xd06   :  { %v3455_v22 = vmul.f32 %v3453_v57, %v3416_v15 }
 0xd08   :  { %v3464_v39 = vadd.f32 %v3462_v24, %v3455_v22 }
 0xd09   :  { %v3476_v0 = vpop.permute.xlu1 %3475 }
 0xd0a   :  { %v3465_v36 = vmax.f32 %v3464_v39, 0.0 }
 0xd0c   :  { %v3466_v63 = vpack.c.bf16 %v3465_v36, %v3465_v36 }
 0xd0e   :  { %3694 = vmatmul.mubr.msk.bf16.vlgmr.msra.gmra.mxu0 %vm3478_vm3, %v3466_v63 }
 0xdce   :  { %v3516_v48 = vpop.f32.mrf.mxu0 }
 0xdcf   :  { %v3517_v30 = vadd.f32 %v3516_v48, %v3476_v0 }
 0xdd0   :  { %v3695_v51 = vpop.f32.mrf.mxu0 }
 0xdd1   :  { %3523 = vst.msk [vmem:[#allocation2] sm:$0x3] %vm3522_vm6, %v3517_v30 }
 0xdd2   :  { %v3519_v32 = vpop.f32.mrf.mxu0 }
 0xdd3   :  { %4270 = shalt.err (!%p4267_p4)
}
 0xdd4   :  { %3533 = dma.vmem_to_hbm [thread:$0]  %s3531_s10, 32, %s6967_s11, [#allocation3]   ;;  %v3696_v42 = vpop.f32.mrf.mxu0 }
 0xdd5   :  { %4279 = dma.done.wait [#allocation3], 32  }
 0xdd6   :  { %4280 = vsyncadd [#allocation3], 4294967264 }
 0xdd7   :  { %3537 = vsyncpa [#allocation3], 1 }

</bundles_post_ra>
